<compile_context>
chip_gen: v5e
topology: v5e:2x2
jax: 0.10.0
libtpu: 0.0.40
codegen_flags: <defaults>
</compile_context>

<pallas_src>
import functools

import jax
import jax.numpy as jnp
from jax.experimental import pallas as pl
from jax.experimental.pallas import tpu as pltpu

# Layer widths of DeepHighwayNetwork(nin)
_WIDTHS = [400, 300, 300, 300, 200, 200, 200, 100, 100, 100, 50, 50, 50, 10]


def _layer_dims(nin):
    dims = [nin] + _WIDTHS
    return list(zip(dims[:-1], dims[1:]))  # 14 (fan_in, fan_out) pairs


def _round_up(x, m):
    return (x + m - 1) // m * m


def fused_highway_kernel(*refs, num_layers):
    """All highway layers fused; refs = (x, w_0..w_{L-1}, bias, out)."""
    x_ref = refs[0]
    w_refs = refs[1:1 + num_layers]
    bias_ref = refs[1 + num_layers]          # [L, max_padded_width] f32
    o_ref = refs[2 + num_layers]

    x = x_ref[...]                           # bf16 on entry; f32 after layer 0
    for i in range(num_layers):              # static, fully unrolled layer loop
        w = w_refs[i][...]                   # bf16 [pd_in, pd_out], VMEM-resident
        pd_out = w.shape[1]
        brow = bias_ref[i, :]                # f32 (max_pd,)
        b = brow[:pd_out][None, :]           # f32 (1, pd_out)

        xb = x if x.dtype == jnp.bfloat16 else x.astype(jnp.bfloat16)
        h = jnp.dot(xb, w, preferred_element_type=jnp.float32) + b  # f32 acc

        # One transcendental: t = tanh(h/2); derive both branches from it.
        t = jnp.tanh(0.5 * h)
        g = 0.5 * (1.0 + t)                                  # sigmoid(h)  (VPU)
        nl = (2.0 * t) * pl.reciprocal(1.0 + t * t, approx=True)  # tanh(h) (EUP)
        x = h + g * (nl - h)                                 # gated highway mix
    o_ref[...] = x


def init_params(key, nin):
    """Deterministic f32 parameter init (uniform, PyTorch Linear default scale).

    Returns a list of (w [fan_in, fan_out], b [fan_out]) in f32, unpadded.
    """
    params = []
    for (fi, fo) in _layer_dims(nin):
        key, kw, kb = jax.random.split(key, 3)
        bound = 1.0 / jnp.sqrt(jnp.float32(fi))
        w = jax.random.uniform(kw, (fi, fo), jnp.float32, -bound, bound)
        b = jax.random.uniform(kb, (fo,), jnp.float32, -bound, bound)
        params.append((w, b))
    return params


def prepare_params(params, nin):
    """Pad to 128-lane multiples and cast weights to bf16 ONCE (outside jit).

    Returns (tuple of padded bf16 weights, coalesced [L, max_pd] f32 bias).
    # TODO(synk): optional int8 weight path for v5e/v6e (no int MXU on v7x).
    """
    dims = [nin] + [w.shape[1] for (w, _) in params]
    pdims = [_round_up(d, 128) for d in dims]
    max_pd = max(pdims[1:])
    wps, brows = [], []
    for i, (w, b) in enumerate(params):
        fi, fo = w.shape
        wp = jnp.zeros((pdims[i], pdims[i + 1]), jnp.bfloat16)
        wp = wp.at[:fi, :fo].set(w.astype(jnp.bfloat16))
        wps.append(wp)
        brows.append(jnp.zeros((max_pd,), jnp.float32).at[:fo].set(b))
    return tuple(wps), jnp.stack(brows)      # weights tuple, bias [L, max_pd]


@functools.partial(jax.jit, static_argnames=("out_dim",))
def deep_highway_forward(x, wps, bias, *, out_dim):
    B, nin = x.shape
    n = len(wps)
    pd_in = wps[0].shape[0]
    pd_out_final = wps[-1].shape[1]

    # Batch-tile selection:
    #  - tiny batch: one 16-aligned tile (bf16 sublane friendly)
    #  - B > 128: at least 2 grid steps so "parallel" can use both v7x TCs
    #  - large batch: TB=512 to amortize per-step overhead with bf16 matmuls
    if B <= 128:
        TB = _round_up(max(B, 16), 16)
    elif B <= 512:
        TB = 128
    else:
        TB = 512
    Bp = _round_up(B, TB)

    # Only the activation is padded per call (params were pre-padded once).
    xp = jnp.zeros((Bp, pd_in), jnp.bfloat16).at[:B, :nin].set(
        x.astype(jnp.bfloat16))

    grid = (Bp // TB,)
    in_specs = (
        [pl.BlockSpec((TB, pd_in), lambda i: (i, 0))]                  # activation tile
        + [pl.BlockSpec(w.shape, lambda i: (0, 0)) for w in wps]       # weights: VMEM-resident
        + [pl.BlockSpec(bias.shape, lambda i: (0, 0))]                 # coalesced biases
    )
    out_spec = pl.BlockSpec((TB, pd_out_final), lambda i: (i, 0))

    out_padded = pl.pallas_call(
        functools.partial(fused_highway_kernel, num_layers=n),
        out_shape=jax.ShapeDtypeStruct((Bp, pd_out_final), jnp.float32),
        grid_spec=pltpu.PrefetchScalarGridSpec(
            num_scalar_prefetch=0,
            grid=grid,
            in_specs=in_specs,
            out_specs=out_spec,
        ),
        compiler_params=pltpu.CompilerParams(
            dimension_semantics=("parallel",),
            vmem_limit_bytes=40 * 1024 * 1024,
        ),
    )(xp, *wps, bias)

    return out_padded[:B, :out_dim]


if __name__ == "__main__":
    key = jax.random.PRNGKey(0)
    nin = 32
    batch = 4

    kx, kp = jax.random.split(key)
    x = jax.random.normal(kx, (batch, nin), dtype=jnp.float32)
    params = init_params(kp, nin)

    wps, bias = prepare_params(params, nin)        # one-time pad + bf16 cast
    out = deep_highway_forward(x, wps, bias, out_dim=_WIDTHS[-1])
    out = jax.block_until_ready(out)

    # Pure-JAX reference with the SAME bf16-quantized weights (f32 accumulation,
    # canonical sigmoid/tanh), so the check isolates kernel correctness from the
    # intentional bf16 weight quantization.
    def ref(x, params):
        for (w, b) in params:
            h = jnp.dot(x.astype(jnp.bfloat16), w.astype(jnp.bfloat16),
                        preferred_element_type=jnp.float32) + b
            g = jax.nn.sigmoid(h)
            x = g * jnp.tanh(h) + (1.0 - g) * h
        return x

    r = ref(x, params)
    assert out.shape == (batch, _WIDTHS[-1]), out.shape
    err = float(jnp.max(jnp.abs(out - r)))
    assert jnp.allclose(out, r, atol=5e-3, rtol=5e-3), err

    print("KERNEL_OK")
</pallas_src>

<mosaic_0001>
module attributes {stable_mosaic.version = 11 : i64} {
  func.func @fused_highway_kernel(%arg0: i32, %arg1: memref<16x128xbf16, #tpu.memory_space<vmem>>, %arg2: memref<128x512xbf16, #tpu.memory_space<vmem>>, %arg3: memref<512x384xbf16, #tpu.memory_space<vmem>>, %arg4: memref<384x384xbf16, #tpu.memory_space<vmem>>, %arg5: memref<384x384xbf16, #tpu.memory_space<vmem>>, %arg6: memref<384x256xbf16, #tpu.memory_space<vmem>>, %arg7: memref<256x256xbf16, #tpu.memory_space<vmem>>, %arg8: memref<256x256xbf16, #tpu.memory_space<vmem>>, %arg9: memref<256x128xbf16, #tpu.memory_space<vmem>>, %arg10: memref<128x128xbf16, #tpu.memory_space<vmem>>, %arg11: memref<128x128xbf16, #tpu.memory_space<vmem>>, %arg12: memref<128x128xbf16, #tpu.memory_space<vmem>>, %arg13: memref<128x128xbf16, #tpu.memory_space<vmem>>, %arg14: memref<128x128xbf16, #tpu.memory_space<vmem>>, %arg15: memref<128x128xbf16, #tpu.memory_space<vmem>>, %arg16: memref<14x512xf32, #tpu.memory_space<vmem>>, %arg17: memref<16x128xf32, #tpu.memory_space<vmem>>) attributes {dimension_semantics = [#tpu.dimension_semantics<parallel>], iteration_bounds = array<i64: 1>, scalar_prefetch = 0 : i64, scratch_operands = 0 : i64, tpu.core_type = #tpu.core_type<tc>, window_params = [{transform_indices = @transform_0, window_bounds = array<i64: 16, 128>}, {pipeline_mode = #tpu.pipeline_mode<synchronous>, transform_indices = @transform_1, window_bounds = array<i64: 128, 512>}, {pipeline_mode = #tpu.pipeline_mode<synchronous>, transform_indices = @transform_2, window_bounds = array<i64: 512, 384>}, {pipeline_mode = #tpu.pipeline_mode<synchronous>, transform_indices = @transform_3, window_bounds = array<i64: 384, 384>}, {pipeline_mode = #tpu.pipeline_mode<synchronous>, transform_indices = @transform_4, window_bounds = array<i64: 384, 384>}, {pipeline_mode = #tpu.pipeline_mode<synchronous>, transform_indices = @transform_5, window_bounds = array<i64: 384, 256>}, {pipeline_mode = #tpu.pipeline_mode<synchronous>, transform_indices = @transform_6, window_bounds = array<i64: 256, 256>}, {pipeline_mode = #tpu.pipeline_mode<synchronous>, transform_indices = @transform_7, window_bounds = array<i64: 256, 256>}, {pipeline_mode = #tpu.pipeline_mode<synchronous>, transform_indices = @transform_8, window_bounds = array<i64: 256, 128>}, {pipeline_mode = #tpu.pipeline_mode<synchronous>, transform_indices = @transform_9, window_bounds = array<i64: 128, 128>}, {pipeline_mode = #tpu.pipeline_mode<synchronous>, transform_indices = @transform_10, window_bounds = array<i64: 128, 128>}, {pipeline_mode = #tpu.pipeline_mode<synchronous>, transform_indices = @transform_11, window_bounds = array<i64: 128, 128>}, {pipeline_mode = #tpu.pipeline_mode<synchronous>, transform_indices = @transform_12, window_bounds = array<i64: 128, 128>}, {pipeline_mode = #tpu.pipeline_mode<synchronous>, transform_indices = @transform_13, window_bounds = array<i64: 128, 128>}, {pipeline_mode = #tpu.pipeline_mode<synchronous>, transform_indices = @transform_14, window_bounds = array<i64: 128, 128>}, {pipeline_mode = #tpu.pipeline_mode<synchronous>, transform_indices = @transform_15, window_bounds = array<i64: 14, 512>}, {transform_indices = @transform_16, window_bounds = array<i64: 16, 128>}]} {
    %c0 = arith.constant 0 : index
    %c0_0 = arith.constant 0 : index
    %0 = vector.load %arg1[%c0, %c0_0] : memref<16x128xbf16, #tpu.memory_space<vmem>>, vector<16x128xbf16>
    %c0_1 = arith.constant 0 : index
    %c0_2 = arith.constant 0 : index
    %1 = vector.load %arg2[%c0_1, %c0_2] : memref<128x512xbf16, #tpu.memory_space<vmem>>, vector<128x512xbf16>
    %c0_3 = arith.constant 0 : index
    %c0_4 = arith.constant 0 : index
    %2 = vector.load %arg16[%c0_3, %c0_4] : memref<14x512xf32, #tpu.memory_space<vmem>>, vector<1x512xf32>
    %3 = vector.shape_cast %2 : vector<1x512xf32> to vector<512xf32>
    %4 = vector.shape_cast %3 : vector<512xf32> to vector<1x512xf32>
    %cst = arith.constant dense<0.000000e+00> : vector<16x512xf32>
    %5 = tpu.matmul %0, %1, %cst {dimension_numbers = #tpu.dot_dimension_numbers<[1], [0], [0], [1], [0, 0, 1, 1], [], []>} : vector<16x128xbf16>, vector<128x512xbf16>, vector<16x512xf32> -> vector<16x512xf32>
    %6 = vector.broadcast %4 : vector<1x512xf32> to vector<16x512xf32>
    %7 = arith.addf %5, %6 : vector<16x512xf32>
    %cst_5 = arith.constant 5.000000e-01 : f32
    %8 = vector.broadcast %cst_5 : f32 to vector<16x512xf32>
    %9 = arith.mulf %8, %7 : vector<16x512xf32>
    %10 = math.tanh %9 : vector<16x512xf32>
    %cst_6 = arith.constant 1.000000e+00 : f32
    %11 = vector.broadcast %cst_6 : f32 to vector<16x512xf32>
    %12 = arith.addf %11, %10 : vector<16x512xf32>
    %cst_7 = arith.constant 5.000000e-01 : f32
    %13 = vector.broadcast %cst_7 : f32 to vector<16x512xf32>
    %14 = arith.mulf %13, %12 : vector<16x512xf32>
    %cst_8 = arith.constant 2.000000e+00 : f32
    %15 = vector.broadcast %cst_8 : f32 to vector<16x512xf32>
    %16 = arith.mulf %15, %10 : vector<16x512xf32>
    %17 = arith.mulf %10, %10 : vector<16x512xf32>
    %cst_9 = arith.constant 1.000000e+00 : f32
    %18 = vector.broadcast %cst_9 : f32 to vector<16x512xf32>
    %19 = arith.addf %18, %17 : vector<16x512xf32>
    %20 = tpu.reciprocal %19 {approx = true} : vector<16x512xf32> -> vector<16x512xf32>
    %21 = arith.mulf %16, %20 : vector<16x512xf32>
    %22 = arith.subf %21, %7 : vector<16x512xf32>
    %23 = arith.mulf %14, %22 : vector<16x512xf32>
    %24 = arith.addf %7, %23 : vector<16x512xf32>
    %c0_10 = arith.constant 0 : index
    %c0_11 = arith.constant 0 : index
    %25 = vector.load %arg3[%c0_10, %c0_11] : memref<512x384xbf16, #tpu.memory_space<vmem>>, vector<512x384xbf16>
    %c1 = arith.constant 1 : index
    %c0_12 = arith.constant 0 : index
    %26 = vector.load %arg16[%c1, %c0_12] : memref<14x512xf32, #tpu.memory_space<vmem>>, vector<1x512xf32>
    %27 = vector.shape_cast %26 : vector<1x512xf32> to vector<512xf32>
    %28 = vector.extract_strided_slice %27 {offsets = [0], sizes = [384], strides = [1]} : vector<512xf32> to vector<384xf32>
    %29 = vector.shape_cast %28 : vector<384xf32> to vector<1x384xf32>
    %30 = arith.truncf %24 : vector<16x512xf32> to vector<16x512xbf16>
    %cst_13 = arith.constant dense<0.000000e+00> : vector<16x384xf32>
    %31 = tpu.matmul %30, %25, %cst_13 {dimension_numbers = #tpu.dot_dimension_numbers<[1], [0], [0], [1], [0, 0, 1, 1], [], []>} : vector<16x512xbf16>, vector<512x384xbf16>, vector<16x384xf32> -> vector<16x384xf32>
    %32 = vector.broadcast %29 : vector<1x384xf32> to vector<16x384xf32>
    %33 = arith.addf %31, %32 : vector<16x384xf32>
    %cst_14 = arith.constant 5.000000e-01 : f32
    %34 = vector.broadcast %cst_14 : f32 to vector<16x384xf32>
    %35 = arith.mulf %34, %33 : vector<16x384xf32>
    %36 = math.tanh %35 : vector<16x384xf32>
    %cst_15 = arith.constant 1.000000e+00 : f32
    %37 = vector.broadcast %cst_15 : f32 to vector<16x384xf32>
    %38 = arith.addf %37, %36 : vector<16x384xf32>
    %cst_16 = arith.constant 5.000000e-01 : f32
    %39 = vector.broadcast %cst_16 : f32 to vector<16x384xf32>
    %40 = arith.mulf %39, %38 : vector<16x384xf32>
    %cst_17 = arith.constant 2.000000e+00 : f32
    %41 = vector.broadcast %cst_17 : f32 to vector<16x384xf32>
    %42 = arith.mulf %41, %36 : vector<16x384xf32>
    %43 = arith.mulf %36, %36 : vector<16x384xf32>
    %cst_18 = arith.constant 1.000000e+00 : f32
    %44 = vector.broadcast %cst_18 : f32 to vector<16x384xf32>
    %45 = arith.addf %44, %43 : vector<16x384xf32>
    %46 = tpu.reciprocal %45 {approx = true} : vector<16x384xf32> -> vector<16x384xf32>
    %47 = arith.mulf %42, %46 : vector<16x384xf32>
    %48 = arith.subf %47, %33 : vector<16x384xf32>
    %49 = arith.mulf %40, %48 : vector<16x384xf32>
    %50 = arith.addf %33, %49 : vector<16x384xf32>
    %c0_19 = arith.constant 0 : index
    %c0_20 = arith.constant 0 : index
    %51 = vector.load %arg4[%c0_19, %c0_20] : memref<384x384xbf16, #tpu.memory_space<vmem>>, vector<384x384xbf16>
    %c2 = arith.constant 2 : index
    %c0_21 = arith.constant 0 : index
    %52 = vector.load %arg16[%c2, %c0_21] : memref<14x512xf32, #tpu.memory_space<vmem>>, vector<1x512xf32>
    %53 = vector.shape_cast %52 : vector<1x512xf32> to vector<512xf32>
    %54 = vector.extract_strided_slice %53 {offsets = [0], sizes = [384], strides = [1]} : vector<512xf32> to vector<384xf32>
    %55 = vector.shape_cast %54 : vector<384xf32> to vector<1x384xf32>
    %56 = arith.truncf %50 : vector<16x384xf32> to vector<16x384xbf16>
    %cst_22 = arith.constant dense<0.000000e+00> : vector<16x384xf32>
    %57 = tpu.matmul %56, %51, %cst_22 {dimension_numbers = #tpu.dot_dimension_numbers<[1], [0], [0], [1], [0, 0, 1, 1], [], []>} : vector<16x384xbf16>, vector<384x384xbf16>, vector<16x384xf32> -> vector<16x384xf32>
    %58 = vector.broadcast %55 : vector<1x384xf32> to vector<16x384xf32>
    %59 = arith.addf %57, %58 : vector<16x384xf32>
    %cst_23 = arith.constant 5.000000e-01 : f32
    %60 = vector.broadcast %cst_23 : f32 to vector<16x384xf32>
    %61 = arith.mulf %60, %59 : vector<16x384xf32>
    %62 = math.tanh %61 : vector<16x384xf32>
    %cst_24 = arith.constant 1.000000e+00 : f32
    %63 = vector.broadcast %cst_24 : f32 to vector<16x384xf32>
    %64 = arith.addf %63, %62 : vector<16x384xf32>
    %cst_25 = arith.constant 5.000000e-01 : f32
    %65 = vector.broadcast %cst_25 : f32 to vector<16x384xf32>
    %66 = arith.mulf %65, %64 : vector<16x384xf32>
    %cst_26 = arith.constant 2.000000e+00 : f32
    %67 = vector.broadcast %cst_26 : f32 to vector<16x384xf32>
    %68 = arith.mulf %67, %62 : vector<16x384xf32>
    %69 = arith.mulf %62, %62 : vector<16x384xf32>
    %cst_27 = arith.constant 1.000000e+00 : f32
    %70 = vector.broadcast %cst_27 : f32 to vector<16x384xf32>
    %71 = arith.addf %70, %69 : vector<16x384xf32>
    %72 = tpu.reciprocal %71 {approx = true} : vector<16x384xf32> -> vector<16x384xf32>
    %73 = arith.mulf %68, %72 : vector<16x384xf32>
    %74 = arith.subf %73, %59 : vector<16x384xf32>
    %75 = arith.mulf %66, %74 : vector<16x384xf32>
    %76 = arith.addf %59, %75 : vector<16x384xf32>
    %c0_28 = arith.constant 0 : index
    %c0_29 = arith.constant 0 : index
    %77 = vector.load %arg5[%c0_28, %c0_29] : memref<384x384xbf16, #tpu.memory_space<vmem>>, vector<384x384xbf16>
    %c3 = arith.constant 3 : index
    %c0_30 = arith.constant 0 : index
    %78 = vector.load %arg16[%c3, %c0_30] : memref<14x512xf32, #tpu.memory_space<vmem>>, vector<1x512xf32>
    %79 = vector.shape_cast %78 : vector<1x512xf32> to vector<512xf32>
    %80 = vector.extract_strided_slice %79 {offsets = [0], sizes = [384], strides = [1]} : vector<512xf32> to vector<384xf32>
    %81 = vector.shape_cast %80 : vector<384xf32> to vector<1x384xf32>
    %82 = arith.truncf %76 : vector<16x384xf32> to vector<16x384xbf16>
    %cst_31 = arith.constant dense<0.000000e+00> : vector<16x384xf32>
    %83 = tpu.matmul %82, %77, %cst_31 {dimension_numbers = #tpu.dot_dimension_numbers<[1], [0], [0], [1], [0, 0, 1, 1], [], []>} : vector<16x384xbf16>, vector<384x384xbf16>, vector<16x384xf32> -> vector<16x384xf32>
    %84 = vector.broadcast %81 : vector<1x384xf32> to vector<16x384xf32>
    %85 = arith.addf %83, %84 : vector<16x384xf32>
    %cst_32 = arith.constant 5.000000e-01 : f32
    %86 = vector.broadcast %cst_32 : f32 to vector<16x384xf32>
    %87 = arith.mulf %86, %85 : vector<16x384xf32>
    %88 = math.tanh %87 : vector<16x384xf32>
    %cst_33 = arith.constant 1.000000e+00 : f32
    %89 = vector.broadcast %cst_33 : f32 to vector<16x384xf32>
    %90 = arith.addf %89, %88 : vector<16x384xf32>
    %cst_34 = arith.constant 5.000000e-01 : f32
    %91 = vector.broadcast %cst_34 : f32 to vector<16x384xf32>
    %92 = arith.mulf %91, %90 : vector<16x384xf32>
    %cst_35 = arith.constant 2.000000e+00 : f32
    %93 = vector.broadcast %cst_35 : f32 to vector<16x384xf32>
    %94 = arith.mulf %93, %88 : vector<16x384xf32>
    %95 = arith.mulf %88, %88 : vector<16x384xf32>
    %cst_36 = arith.constant 1.000000e+00 : f32
    %96 = vector.broadcast %cst_36 : f32 to vector<16x384xf32>
    %97 = arith.addf %96, %95 : vector<16x384xf32>
    %98 = tpu.reciprocal %97 {approx = true} : vector<16x384xf32> -> vector<16x384xf32>
    %99 = arith.mulf %94, %98 : vector<16x384xf32>
    %100 = arith.subf %99, %85 : vector<16x384xf32>
    %101 = arith.mulf %92, %100 : vector<16x384xf32>
    %102 = arith.addf %85, %101 : vector<16x384xf32>
    %c0_37 = arith.constant 0 : index
    %c0_38 = arith.constant 0 : index
    %103 = vector.load %arg6[%c0_37, %c0_38] : memref<384x256xbf16, #tpu.memory_space<vmem>>, vector<384x256xbf16>
    %c4 = arith.constant 4 : index
    %c0_39 = arith.constant 0 : index
    %104 = vector.load %arg16[%c4, %c0_39] : memref<14x512xf32, #tpu.memory_space<vmem>>, vector<1x512xf32>
    %105 = vector.shape_cast %104 : vector<1x512xf32> to vector<512xf32>
    %106 = vector.extract_strided_slice %105 {offsets = [0], sizes = [256], strides = [1]} : vector<512xf32> to vector<256xf32>
    %107 = vector.shape_cast %106 : vector<256xf32> to vector<1x256xf32>
    %108 = arith.truncf %102 : vector<16x384xf32> to vector<16x384xbf16>
    %cst_40 = arith.constant dense<0.000000e+00> : vector<16x256xf32>
    %109 = tpu.matmul %108, %103, %cst_40 {dimension_numbers = #tpu.dot_dimension_numbers<[1], [0], [0], [1], [0, 0, 1, 1], [], []>} : vector<16x384xbf16>, vector<384x256xbf16>, vector<16x256xf32> -> vector<16x256xf32>
    %110 = vector.broadcast %107 : vector<1x256xf32> to vector<16x256xf32>
    %111 = arith.addf %109, %110 : vector<16x256xf32>
    %cst_41 = arith.constant 5.000000e-01 : f32
    %112 = vector.broadcast %cst_41 : f32 to vector<16x256xf32>
    %113 = arith.mulf %112, %111 : vector<16x256xf32>
    %114 = math.tanh %113 : vector<16x256xf32>
    %cst_42 = arith.constant 1.000000e+00 : f32
    %115 = vector.broadcast %cst_42 : f32 to vector<16x256xf32>
    %116 = arith.addf %115, %114 : vector<16x256xf32>
    %cst_43 = arith.constant 5.000000e-01 : f32
    %117 = vector.broadcast %cst_43 : f32 to vector<16x256xf32>
    %118 = arith.mulf %117, %116 : vector<16x256xf32>
    %cst_44 = arith.constant 2.000000e+00 : f32
    %119 = vector.broadcast %cst_44 : f32 to vector<16x256xf32>
    %120 = arith.mulf %119, %114 : vector<16x256xf32>
    %121 = arith.mulf %114, %114 : vector<16x256xf32>
    %cst_45 = arith.constant 1.000000e+00 : f32
    %122 = vector.broadcast %cst_45 : f32 to vector<16x256xf32>
    %123 = arith.addf %122, %121 : vector<16x256xf32>
    %124 = tpu.reciprocal %123 {approx = true} : vector<16x256xf32> -> vector<16x256xf32>
    %125 = arith.mulf %120, %124 : vector<16x256xf32>
    %126 = arith.subf %125, %111 : vector<16x256xf32>
    %127 = arith.mulf %118, %126 : vector<16x256xf32>
    %128 = arith.addf %111, %127 : vector<16x256xf32>
    %c0_46 = arith.constant 0 : index
    %c0_47 = arith.constant 0 : index
    %129 = vector.load %arg7[%c0_46, %c0_47] : memref<256x256xbf16, #tpu.memory_space<vmem>>, vector<256x256xbf16>
    %c5 = arith.constant 5 : index
    %c0_48 = arith.constant 0 : index
    %130 = vector.load %arg16[%c5, %c0_48] : memref<14x512xf32, #tpu.memory_space<vmem>>, vector<1x512xf32>
    %131 = vector.shape_cast %130 : vector<1x512xf32> to vector<512xf32>
    %132 = vector.extract_strided_slice %131 {offsets = [0], sizes = [256], strides = [1]} : vector<512xf32> to vector<256xf32>
    %133 = vector.shape_cast %132 : vector<256xf32> to vector<1x256xf32>
    %134 = arith.truncf %128 : vector<16x256xf32> to vector<16x256xbf16>
    %cst_49 = arith.constant dense<0.000000e+00> : vector<16x256xf32>
    %135 = tpu.matmul %134, %129, %cst_49 {dimension_numbers = #tpu.dot_dimension_numbers<[1], [0], [0], [1], [0, 0, 1, 1], [], []>} : vector<16x256xbf16>, vector<256x256xbf16>, vector<16x256xf32> -> vector<16x256xf32>
    %136 = vector.broadcast %133 : vector<1x256xf32> to vector<16x256xf32>
    %137 = arith.addf %135, %136 : vector<16x256xf32>
    %cst_50 = arith.constant 5.000000e-01 : f32
    %138 = vector.broadcast %cst_50 : f32 to vector<16x256xf32>
    %139 = arith.mulf %138, %137 : vector<16x256xf32>
    %140 = math.tanh %139 : vector<16x256xf32>
    %cst_51 = arith.constant 1.000000e+00 : f32
    %141 = vector.broadcast %cst_51 : f32 to vector<16x256xf32>
    %142 = arith.addf %141, %140 : vector<16x256xf32>
    %cst_52 = arith.constant 5.000000e-01 : f32
    %143 = vector.broadcast %cst_52 : f32 to vector<16x256xf32>
    %144 = arith.mulf %143, %142 : vector<16x256xf32>
    %cst_53 = arith.constant 2.000000e+00 : f32
    %145 = vector.broadcast %cst_53 : f32 to vector<16x256xf32>
    %146 = arith.mulf %145, %140 : vector<16x256xf32>
    %147 = arith.mulf %140, %140 : vector<16x256xf32>
    %cst_54 = arith.constant 1.000000e+00 : f32
    %148 = vector.broadcast %cst_54 : f32 to vector<16x256xf32>
    %149 = arith.addf %148, %147 : vector<16x256xf32>
    %150 = tpu.reciprocal %149 {approx = true} : vector<16x256xf32> -> vector<16x256xf32>
    %151 = arith.mulf %146, %150 : vector<16x256xf32>
    %152 = arith.subf %151, %137 : vector<16x256xf32>
    %153 = arith.mulf %144, %152 : vector<16x256xf32>
    %154 = arith.addf %137, %153 : vector<16x256xf32>
    %c0_55 = arith.constant 0 : index
    %c0_56 = arith.constant 0 : index
    %155 = vector.load %arg8[%c0_55, %c0_56] : memref<256x256xbf16, #tpu.memory_space<vmem>>, vector<256x256xbf16>
    %c6 = arith.constant 6 : index
    %c0_57 = arith.constant 0 : index
    %156 = vector.load %arg16[%c6, %c0_57] : memref<14x512xf32, #tpu.memory_space<vmem>>, vector<1x512xf32>
    %157 = vector.shape_cast %156 : vector<1x512xf32> to vector<512xf32>
    %158 = vector.extract_strided_slice %157 {offsets = [0], sizes = [256], strides = [1]} : vector<512xf32> to vector<256xf32>
    %159 = vector.shape_cast %158 : vector<256xf32> to vector<1x256xf32>
    %160 = arith.truncf %154 : vector<16x256xf32> to vector<16x256xbf16>
    %cst_58 = arith.constant dense<0.000000e+00> : vector<16x256xf32>
    %161 = tpu.matmul %160, %155, %cst_58 {dimension_numbers = #tpu.dot_dimension_numbers<[1], [0], [0], [1], [0, 0, 1, 1], [], []>} : vector<16x256xbf16>, vector<256x256xbf16>, vector<16x256xf32> -> vector<16x256xf32>
    %162 = vector.broadcast %159 : vector<1x256xf32> to vector<16x256xf32>
    %163 = arith.addf %161, %162 : vector<16x256xf32>
    %cst_59 = arith.constant 5.000000e-01 : f32
    %164 = vector.broadcast %cst_59 : f32 to vector<16x256xf32>
    %165 = arith.mulf %164, %163 : vector<16x256xf32>
    %166 = math.tanh %165 : vector<16x256xf32>
    %cst_60 = arith.constant 1.000000e+00 : f32
    %167 = vector.broadcast %cst_60 : f32 to vector<16x256xf32>
    %168 = arith.addf %167, %166 : vector<16x256xf32>
    %cst_61 = arith.constant 5.000000e-01 : f32
    %169 = vector.broadcast %cst_61 : f32 to vector<16x256xf32>
    %170 = arith.mulf %169, %168 : vector<16x256xf32>
    %cst_62 = arith.constant 2.000000e+00 : f32
    %171 = vector.broadcast %cst_62 : f32 to vector<16x256xf32>
    %172 = arith.mulf %171, %166 : vector<16x256xf32>
    %173 = arith.mulf %166, %166 : vector<16x256xf32>
    %cst_63 = arith.constant 1.000000e+00 : f32
    %174 = vector.broadcast %cst_63 : f32 to vector<16x256xf32>
    %175 = arith.addf %174, %173 : vector<16x256xf32>
    %176 = tpu.reciprocal %175 {approx = true} : vector<16x256xf32> -> vector<16x256xf32>
    %177 = arith.mulf %172, %176 : vector<16x256xf32>
    %178 = arith.subf %177, %163 : vector<16x256xf32>
    %179 = arith.mulf %170, %178 : vector<16x256xf32>
    %180 = arith.addf %163, %179 : vector<16x256xf32>
    %c0_64 = arith.constant 0 : index
    %c0_65 = arith.constant 0 : index
    %181 = vector.load %arg9[%c0_64, %c0_65] : memref<256x128xbf16, #tpu.memory_space<vmem>>, vector<256x128xbf16>
    %c7 = arith.constant 7 : index
    %c0_66 = arith.constant 0 : index
    %182 = vector.load %arg16[%c7, %c0_66] : memref<14x512xf32, #tpu.memory_space<vmem>>, vector<1x512xf32>
    %183 = vector.shape_cast %182 : vector<1x512xf32> to vector<512xf32>
    %184 = vector.extract_strided_slice %183 {offsets = [0], sizes = [128], strides = [1]} : vector<512xf32> to vector<128xf32>
    %185 = vector.shape_cast %184 : vector<128xf32> to vector<1x128xf32>
    %186 = arith.truncf %180 : vector<16x256xf32> to vector<16x256xbf16>
    %cst_67 = arith.constant dense<0.000000e+00> : vector<16x128xf32>
    %187 = tpu.matmul %186, %181, %cst_67 {dimension_numbers = #tpu.dot_dimension_numbers<[1], [0], [0], [1], [0, 0, 1, 1], [], []>} : vector<16x256xbf16>, vector<256x128xbf16>, vector<16x128xf32> -> vector<16x128xf32>
    %188 = vector.broadcast %185 : vector<1x128xf32> to vector<16x128xf32>
    %189 = arith.addf %187, %188 : vector<16x128xf32>
    %cst_68 = arith.constant 5.000000e-01 : f32
    %190 = vector.broadcast %cst_68 : f32 to vector<16x128xf32>
    %191 = arith.mulf %190, %189 : vector<16x128xf32>
    %192 = math.tanh %191 : vector<16x128xf32>
    %cst_69 = arith.constant 1.000000e+00 : f32
    %193 = vector.broadcast %cst_69 : f32 to vector<16x128xf32>
    %194 = arith.addf %193, %192 : vector<16x128xf32>
    %cst_70 = arith.constant 5.000000e-01 : f32
    %195 = vector.broadcast %cst_70 : f32 to vector<16x128xf32>
    %196 = arith.mulf %195, %194 : vector<16x128xf32>
    %cst_71 = arith.constant 2.000000e+00 : f32
    %197 = vector.broadcast %cst_71 : f32 to vector<16x128xf32>
    %198 = arith.mulf %197, %192 : vector<16x128xf32>
    %199 = arith.mulf %192, %192 : vector<16x128xf32>
    %cst_72 = arith.constant 1.000000e+00 : f32
    %200 = vector.broadcast %cst_72 : f32 to vector<16x128xf32>
    %201 = arith.addf %200, %199 : vector<16x128xf32>
    %202 = tpu.reciprocal %201 {approx = true} : vector<16x128xf32> -> vector<16x128xf32>
    %203 = arith.mulf %198, %202 : vector<16x128xf32>
    %204 = arith.subf %203, %189 : vector<16x128xf32>
    %205 = arith.mulf %196, %204 : vector<16x128xf32>
    %206 = arith.addf %189, %205 : vector<16x128xf32>
    %c0_73 = arith.constant 0 : index
    %c0_74 = arith.constant 0 : index
    %207 = vector.load %arg10[%c0_73, %c0_74] : memref<128x128xbf16, #tpu.memory_space<vmem>>, vector<128x128xbf16>
    %c8 = arith.constant 8 : index
    %c0_75 = arith.constant 0 : index
    %208 = vector.load %arg16[%c8, %c0_75] : memref<14x512xf32, #tpu.memory_space<vmem>>, vector<1x512xf32>
    %209 = vector.shape_cast %208 : vector<1x512xf32> to vector<512xf32>
    %210 = vector.extract_strided_slice %209 {offsets = [0], sizes = [128], strides = [1]} : vector<512xf32> to vector<128xf32>
    %211 = vector.shape_cast %210 : vector<128xf32> to vector<1x128xf32>
    %212 = arith.truncf %206 : vector<16x128xf32> to vector<16x128xbf16>
    %cst_76 = arith.constant dense<0.000000e+00> : vector<16x128xf32>
    %213 = tpu.matmul %212, %207, %cst_76 {dimension_numbers = #tpu.dot_dimension_numbers<[1], [0], [0], [1], [0, 0, 1, 1], [], []>} : vector<16x128xbf16>, vector<128x128xbf16>, vector<16x128xf32> -> vector<16x128xf32>
    %214 = vector.broadcast %211 : vector<1x128xf32> to vector<16x128xf32>
    %215 = arith.addf %213, %214 : vector<16x128xf32>
    %cst_77 = arith.constant 5.000000e-01 : f32
    %216 = vector.broadcast %cst_77 : f32 to vector<16x128xf32>
    %217 = arith.mulf %216, %215 : vector<16x128xf32>
    %218 = math.tanh %217 : vector<16x128xf32>
    %cst_78 = arith.constant 1.000000e+00 : f32
    %219 = vector.broadcast %cst_78 : f32 to vector<16x128xf32>
    %220 = arith.addf %219, %218 : vector<16x128xf32>
    %cst_79 = arith.constant 5.000000e-01 : f32
    %221 = vector.broadcast %cst_79 : f32 to vector<16x128xf32>
    %222 = arith.mulf %221, %220 : vector<16x128xf32>
    %cst_80 = arith.constant 2.000000e+00 : f32
    %223 = vector.broadcast %cst_80 : f32 to vector<16x128xf32>
    %224 = arith.mulf %223, %218 : vector<16x128xf32>
    %225 = arith.mulf %218, %218 : vector<16x128xf32>
    %cst_81 = arith.constant 1.000000e+00 : f32
    %226 = vector.broadcast %cst_81 : f32 to vector<16x128xf32>
    %227 = arith.addf %226, %225 : vector<16x128xf32>
    %228 = tpu.reciprocal %227 {approx = true} : vector<16x128xf32> -> vector<16x128xf32>
    %229 = arith.mulf %224, %228 : vector<16x128xf32>
    %230 = arith.subf %229, %215 : vector<16x128xf32>
    %231 = arith.mulf %222, %230 : vector<16x128xf32>
    %232 = arith.addf %215, %231 : vector<16x128xf32>
    %c0_82 = arith.constant 0 : index
    %c0_83 = arith.constant 0 : index
    %233 = vector.load %arg11[%c0_82, %c0_83] : memref<128x128xbf16, #tpu.memory_space<vmem>>, vector<128x128xbf16>
    %c9 = arith.constant 9 : index
    %c0_84 = arith.constant 0 : index
    %234 = vector.load %arg16[%c9, %c0_84] : memref<14x512xf32, #tpu.memory_space<vmem>>, vector<1x512xf32>
    %235 = vector.shape_cast %234 : vector<1x512xf32> to vector<512xf32>
    %236 = vector.extract_strided_slice %235 {offsets = [0], sizes = [128], strides = [1]} : vector<512xf32> to vector<128xf32>
    %237 = vector.shape_cast %236 : vector<128xf32> to vector<1x128xf32>
    %238 = arith.truncf %232 : vector<16x128xf32> to vector<16x128xbf16>
    %cst_85 = arith.constant dense<0.000000e+00> : vector<16x128xf32>
    %239 = tpu.matmul %238, %233, %cst_85 {dimension_numbers = #tpu.dot_dimension_numbers<[1], [0], [0], [1], [0, 0, 1, 1], [], []>} : vector<16x128xbf16>, vector<128x128xbf16>, vector<16x128xf32> -> vector<16x128xf32>
    %240 = vector.broadcast %237 : vector<1x128xf32> to vector<16x128xf32>
    %241 = arith.addf %239, %240 : vector<16x128xf32>
    %cst_86 = arith.constant 5.000000e-01 : f32
    %242 = vector.broadcast %cst_86 : f32 to vector<16x128xf32>
    %243 = arith.mulf %242, %241 : vector<16x128xf32>
    %244 = math.tanh %243 : vector<16x128xf32>
    %cst_87 = arith.constant 1.000000e+00 : f32
    %245 = vector.broadcast %cst_87 : f32 to vector<16x128xf32>
    %246 = arith.addf %245, %244 : vector<16x128xf32>
    %cst_88 = arith.constant 5.000000e-01 : f32
    %247 = vector.broadcast %cst_88 : f32 to vector<16x128xf32>
    %248 = arith.mulf %247, %246 : vector<16x128xf32>
    %cst_89 = arith.constant 2.000000e+00 : f32
    %249 = vector.broadcast %cst_89 : f32 to vector<16x128xf32>
    %250 = arith.mulf %249, %244 : vector<16x128xf32>
    %251 = arith.mulf %244, %244 : vector<16x128xf32>
    %cst_90 = arith.constant 1.000000e+00 : f32
    %252 = vector.broadcast %cst_90 : f32 to vector<16x128xf32>
    %253 = arith.addf %252, %251 : vector<16x128xf32>
    %254 = tpu.reciprocal %253 {approx = true} : vector<16x128xf32> -> vector<16x128xf32>
    %255 = arith.mulf %250, %254 : vector<16x128xf32>
    %256 = arith.subf %255, %241 : vector<16x128xf32>
    %257 = arith.mulf %248, %256 : vector<16x128xf32>
    %258 = arith.addf %241, %257 : vector<16x128xf32>
    %c0_91 = arith.constant 0 : index
    %c0_92 = arith.constant 0 : index
    %259 = vector.load %arg12[%c0_91, %c0_92] : memref<128x128xbf16, #tpu.memory_space<vmem>>, vector<128x128xbf16>
    %c10 = arith.constant 10 : index
    %c0_93 = arith.constant 0 : index
    %260 = vector.load %arg16[%c10, %c0_93] : memref<14x512xf32, #tpu.memory_space<vmem>>, vector<1x512xf32>
    %261 = vector.shape_cast %260 : vector<1x512xf32> to vector<512xf32>
    %262 = vector.extract_strided_slice %261 {offsets = [0], sizes = [128], strides = [1]} : vector<512xf32> to vector<128xf32>
    %263 = vector.shape_cast %262 : vector<128xf32> to vector<1x128xf32>
    %264 = arith.truncf %258 : vector<16x128xf32> to vector<16x128xbf16>
    %cst_94 = arith.constant dense<0.000000e+00> : vector<16x128xf32>
    %265 = tpu.matmul %264, %259, %cst_94 {dimension_numbers = #tpu.dot_dimension_numbers<[1], [0], [0], [1], [0, 0, 1, 1], [], []>} : vector<16x128xbf16>, vector<128x128xbf16>, vector<16x128xf32> -> vector<16x128xf32>
    %266 = vector.broadcast %263 : vector<1x128xf32> to vector<16x128xf32>
    %267 = arith.addf %265, %266 : vector<16x128xf32>
    %cst_95 = arith.constant 5.000000e-01 : f32
    %268 = vector.broadcast %cst_95 : f32 to vector<16x128xf32>
    %269 = arith.mulf %268, %267 : vector<16x128xf32>
    %270 = math.tanh %269 : vector<16x128xf32>
    %cst_96 = arith.constant 1.000000e+00 : f32
    %271 = vector.broadcast %cst_96 : f32 to vector<16x128xf32>
    %272 = arith.addf %271, %270 : vector<16x128xf32>
    %cst_97 = arith.constant 5.000000e-01 : f32
    %273 = vector.broadcast %cst_97 : f32 to vector<16x128xf32>
    %274 = arith.mulf %273, %272 : vector<16x128xf32>
    %cst_98 = arith.constant 2.000000e+00 : f32
    %275 = vector.broadcast %cst_98 : f32 to vector<16x128xf32>
    %276 = arith.mulf %275, %270 : vector<16x128xf32>
    %277 = arith.mulf %270, %270 : vector<16x128xf32>
    %cst_99 = arith.constant 1.000000e+00 : f32
    %278 = vector.broadcast %cst_99 : f32 to vector<16x128xf32>
    %279 = arith.addf %278, %277 : vector<16x128xf32>
    %280 = tpu.reciprocal %279 {approx = true} : vector<16x128xf32> -> vector<16x128xf32>
    %281 = arith.mulf %276, %280 : vector<16x128xf32>
    %282 = arith.subf %281, %267 : vector<16x128xf32>
    %283 = arith.mulf %274, %282 : vector<16x128xf32>
    %284 = arith.addf %267, %283 : vector<16x128xf32>
    %c0_100 = arith.constant 0 : index
    %c0_101 = arith.constant 0 : index
    %285 = vector.load %arg13[%c0_100, %c0_101] : memref<128x128xbf16, #tpu.memory_space<vmem>>, vector<128x128xbf16>
    %c11 = arith.constant 11 : index
    %c0_102 = arith.constant 0 : index
    %286 = vector.load %arg16[%c11, %c0_102] : memref<14x512xf32, #tpu.memory_space<vmem>>, vector<1x512xf32>
    %287 = vector.shape_cast %286 : vector<1x512xf32> to vector<512xf32>
    %288 = vector.extract_strided_slice %287 {offsets = [0], sizes = [128], strides = [1]} : vector<512xf32> to vector<128xf32>
    %289 = vector.shape_cast %288 : vector<128xf32> to vector<1x128xf32>
    %290 = arith.truncf %284 : vector<16x128xf32> to vector<16x128xbf16>
    %cst_103 = arith.constant dense<0.000000e+00> : vector<16x128xf32>
    %291 = tpu.matmul %290, %285, %cst_103 {dimension_numbers = #tpu.dot_dimension_numbers<[1], [0], [0], [1], [0, 0, 1, 1], [], []>} : vector<16x128xbf16>, vector<128x128xbf16>, vector<16x128xf32> -> vector<16x128xf32>
    %292 = vector.broadcast %289 : vector<1x128xf32> to vector<16x128xf32>
    %293 = arith.addf %291, %292 : vector<16x128xf32>
    %cst_104 = arith.constant 5.000000e-01 : f32
    %294 = vector.broadcast %cst_104 : f32 to vector<16x128xf32>
    %295 = arith.mulf %294, %293 : vector<16x128xf32>
    %296 = math.tanh %295 : vector<16x128xf32>
    %cst_105 = arith.constant 1.000000e+00 : f32
    %297 = vector.broadcast %cst_105 : f32 to vector<16x128xf32>
    %298 = arith.addf %297, %296 : vector<16x128xf32>
    %cst_106 = arith.constant 5.000000e-01 : f32
    %299 = vector.broadcast %cst_106 : f32 to vector<16x128xf32>
    %300 = arith.mulf %299, %298 : vector<16x128xf32>
    %cst_107 = arith.constant 2.000000e+00 : f32
    %301 = vector.broadcast %cst_107 : f32 to vector<16x128xf32>
    %302 = arith.mulf %301, %296 : vector<16x128xf32>
    %303 = arith.mulf %296, %296 : vector<16x128xf32>
    %cst_108 = arith.constant 1.000000e+00 : f32
    %304 = vector.broadcast %cst_108 : f32 to vector<16x128xf32>
    %305 = arith.addf %304, %303 : vector<16x128xf32>
    %306 = tpu.reciprocal %305 {approx = true} : vector<16x128xf32> -> vector<16x128xf32>
    %307 = arith.mulf %302, %306 : vector<16x128xf32>
    %308 = arith.subf %307, %293 : vector<16x128xf32>
    %309 = arith.mulf %300, %308 : vector<16x128xf32>
    %310 = arith.addf %293, %309 : vector<16x128xf32>
    %c0_109 = arith.constant 0 : index
    %c0_110 = arith.constant 0 : index
    %311 = vector.load %arg14[%c0_109, %c0_110] : memref<128x128xbf16, #tpu.memory_space<vmem>>, vector<128x128xbf16>
    %c12 = arith.constant 12 : index
    %c0_111 = arith.constant 0 : index
    %312 = vector.load %arg16[%c12, %c0_111] : memref<14x512xf32, #tpu.memory_space<vmem>>, vector<1x512xf32>
    %313 = vector.shape_cast %312 : vector<1x512xf32> to vector<512xf32>
    %314 = vector.extract_strided_slice %313 {offsets = [0], sizes = [128], strides = [1]} : vector<512xf32> to vector<128xf32>
    %315 = vector.shape_cast %314 : vector<128xf32> to vector<1x128xf32>
    %316 = arith.truncf %310 : vector<16x128xf32> to vector<16x128xbf16>
    %cst_112 = arith.constant dense<0.000000e+00> : vector<16x128xf32>
    %317 = tpu.matmul %316, %311, %cst_112 {dimension_numbers = #tpu.dot_dimension_numbers<[1], [0], [0], [1], [0, 0, 1, 1], [], []>} : vector<16x128xbf16>, vector<128x128xbf16>, vector<16x128xf32> -> vector<16x128xf32>
    %318 = vector.broadcast %315 : vector<1x128xf32> to vector<16x128xf32>
    %319 = arith.addf %317, %318 : vector<16x128xf32>
    %cst_113 = arith.constant 5.000000e-01 : f32
    %320 = vector.broadcast %cst_113 : f32 to vector<16x128xf32>
    %321 = arith.mulf %320, %319 : vector<16x128xf32>
    %322 = math.tanh %321 : vector<16x128xf32>
    %cst_114 = arith.constant 1.000000e+00 : f32
    %323 = vector.broadcast %cst_114 : f32 to vector<16x128xf32>
    %324 = arith.addf %323, %322 : vector<16x128xf32>
    %cst_115 = arith.constant 5.000000e-01 : f32
    %325 = vector.broadcast %cst_115 : f32 to vector<16x128xf32>
    %326 = arith.mulf %325, %324 : vector<16x128xf32>
    %cst_116 = arith.constant 2.000000e+00 : f32
    %327 = vector.broadcast %cst_116 : f32 to vector<16x128xf32>
    %328 = arith.mulf %327, %322 : vector<16x128xf32>
    %329 = arith.mulf %322, %322 : vector<16x128xf32>
    %cst_117 = arith.constant 1.000000e+00 : f32
    %330 = vector.broadcast %cst_117 : f32 to vector<16x128xf32>
    %331 = arith.addf %330, %329 : vector<16x128xf32>
    %332 = tpu.reciprocal %331 {approx = true} : vector<16x128xf32> -> vector<16x128xf32>
    %333 = arith.mulf %328, %332 : vector<16x128xf32>
    %334 = arith.subf %333, %319 : vector<16x128xf32>
    %335 = arith.mulf %326, %334 : vector<16x128xf32>
    %336 = arith.addf %319, %335 : vector<16x128xf32>
    %c0_118 = arith.constant 0 : index
    %c0_119 = arith.constant 0 : index
    %337 = vector.load %arg15[%c0_118, %c0_119] : memref<128x128xbf16, #tpu.memory_space<vmem>>, vector<128x128xbf16>
    %c13 = arith.constant 13 : index
    %c0_120 = arith.constant 0 : index
    %338 = vector.load %arg16[%c13, %c0_120] : memref<14x512xf32, #tpu.memory_space<vmem>>, vector<1x512xf32>
    %339 = vector.shape_cast %338 : vector<1x512xf32> to vector<512xf32>
    %340 = vector.extract_strided_slice %339 {offsets = [0], sizes = [128], strides = [1]} : vector<512xf32> to vector<128xf32>
    %341 = vector.shape_cast %340 : vector<128xf32> to vector<1x128xf32>
    %342 = arith.truncf %336 : vector<16x128xf32> to vector<16x128xbf16>
    %cst_121 = arith.constant dense<0.000000e+00> : vector<16x128xf32>
    %343 = tpu.matmul %342, %337, %cst_121 {dimension_numbers = #tpu.dot_dimension_numbers<[1], [0], [0], [1], [0, 0, 1, 1], [], []>} : vector<16x128xbf16>, vector<128x128xbf16>, vector<16x128xf32> -> vector<16x128xf32>
    %344 = vector.broadcast %341 : vector<1x128xf32> to vector<16x128xf32>
    %345 = arith.addf %343, %344 : vector<16x128xf32>
    %cst_122 = arith.constant 5.000000e-01 : f32
    %346 = vector.broadcast %cst_122 : f32 to vector<16x128xf32>
    %347 = arith.mulf %346, %345 : vector<16x128xf32>
    %348 = math.tanh %347 : vector<16x128xf32>
    %cst_123 = arith.constant 1.000000e+00 : f32
    %349 = vector.broadcast %cst_123 : f32 to vector<16x128xf32>
    %350 = arith.addf %349, %348 : vector<16x128xf32>
    %cst_124 = arith.constant 5.000000e-01 : f32
    %351 = vector.broadcast %cst_124 : f32 to vector<16x128xf32>
    %352 = arith.mulf %351, %350 : vector<16x128xf32>
    %cst_125 = arith.constant 2.000000e+00 : f32
    %353 = vector.broadcast %cst_125 : f32 to vector<16x128xf32>
    %354 = arith.mulf %353, %348 : vector<16x128xf32>
    %355 = arith.mulf %348, %348 : vector<16x128xf32>
    %cst_126 = arith.constant 1.000000e+00 : f32
    %356 = vector.broadcast %cst_126 : f32 to vector<16x128xf32>
    %357 = arith.addf %356, %355 : vector<16x128xf32>
    %358 = tpu.reciprocal %357 {approx = true} : vector<16x128xf32> -> vector<16x128xf32>
    %359 = arith.mulf %354, %358 : vector<16x128xf32>
    %360 = arith.subf %359, %345 : vector<16x128xf32>
    %361 = arith.mulf %352, %360 : vector<16x128xf32>
    %362 = arith.addf %345, %361 : vector<16x128xf32>
    %c0_127 = arith.constant 0 : index
    %c0_128 = arith.constant 0 : index
    %363 = vector.load %arg17[%c0_127, %c0_128] : memref<16x128xf32, #tpu.memory_space<vmem>>, vector<16x128xf32>
    tpu.vector_store %arg17[%c0_127, %c0_128], %362 {strides = array<i32>} : memref<16x128xf32, #tpu.memory_space<vmem>>, vector<16x128xf32>,
    return
  }
  func.func @transform_0(%arg0: i32) -> (i32, i32) {
    %c0_i32 = arith.constant 0 : i32
    %c0_i32_0 = arith.constant 0 : i32
    return %arg0, %c0_i32 : i32, i32
  }
  func.func @transform_1(%arg0: i32) -> (i32, i32) {
    %c0_i32 = arith.constant 0 : i32
    %c0_i32_0 = arith.constant 0 : i32
    %c0_i32_1 = arith.constant 0 : i32
    return %c0_i32, %c0_i32_0 : i32, i32
  }
  func.func @transform_2(%arg0: i32) -> (i32, i32) {
    %c0_i32 = arith.constant 0 : i32
    %c0_i32_0 = arith.constant 0 : i32
    %c0_i32_1 = arith.constant 0 : i32
    return %c0_i32, %c0_i32_0 : i32, i32
  }
  func.func @transform_3(%arg0: i32) -> (i32, i32) {
    %c0_i32 = arith.constant 0 : i32
    %c0_i32_0 = arith.constant 0 : i32
    %c0_i32_1 = arith.constant 0 : i32
    return %c0_i32, %c0_i32_0 : i32, i32
  }
  func.func @transform_4(%arg0: i32) -> (i32, i32) {
    %c0_i32 = arith.constant 0 : i32
    %c0_i32_0 = arith.constant 0 : i32
    %c0_i32_1 = arith.constant 0 : i32
    return %c0_i32, %c0_i32_0 : i32, i32
  }
  func.func @transform_5(%arg0: i32) -> (i32, i32) {
    %c0_i32 = arith.constant 0 : i32
    %c0_i32_0 = arith.constant 0 : i32
    %c0_i32_1 = arith.constant 0 : i32
    return %c0_i32, %c0_i32_0 : i32, i32
  }
  func.func @transform_6(%arg0: i32) -> (i32, i32) {
    %c0_i32 = arith.constant 0 : i32
    %c0_i32_0 = arith.constant 0 : i32
    %c0_i32_1 = arith.constant 0 : i32
    return %c0_i32, %c0_i32_0 : i32, i32
  }
  func.func @transform_7(%arg0: i32) -> (i32, i32) {
    %c0_i32 = arith.constant 0 : i32
    %c0_i32_0 = arith.constant 0 : i32
    %c0_i32_1 = arith.constant 0 : i32
    return %c0_i32, %c0_i32_0 : i32, i32
  }
  func.func @transform_8(%arg0: i32) -> (i32, i32) {
    %c0_i32 = arith.constant 0 : i32
    %c0_i32_0 = arith.constant 0 : i32
    %c0_i32_1 = arith.constant 0 : i32
    return %c0_i32, %c0_i32_0 : i32, i32
  }
  func.func @transform_9(%arg0: i32) -> (i32, i32) {
    %c0_i32 = arith.constant 0 : i32
    %c0_i32_0 = arith.constant 0 : i32
    %c0_i32_1 = arith.constant 0 : i32
    return %c0_i32, %c0_i32_0 : i32, i32
  }
  func.func @transform_10(%arg0: i32) -> (i32, i32) {
    %c0_i32 = arith.constant 0 : i32
    %c0_i32_0 = arith.constant 0 : i32
    %c0_i32_1 = arith.constant 0 : i32
    return %c0_i32, %c0_i32_0 : i32, i32
  }
  func.func @transform_11(%arg0: i32) -> (i32, i32) {
    %c0_i32 = arith.constant 0 : i32
    %c0_i32_0 = arith.constant 0 : i32
    %c0_i32_1 = arith.constant 0 : i32
    return %c0_i32, %c0_i32_0 : i32, i32
  }
  func.func @transform_12(%arg0: i32) -> (i32, i32) {
    %c0_i32 = arith.constant 0 : i32
    %c0_i32_0 = arith.constant 0 : i32
    %c0_i32_1 = arith.constant 0 : i32
    return %c0_i32, %c0_i32_0 : i32, i32
  }
  func.func @transform_13(%arg0: i32) -> (i32, i32) {
    %c0_i32 = arith.constant 0 : i32
    %c0_i32_0 = arith.constant 0 : i32
    %c0_i32_1 = arith.constant 0 : i32
    return %c0_i32, %c0_i32_0 : i32, i32
  }
  func.func @transform_14(%arg0: i32) -> (i32, i32) {
    %c0_i32 = arith.constant 0 : i32
    %c0_i32_0 = arith.constant 0 : i32
    %c0_i32_1 = arith.constant 0 : i32
    return %c0_i32, %c0_i32_0 : i32, i32
  }
  func.func @transform_15(%arg0: i32) -> (i32, i32) {
    %c0_i32 = arith.constant 0 : i32
    %c0_i32_0 = arith.constant 0 : i32
    %c0_i32_1 = arith.constant 0 : i32
    return %c0_i32, %c0_i32_0 : i32, i32
  }
  func.func @transform_16(%arg0: i32) -> (i32, i32) {
    %c0_i32 = arith.constant 0 : i32
    %c0_i32_0 = arith.constant 0 : i32
    return %arg0, %c0_i32 : i32, i32
  }
}

</mosaic_0001>

<bundles_post_ra>
// kernel: deep_highway_forward.1
= control target key start
LH: loop header
LB: loop body
LE: loop exit
PB: predicated region body
PF: predicated region fallthrough
CT: control target
= control target key end

     0   :  { %s8222_s0 = inlined_call_operand.vmem [shape: bf16[16,128], index: 0, kind: input, shape index: {}]   ;;  %s8223_s1 = inlined_call_operand.hbm [shape: bf16[128,512], index: 1, kind: input, shape index: {}]   ;;  %s8224_s2 = inlined_call_operand.hbm [shape: bf16[512,384], index: 2, kind: input, shape index: {}]   ;;  %s8225_s3 = inlined_call_operand.hbm [shape: bf16[384,384], index: 3, kind: input, shape index: {}]   ;;  %s8226_s4 = inlined_call_operand.hbm [shape: bf16[384,384], index: 4, kind: input, shape index: {}]   ;;  %s8227_s5 = inlined_call_operand.hbm [shape: bf16[384,256], index: 5, kind: input, shape index: {}]   ;;  %s8228_s6 = inlined_call_operand.hbm [shape: bf16[256,256], index: 6, kind: input, shape index: {}]   ;;  %s8229_s7 = inlined_call_operand.hbm [shape: bf16[256,256], index: 7, kind: input, shape index: {}]   ;;  %s8230_s8 = inlined_call_operand.hbm [shape: bf16[256,128], index: 8, kind: input, shape index: {}]   ;;  %s8231_s9 = inlined_call_operand.hbm [shape: bf16[128,128], index: 9, kind: input, shape index: {}]   ;;  %s8232_s10 = inlined_call_operand.hbm [shape: bf16[128,128], index: 10, kind: input, shape index: {}]   ;;  %s8233_s11 = inlined_call_operand.hbm [shape: bf16[128,128], index: 11, kind: input, shape index: {}]   ;;  %s8234_s12 = inlined_call_operand.hbm [shape: bf16[128,128], index: 12, kind: input, shape index: {}]   ;;  %s8235_s13 = inlined_call_operand.hbm [shape: bf16[128,128], index: 13, kind: input, shape index: {}]   ;;  %s8236_s14 = inlined_call_operand.hbm [shape: bf16[128,128], index: 14, kind: input, shape index: {}]   ;;  %s8237_s15 = inlined_call_operand.hbm [shape: f32[14,512], index: 15, kind: input, shape index: {}]   ;;  %s8238_s16 = inlined_call_operand.vmem [shape: f32[16,128], index: 16, kind: output, shape index: {}]  }
   0x1   :  { %8239 = sst [smem:[#allocation33_spill]] %s8222_s0 }
   0x2   :  { %21 = vsyncpa [#allocation3], 0 }
   0x3   :  { %22 = vsyncpa [#allocation5], 0 }
   0x4   :  { %23 = vsyncpa [#allocation8], 0 }
   0x5   :  { %24 = vsyncpa [#allocation11], 0 }
   0x6   :  { %25 = vsyncpa [#allocation14], 0 }
   0x7   :  { %26 = vsyncpa [#allocation17], 0 }
   0x8   :  { %27 = vsyncpa [#allocation20], 0  ;;  %s48_s23 = sshll.u32 %s8224_s2, 4  ;;  %s49_s23 = int_to_ptr.hbm [resolvable:$true] %s48_s23 }
   0x9   :  { %28 = vsyncpa [#allocation23], 0  ;;  %s7664_s24 = smov [#allocation4]   ;;  %s74_s28 = sshll.u32 %s8226_s4, 4  ;;  %s75_s28 = int_to_ptr.hbm [resolvable:$true] %s74_s28 }
   0xa   :  { %s50_s25 = sshll.u32 %s7664_s24, 4  ;;  %s7665_s29 = smov 192   ;;  %s51_s25 = int_to_ptr.vmem [resolvable:$true] %s50_s25 }
   0xb   :  { %s7666_s30 = smov 12   ;;  %s7667_s0 = smov [#allocation7]  }
   0xc   :  { %56 = dma.hbm_to_vmem [thread:$0]  %s49_s23, 12288, %s51_s25, [#allocation5], %s7665_s29, %s7665_s29, %s7666_s30  }
   0xd   :  { %s76_s17 = sshll.u32 %s7667_s0, 4  ;;  %s100_s19 = sshll.u32 %s8228_s6, 4  ;;  %s77_s17 = int_to_ptr.vmem [resolvable:$true] %s76_s17  ;;  %s101_s19 = int_to_ptr.hbm [resolvable:$true] %s100_s19 }
   0xe   :  { %82 = dma.hbm_to_vmem [thread:$0]  %s75_s28, 9216, %s77_s17, [#allocation8], %s7665_s29, %s7665_s29, %s7666_s30  }
   0xf   :  { %s7668_s4 = smov [#allocation10]   ;;  %s126_s23 = sshll.u32 %s8230_s8, 4  ;;  %s127_s23 = int_to_ptr.hbm [resolvable:$true] %s126_s23 }
  0x10   :  { %s102_s20 = sshll.u32 %s7668_s4, 4  ;;  %s7669_s24 = smov 128   ;;  %s103_s20 = int_to_ptr.vmem [resolvable:$true] %s102_s20 }
  0x11   :  { %s7670_s25 = smov 8   ;;  %s7671_s26 = smov [#allocation13]  }
  0x12   :  { %108 = dma.hbm_to_vmem [thread:$0]  %s101_s19, 4096, %s103_s20, [#allocation11], %s7669_s24, %s7669_s24, %s7670_s25  }
  0x13   :  { %s128_s27 = sshll.u32 %s7671_s26, 4  ;;  %s7672_s28 = smov 64   ;;  %s129_s27 = int_to_ptr.vmem [resolvable:$true] %s128_s27 }
  0x14   :  { %s7673_s6 = smov 4   ;;  %s152_s8 = sshll.u32 %s8232_s10, 4  ;;  %s153_s8 = int_to_ptr.hbm [resolvable:$true] %s152_s8 }
  0x15   :  { %134 = dma.hbm_to_vmem [thread:$0]  %s127_s23, 2048, %s129_s27, [#allocation14], %s7672_s28, %s7672_s28, %s7673_s6  }
  0x16   :  { %s7674_s2 = smov [#allocation16]   ;;  %s178_s20 = sshll.u32 %s8234_s12, 4  ;;  %s179_s20 = int_to_ptr.hbm [resolvable:$true] %s178_s20 }
  0x17   :  { %s154_s18 = sshll.u32 %s7674_s2, 4  ;;  %s7675_s21 = smov [#allocation19]   ;;  %s155_s18 = int_to_ptr.vmem [resolvable:$true] %s154_s18 }
  0x18   :  { %160 = dma.hbm_to_vmem [thread:$0]  %s153_s8, 1024, %s155_s18, [#allocation17], %s7672_s28, %s7672_s28, %s7673_s6  }
  0x19   :  { %s180_s22 = sshll.u32 %s7675_s21, 4  ;;  %s204_s27 = sshll.u32 %s8236_s14, 4  ;;  %s181_s22 = int_to_ptr.vmem [resolvable:$true] %s180_s22  ;;  %s205_s27 = int_to_ptr.hbm [resolvable:$true] %s204_s27 }
  0x1a   :  { %186 = dma.hbm_to_vmem [thread:$0]  %s179_s20, 1024, %s181_s22, [#allocation20], %s7672_s28, %s7672_s28, %s7673_s6  }
  0x1b   :  { %s35_s12 = sshll.u32 %s8223_s1, 4  ;;  %s7676_s17 = smov [#allocation22]   ;;  %s36_s12 = int_to_ptr.hbm [resolvable:$true] %s35_s12 }
  0x1c   :  { %s206_s2 = sshll.u32 %s7676_s17, 4  ;;  %s7677_s8 = smov [#allocation2]   ;;  %s207_s2 = int_to_ptr.vmem [resolvable:$true] %s206_s2 }
  0x1d   :  { %212 = dma.hbm_to_vmem [thread:$0]  %s205_s27, 1024, %s207_s2, [#allocation23], %s7672_s28, %s7672_s28, %s7673_s6  }
  0x1e   :  { %s37_s14 = sshll.u32 %s7677_s8, 4  ;;  %s7678_s18 = smov 256   ;;  %s38_s14 = int_to_ptr.vmem [resolvable:$true] %s37_s14 }
  0x1f   :  { %s7679_s4 = smov 16   ;;  %s61_s21 = sshll.u32 %s8225_s3, 4  ;;  %s62_s21 = int_to_ptr.hbm [resolvable:$true] %s61_s21 }
  0x20   :  { %43 = dma.hbm_to_vmem [thread:$0]  %s36_s12, 4096, %s38_s14, [#allocation3], %s7678_s18, %s7678_s18, %s7679_s4  }
  0x21   :  { %s7680_s1 = smov [#allocation6]   ;;  %s87_s10 = sshll.u32 %s8227_s5, 4  ;;  %s88_s10 = int_to_ptr.hbm [resolvable:$true] %s87_s10 }
  0x22   :  { %s63_s22 = sshll.u32 %s7680_s1, 4  ;;  %s7681_s27 = smov [#allocation9]   ;;  %s64_s22 = int_to_ptr.vmem [resolvable:$true] %s63_s22 }
  0x23   :  { %69 = dma.hbm_to_vmem [thread:$0]  %s62_s21, 9216, %s64_s22, [#allocation5], %s7665_s29, %s7665_s29, %s7666_s30  }
  0x24   :  { %s89_s0 = sshll.u32 %s7681_s27, 4  ;;  %s113_s2 = sshll.u32 %s8229_s7, 4  ;;  %s90_s0 = int_to_ptr.vmem [resolvable:$true] %s89_s0  ;;  %s114_s2 = int_to_ptr.hbm [resolvable:$true] %s113_s2 }
  0x25   :  { %95 = dma.hbm_to_vmem [thread:$0]  %s88_s10, 6144, %s90_s0, [#allocation8], %s7669_s24, %s7669_s24, %s7670_s25  }
  0x26   :  { %s139_s5 = sshll.u32 %s8231_s9, 4  ;;  %s7682_s14 = smov [#allocation12]   ;;  %s140_s5 = int_to_ptr.hbm [resolvable:$true] %s139_s5 }
  0x27   :  { %s115_s18 = sshll.u32 %s7682_s14, 4  ;;  %s7683_s29 = smov [#allocation15]   ;;  %s116_s18 = int_to_ptr.vmem [resolvable:$true] %s115_s18 }
  0x28   :  { %121 = dma.hbm_to_vmem [thread:$0]  %s114_s2, 4096, %s116_s18, [#allocation11], %s7669_s24, %s7669_s24, %s7670_s25  }
  0x29   :  { %s141_s7 = sshll.u32 %s7683_s29, 4  ;;  %s165_s19 = sshll.u32 %s8233_s11, 4  ;;  %s142_s7 = int_to_ptr.vmem [resolvable:$true] %s141_s7  ;;  %s166_s19 = int_to_ptr.hbm [resolvable:$true] %s165_s19 }
  0x2a   :  { %147 = dma.hbm_to_vmem [thread:$0]  %s140_s5, 1024, %s142_s7, [#allocation14], %s7672_s28, %s7672_s28, %s7673_s6  }
  0x2b   :  { %s191_s21 = sshll.u32 %s8235_s13, 4  ;;  %s7684_s1 = smov [#allocation18]   ;;  %s192_s21 = int_to_ptr.hbm [resolvable:$true] %s191_s21 }
  0x2c   :  { %s167_s22 = sshll.u32 %s7684_s1, 4  ;;  %s7685_s24 = smov [#allocation21]   ;;  %s168_s22 = int_to_ptr.vmem [resolvable:$true] %s167_s22 }
  0x2d   :  { %173 = dma.hbm_to_vmem [thread:$0]  %s166_s19, 1024, %s168_s22, [#allocation17], %s7672_s28, %s7672_s28, %s7673_s6  }
  0x2e   :  { %s193_s11 = sshll.u32 %s7685_s24, 4  ;;  %s217_s26 = sshll.u32 %s8237_s15, 4  ;;  %s194_s11 = int_to_ptr.vmem [resolvable:$true] %s193_s11  ;;  %s218_s26 = int_to_ptr.hbm [resolvable:$true] %s217_s26 }
  0x2f   :  { %199 = dma.hbm_to_vmem [thread:$0]  %s192_s21, 1024, %s194_s11, [#allocation20], %s7672_s28, %s7672_s28, %s7673_s6  }
  0x30   :  { %s7686_s13 = smov [#allocation24]   ;;  %s7687_s27 = smov 512  }
  0x31   :  { %s219_s10 = sshll.u32 %s7686_s13, 4  ;;  %s7688_s0 = smov 32   ;;  %s220_s10 = int_to_ptr.vmem [resolvable:$true] %s219_s10 }
  0x32   :  { %225 = dma.hbm_to_vmem [thread:$0]  %s218_s26, 1024, %s220_s10, [#allocation23], %s7687_s27, %s7687_s27, %s7688_s0  }
  0x33   :  { %7648 = dma.done.wait [#allocation3], 4096  }
  0x34   :  { %7649 = vsyncadd [#allocation3], 4294963200 }
  0x35   :  { %7650 = dma.done.wait [#allocation5], 21504  }
  0x36   :  { %7651 = vsyncadd [#allocation5], 4294945792 }
  0x37   :  { %7652 = dma.done.wait [#allocation8], 15360  }
  0x38   :  { %7653 = vsyncadd [#allocation8], 4294951936 }
  0x39   :  { %7654 = dma.done.wait [#allocation11], 8192  }
  0x3a   :  { %7655 = vsyncadd [#allocation11], 4294959104 }
  0x3b   :  { %7656 = dma.done.wait [#allocation14], 3072  }
  0x3c   :  { %7657 = vsyncadd [#allocation14], 4294964224 }
  0x3d   :  { %7658 = dma.done.wait [#allocation17], 2048  }
  0x3e   :  { %7659 = vsyncadd [#allocation17], 4294965248 }
  0x3f   :  { %7660 = dma.done.wait [#allocation20], 2048  }
  0x40   :  { %7661 = vsyncadd [#allocation20], 4294965248 }
  0x41   :  { %7662 = dma.done.wait [#allocation23], 2048  }
  0x42   :  { %7663 = vsyncadd [#allocation23], 4294965248  ;;  %v4928_v0 = vld [vmem:[#allocation2 + $0xe0] sm:$0xf]  ;;  %v6637_v1 = vld [vmem:[#allocation2 + $0xec] sm:$0xf0] }
  0x43   :  { %v6635_v2 = vld [vmem:[#allocation2 + $0xe4] sm:$0xf]  ;;  %v4929_v3 = vor.u32 %v6637_v1, %v4928_v0  ;;  %v4930_v4 = vld [vmem:[#allocation2 + $0xf0] sm:$0xf0]  ;;  %v4936_v5 = vld [vmem:[#allocation2 + $0xe8] sm:$0xf] }
  0x44   :  { %v6638_v6 = vld [vmem:[#allocation2 + $0xf4] sm:$0xf0]  ;;  %v4933_v7 = vor.u32 %v6635_v2, %v4930_v4  ;;  %v6636_v9 = vld [vmem:[#allocation2 + $0xec] sm:$0xf]  ;;  %v4938_v10 = vld [vmem:[#allocation2 + $0xf8] sm:$0xf0] }
  0x45   :  { %v4937_v8 = vor.u32 %v6638_v6, %v4936_v5  ;;  %v4912_v11 = vld [vmem:[#allocation2 + $0xc0] sm:$0xf]  ;;  %496 = vmatpush.bf16.msra.mxu0 %v4929_v3  ;;  %v4941_v12 = vor.u32 %v6636_v9, %v4938_v10  ;;  %v6633_v13 = vld [vmem:[#allocation2 + $0xcc] sm:$0xf0]  ;;  %v6631_v14 = vld [vmem:[#allocation2 + $0xc4] sm:$0xf] }
  0x46   :  { %v4914_v15 = vld [vmem:[#allocation2 + $0xd0] sm:$0xf0]  ;;  %510 = vmatpush.bf16.msra.mxu1 %v4933_v7  ;;  %v4913_v16 = vor.u32 %v6633_v13, %v4912_v11  ;;  %v4920_v18 = vld [vmem:[#allocation2 + $0xc8] sm:$0xf]  ;;  %v6634_v19 = vld [vmem:[#allocation2 + $0xd4] sm:$0xf0] }
  0x47   :  { %524 = vmatpush.bf16.msra.mxu2 %v4937_v8  ;;  %v4917_v17 = vor.u32 %v6631_v14, %v4914_v15  ;;  %v6632_v20 = vld [vmem:[#allocation2 + $0xcc] sm:$0xf]  ;;  %538 = vmatpush.bf16.msra.mxu3 %v4941_v12  ;;  %v4921_v21 = vor.u32 %v6634_v19, %v4920_v18  ;;  %v4922_v22 = vld [vmem:[#allocation2 + $0xd8] sm:$0xf0]  ;;  %v4896_v23 = vld [vmem:[#allocation2 + $0xa0] sm:$0xf] }
  0x48   :  { %v6629_v24 = vld [vmem:[#allocation2 + $0xac] sm:$0xf0]  ;;  %v4925_v25 = vor.u32 %v6632_v20, %v4922_v22  ;;  %v6627_v26 = vld [vmem:[#allocation2 + $0xa4] sm:$0xf]  ;;  %v4898_v27 = vld [vmem:[#allocation2 + $0xb0] sm:$0xf0] }
  0x49   :  { %v4904_v28 = vld [vmem:[#allocation2 + $0xa8] sm:$0xf]  ;;  %497 = vmatpush.bf16.msra.mxu0 %v4913_v16  ;;  %v4897_v29 = vor.u32 %v6629_v24, %v4896_v23  ;;  %v6630_v30 = vld [vmem:[#allocation2 + $0xb4] sm:$0xf0]  ;;  %v6628_v31 = vld [vmem:[#allocation2 + $0xac] sm:$0xf]  ;;  %v4901_v33 = vor.u32 %v6627_v26, %v4898_v27 }
  0x4a   :  { %v4906_v32 = vld [vmem:[#allocation2 + $0xb8] sm:$0xf0]  ;;  %511 = vmatpush.bf16.msra.mxu1 %v4917_v17  ;;  %v4905_v34 = vor.u32 %v6630_v30, %v4904_v28  ;;  %v4880_v35 = vld [vmem:[#allocation2 + $0x80] sm:$0xf]  ;;  %v6625_v36 = vld [vmem:[#allocation2 + $0x8c] sm:$0xf0] }
  0x4b   :  { %525 = vmatpush.bf16.msra.mxu2 %v4921_v21  ;;  %v6623_v37 = vld [vmem:[#allocation2 + $0x84] sm:$0xf]  ;;  %539 = vmatpush.bf16.msra.mxu3 %v4925_v25  ;;  %v4909_v38 = vor.u32 %v6628_v31, %v4906_v32  ;;  %v4882_v39 = vld [vmem:[#allocation2 + $0x90] sm:$0xf0]  ;;  %v4888_v40 = vld [vmem:[#allocation2 + $0x88] sm:$0xf]  ;;  %v4881_v44 = vor.u32 %v6625_v36, %v4880_v35 }
  0x4c   :  { %v6626_v41 = vld [vmem:[#allocation2 + $0x94] sm:$0xf0]  ;;  %v6624_v42 = vld [vmem:[#allocation2 + $0x8c] sm:$0xf]  ;;  %v4890_v43 = vld [vmem:[#allocation2 + $0x98] sm:$0xf0]  ;;  %v4885_v45 = vor.u32 %v6623_v37, %v4882_v39 }
  0x4d   :  { %498 = vmatpush.bf16.msra.mxu0 %v4897_v29  ;;  %v4889_v46 = vor.u32 %v6626_v41, %v4888_v40  ;;  %v4864_v47 = vld [vmem:[#allocation2 + $0x60] sm:$0xf]  ;;  %v6621_v48 = vld [vmem:[#allocation2 + $0x6c] sm:$0xf0]  ;;  %v6619_v49 = vld [vmem:[#allocation2 + $0x64] sm:$0xf]  ;;  %v4893_v50 = vor.u32 %v6624_v42, %v4890_v43 }
  0x4e   :  { %512 = vmatpush.bf16.msra.mxu1 %v4901_v33  ;;  %v4866_v51 = vld [vmem:[#allocation2 + $0x70] sm:$0xf0]  ;;  %v4872_v52 = vld [vmem:[#allocation2 + $0x68] sm:$0xf]  ;;  %v6622_v53 = vld [vmem:[#allocation2 + $0x74] sm:$0xf0]  ;;  %v4865_v56 = vor.u32 %v6621_v48, %v4864_v47 }
  0x4f   :  { %526 = vmatpush.bf16.msra.mxu2 %v4905_v34  ;;  %540 = vmatpush.bf16.msra.mxu3 %v4909_v38  ;;  %v6620_v54 = vld [vmem:[#allocation2 + $0x6c] sm:$0xf]  ;;  %v4874_v55 = vld [vmem:[#allocation2 + $0x78] sm:$0xf0]  ;;  %v4869_v57 = vor.u32 %v6619_v49, %v4866_v51  ;;  %v4873_v58 = vor.u32 %v6622_v53, %v4872_v52  ;;  %v4848_v59 = vld [vmem:[#allocation2 + $0x40] sm:$0xf] }
  0x50   :  { %v6617_v60 = vld [vmem:[#allocation2 + $0x4c] sm:$0xf0]  ;;  %v6615_v61 = vld [vmem:[#allocation2 + $0x44] sm:$0xf]  ;;  %v4877_v62 = vor.u32 %v6620_v54, %v4874_v55  ;;  %v4850_v63 = vld [vmem:[#allocation2 + $0x50] sm:$0xf0] }
  0x51   :  { %499 = vmatpush.bf16.msra.mxu0 %v4881_v44  ;;  %v4856_v0 = vld [vmem:[#allocation2 + $0x48] sm:$0xf]  ;;  %v6618_v1 = vld [vmem:[#allocation2 + $0x54] sm:$0xf0]  ;;  %v6616_v2 = vld [vmem:[#allocation2 + $0x4c] sm:$0xf]  ;;  %v4849_v4 = vor.u32 %v6617_v60, %v4848_v59  ;;  %v4853_v5 = vor.u32 %v6615_v61, %v4850_v63 }
  0x52   :  { %513 = vmatpush.bf16.msra.mxu1 %v4885_v45  ;;  %v4858_v3 = vld [vmem:[#allocation2 + $0x58] sm:$0xf0]  ;;  %v4857_v6 = vor.u32 %v6618_v1, %v4856_v0  ;;  %v4832_v7 = vld [vmem:[#allocation2 + $0x20] sm:$0xf]  ;;  %v6613_v8 = vld [vmem:[#allocation2 + $0x2c] sm:$0xf0] }
  0x53   :  { %527 = vmatpush.bf16.msra.mxu2 %v4889_v46  ;;  %541 = vmatpush.bf16.msra.mxu3 %v4893_v50  ;;  %v6611_v9 = vld [vmem:[#allocation2 + $0x24] sm:$0xf]  ;;  %v4861_v10 = vor.u32 %v6616_v2, %v4858_v3  ;;  %v4834_v11 = vld [vmem:[#allocation2 + $0x30] sm:$0xf0]  ;;  %v4840_v12 = vld [vmem:[#allocation2 + $0x28] sm:$0xf]  ;;  %v4833_v16 = vor.u32 %v6613_v8, %v4832_v7 }
  0x54   :  { %v6614_v13 = vld [vmem:[#allocation2 + $0x34] sm:$0xf0]  ;;  %v6612_v14 = vld [vmem:[#allocation2 + $0x2c] sm:$0xf]  ;;  %v4842_v15 = vld [vmem:[#allocation2 + $0x38] sm:$0xf0]  ;;  %v4837_v18 = vor.u32 %v6611_v9, %v4834_v11 }
  0x55   :  { %500 = vmatpush.bf16.msra.mxu0 %v4865_v56  ;;  %v4816_v17 = vld [vmem:[#allocation2] sm:$0xf]  ;;  %v4841_v19 = vor.u32 %v6614_v13, %v4840_v12  ;;  %v6609_v20 = vld [vmem:[#allocation2 + $0xc] sm:$0xf0]  ;;  %v6607_v21 = vld [vmem:[#allocation2 + $0x4] sm:$0xf]  ;;  %v4845_v23 = vor.u32 %v6612_v14, %v4842_v15 }
  0x56   :  { %514 = vmatpush.bf16.msra.mxu1 %v4869_v57  ;;  %v4818_v22 = vld [vmem:[#allocation2 + $0x10] sm:$0xf0]  ;;  %v4824_v24 = vld [vmem:[#allocation2 + $0x8] sm:$0xf]  ;;  %v6610_v25 = vld [vmem:[#allocation2 + $0x14] sm:$0xf0]  ;;  %v4817_v30 = vor.u32 %v6609_v20, %v4816_v17 }
  0x57   :  { %528 = vmatpush.bf16.msra.mxu2 %v4873_v58  ;;  %542 = vmatpush.bf16.msra.mxu3 %v4877_v62  ;;  %v6608_v26 = vld [vmem:[#allocation2 + $0xc] sm:$0xf]  ;;  %v4826_v27 = vld [vmem:[#allocation2 + $0x18] sm:$0xf0]  ;;  %v5028_v28 = vld [vmem:[#allocation4 + $0xa8] sm:$0xf]  ;;  %v4821_v33 = vor.u32 %v6607_v21, %v4818_v22  ;;  %v4825_v34 = vor.u32 %v6610_v25, %v4824_v24 }
  0x58   :  { %v6661_v29 = vld [vmem:[#allocation4 + $0xb0] sm:$0xf0]  ;;  %v5124_v31 = vld [vmem:[#allocation4 + $0x168] sm:$0xf]  ;;  %s8240_s6 = sld [smem:[#allocation33_spill]]  ;;  %v4829_v36 = vor.u32 %v6608_v26, %v4826_v27 }
  0x59   :  { %501 = vmatpush.bf16.msra.mxu0 %v4849_v4  ;;  %v6685_v32 = vld [vmem:[#allocation4 + $0x170] sm:$0xf0]  ;;  %v5029_v37 = vor.u32 %v6661_v29, %v5028_v28  ;;  %v5016_v38 = vld [vmem:[#allocation4 + $0x90] sm:$0xf]  ;;  %v5220_v39 = vld [vmem:[#allocation4 + $0x228] sm:$0xf] }
  0x5a   :  { %515 = vmatpush.bf16.msra.mxu1 %v4853_v5  ;;  %v6709_v40 = vld [vmem:[#allocation4 + $0x230] sm:$0xf0]  ;;  %v5125_v41 = vor.u32 %v6685_v32, %v5124_v31  ;;  %v6658_v42 = vld [vmem:[#allocation4 + $0x98] sm:$0xf0]  ;;  %v5316_v43 = vld [vmem:[#allocation4 + $0x2e8] sm:$0xf] }
  0x5b   :  { %529 = vmatpush.bf16.msra.mxu2 %v4857_v6  ;;  %543 = vmatpush.bf16.msra.mxu3 %v4861_v10  ;;  %v6733_v44 = vld [vmem:[#allocation4 + $0x2f0] sm:$0xf0]  ;;  %v5112_v45 = vld [vmem:[#allocation4 + $0x150] sm:$0xf]  ;;  %v6682_v46 = vld [vmem:[#allocation4 + $0x158] sm:$0xf0]  ;;  %v5221_v47 = vor.u32 %v6709_v40, %v5220_v39  ;;  %v5017_v48 = vor.u32 %v6658_v42, %v5016_v38 }
  0x5c   :  { %v5317_v49 = vor.u32 %v6733_v44, %v5316_v43  ;;  %v5004_v50 = vld [vmem:[#allocation4 + $0x78] sm:$0xf]  ;;  %v5208_v51 = vld [vmem:[#allocation4 + $0x210] sm:$0xf]  ;;  %v6706_v52 = vld [vmem:[#allocation4 + $0x218] sm:$0xf0]  ;;  %v5113_v53 = vor.u32 %v6682_v46, %v5112_v45 }
  0x5d   :  { %502 = vmatpush.bf16.msra.mxu0 %v4833_v16  ;;  %v6655_v54 = vld [vmem:[#allocation4 + $0x80] sm:$0xf0]  ;;  %v5304_v55 = vld [vmem:[#allocation4 + $0x2d0] sm:$0xf]  ;;  %v6730_v56 = vld [vmem:[#allocation4 + $0x2d8] sm:$0xf0]  ;;  %v5209_v59 = vor.u32 %v6706_v52, %v5208_v51 }
  0x5e   :  { %516 = vmatpush.bf16.msra.mxu1 %v4837_v18  ;;  %v6606_v35 = vld [vmem:[%s8240_s6] sm:$0xff]  ;;  %v5100_v57 = vld [vmem:[#allocation4 + $0x138] sm:$0xf]  ;;  %v5005_v60 = vor.u32 %v6655_v54, %v5004_v50  ;;  %v5305_v61 = vor.u32 %v6730_v56, %v5304_v55  ;;  %v6652_v2 = vld [vmem:[#allocation4 + $0x68] sm:$0xf0] }
  0x5f   :  { %530 = vmatpush.bf16.msra.mxu2 %v4841_v19  ;;  %544 = vmatpush.bf16.msra.mxu3 %v4845_v23  ;;  %v6679_v58 = vld [vmem:[#allocation4 + $0x140] sm:$0xf0]  ;;  %v4992_v62 = vld [vmem:[#allocation4 + $0x60] sm:$0xf]  ;;  %v5196_v63 = vld [vmem:[#allocation4 + $0x1f8] sm:$0xf] }
  0x60   :  { %v6703_v0 = vld [vmem:[#allocation4 + $0x200] sm:$0xf0]  ;;  %v5101_v1 = vor.u32 %v6679_v58, %v5100_v57  ;;  %v5292_v3 = vld [vmem:[#allocation4 + $0x2b8] sm:$0xf]  ;;  %v5088_v5 = vld [vmem:[#allocation4 + $0x120] sm:$0xf]  ;;  %v4993_v8 = vor.u32 %v6652_v2, %v4992_v62 }
  0x61   :  { %503 = vmatpush.bf16.msra.mxu0 %v4817_v30  ;;  %v6727_v4 = vld [vmem:[#allocation4 + $0x2c0] sm:$0xf0]  ;;  %v6676_v6 = vld [vmem:[#allocation4 + $0x128] sm:$0xf0]  ;;  %v5197_v7 = vor.u32 %v6703_v0, %v5196_v63  ;;  %v4980_v11 = vld [vmem:[#allocation4 + $0x48] sm:$0xf] }
  0x62   :  { %517 = vmatpush.bf16.msra.mxu1 %v4821_v33  ;;  %v5293_v9 = vor.u32 %v6727_v4, %v5292_v3  ;;  %v5089_v10 = vor.u32 %v6676_v6, %v5088_v5  ;;  %v6649_v12 = vld [vmem:[#allocation4 + $0x50] sm:$0xf0]  ;;  %v5076_v13 = vld [vmem:[#allocation4 + $0x108] sm:$0xf]  ;;  %v5184_v17 = vld [vmem:[#allocation4 + $0x1e0] sm:$0xf] }
  0x63   :  { %531 = vmatpush.bf16.msra.mxu2 %v4825_v34  ;;  %545 = vmatpush.bf16.msra.mxu3 %v4829_v36  ;;  %v4981_v14 = vor.u32 %v6649_v12, %v4980_v11  ;;  %v6673_v15 = vld [vmem:[#allocation4 + $0x110] sm:$0xf0]  ;;  %v6700_v18 = vld [vmem:[#allocation4 + $0x1e8] sm:$0xf0]  ;;  %v5280_v20 = vld [vmem:[#allocation4 + $0x2a0] sm:$0xf] }
  0x64   :  { %504 = vmatmul.bf16.vlgmr.msra.gmra.mxu0 %v6606_v35  ;;  %v5077_v16 = vor.u32 %v6673_v15, %v5076_v13  ;;  %v5185_v19 = vor.u32 %v6700_v18, %v5184_v17  ;;  %v6724_v21 = vld [vmem:[#allocation4 + $0x2a8] sm:$0xf0]  ;;  %v4968_v23 = vld [vmem:[#allocation4 + $0x30] sm:$0xf]  ;;  %v6646_v24 = vld [vmem:[#allocation4 + $0x38] sm:$0xf0] }
  0x65   :  { %1301 = vmatpush.bf16.msrb.mxu0 %v5029_v37  ;;  %518 = vmatmul.bf16.vlgmr.msra.gmra.mxu1 %v6606_v35  ;;  %v5281_v22 = vor.u32 %v6724_v21, %v5280_v20  ;;  %v5064_v25 = vld [vmem:[#allocation4 + $0xf0] sm:$0xf]  ;;  %v4969_v26 = vor.u32 %v6646_v24, %v4968_v23  ;;  %v6670_v27 = vld [vmem:[#allocation4 + $0xf8] sm:$0xf0]  ;;  %v5172_v29 = vld [vmem:[#allocation4 + $0x1c8] sm:$0xf] }
  0x66   :  { %1315 = vmatpush.bf16.msrb.mxu1 %v5125_v41  ;;  %532 = vmatmul.bf16.vlgmr.msra.gmra.mxu2 %v6606_v35  ;;  %v5065_v28 = vor.u32 %v6670_v27, %v5064_v25  ;;  %v6697_v30 = vld [vmem:[#allocation4 + $0x1d0] sm:$0xf0]  ;;  %v5268_v31 = vld [vmem:[#allocation4 + $0x288] sm:$0xf]  ;;  %v6643_v36 = vld [vmem:[#allocation4 + $0x20] sm:$0xf0] }
  0x67   :  { %546 = vmatmul.bf16.vlgmr.msra.gmra.mxu3 %v6606_v35  ;;  %1329 = vmatpush.bf16.msrb.mxu2 %v5221_v47  ;;  %v5173_v32 = vor.u32 %v6697_v30, %v5172_v29  ;;  %v6721_v33 = vld [vmem:[#allocation4 + $0x290] sm:$0xf0]  ;;  %v4956_v35 = vld [vmem:[#allocation4 + $0x18] sm:$0xf]  ;;  %v6667_v39 = vld [vmem:[#allocation4 + $0xe0] sm:$0xf0] }
  0x68   :  { %1343 = vmatpush.bf16.msrb.mxu3 %v5317_v49  ;;  %v5269_v34 = vor.u32 %v6721_v33, %v5268_v31  ;;  %v5052_v37 = vld [vmem:[#allocation4 + $0xd8] sm:$0xf]  ;;  %v4957_v38 = vor.u32 %v6643_v36, %v4956_v35  ;;  %v5160_v41 = vld [vmem:[#allocation4 + $0x1b0] sm:$0xf]  ;;  %v6694_v42 = vld [vmem:[#allocation4 + $0x1b8] sm:$0xf0] }
  0x69   :  { %1302 = vmatpush.bf16.msrb.mxu0 %v5017_v48  ;;  %v5053_v40 = vor.u32 %v6667_v39, %v5052_v37  ;;  %v5256_v43 = vld [vmem:[#allocation4 + $0x270] sm:$0xf]  ;;  %v5161_v44 = vor.u32 %v6694_v42, %v5160_v41  ;;  %v6718_v45 = vld [vmem:[#allocation4 + $0x278] sm:$0xf0]  ;;  %v4944_v47 = vld [vmem:[#allocation4] sm:$0xf] }
  0x6a   :  { %1316 = vmatpush.bf16.msrb.mxu1 %v5113_v53  ;;  %v5257_v46 = vor.u32 %v6718_v45, %v5256_v43  ;;  %v6640_v48 = vld [vmem:[#allocation4 + $0x8] sm:$0xf0]  ;;  %v5040_v49 = vld [vmem:[#allocation4 + $0xc0] sm:$0xf]  ;;  %v5030_v53 = vld [vmem:[#allocation4 + $0xb4] sm:$0xf0] }
  0x6b   :  { %1330 = vmatpush.bf16.msrb.mxu2 %v5209_v59  ;;  %v4945_v50 = vor.u32 %v6640_v48, %v4944_v47  ;;  %v6664_v51 = vld [vmem:[#allocation4 + $0xc8] sm:$0xf0]  ;;  %v5126_v57 = vld [vmem:[#allocation4 + $0x174] sm:$0xf0]  ;;  %v6715_v62 = vld [vmem:[#allocation4 + $0x260] sm:$0xf0] }
  0x6c   :  { %1344 = vmatpush.bf16.msrb.mxu3 %v5305_v61  ;;  %v6660_v52 = vld [vmem:[#allocation4 + $0xac] sm:$0xf]  ;;  %v5041_v54 = vor.u32 %v6664_v51, %v5040_v49  ;;  %v5148_v58 = vld [vmem:[#allocation4 + $0x198] sm:$0xf]  ;;  %v5018_v2 = vld [vmem:[#allocation4 + $0x9c] sm:$0xf0] }
  0x6d   :  { %1303 = vmatpush.bf16.msrb.mxu0 %v5005_v60  ;;  %v5033_v55 = vor.u32 %v6660_v52, %v5030_v53  ;;  %v6684_v56 = vld [vmem:[#allocation4 + $0x16c] sm:$0xf]  ;;  %v6691_v60 = vld [vmem:[#allocation4 + $0x1a0] sm:$0xf0]  ;;  %v5244_v61 = vld [vmem:[#allocation4 + $0x258] sm:$0xf] }
  0x6e   :  { %1317 = vmatpush.bf16.msrb.mxu1 %v5101_v1  ;;  %v5129_v59 = vor.u32 %v6684_v56, %v5126_v57  ;;  %v5149_v63 = vor.u32 %v6691_v60, %v5148_v58  ;;  %v5245_v0 = vor.u32 %v6715_v62, %v5244_v61  ;;  %v6657_v1 = vld [vmem:[#allocation4 + $0x94] sm:$0xf]  ;;  %v5114_v5 = vld [vmem:[#allocation4 + $0x15c] sm:$0xf0]  ;;  %v6712_v11 = vld [vmem:[#allocation4 + $0x248] sm:$0xf0] }
  0x6f   :  { %1331 = vmatpush.bf16.msrb.mxu2 %v5197_v7  ;;  %v6681_v3 = vld [vmem:[#allocation4 + $0x154] sm:$0xf]  ;;  %v5021_v4 = vor.u32 %v6657_v1, %v5018_v2  ;;  %v5136_v6 = vld [vmem:[#allocation4 + $0x180] sm:$0xf]  ;;  %v6688_v7 = vld [vmem:[#allocation4 + $0x188] sm:$0xf0] }
  0x70   :  { %1345 = vmatpush.bf16.msrb.mxu3 %v5293_v9  ;;  %v5137_v9 = vor.u32 %v6688_v7, %v5136_v6  ;;  %v6708_v12 = vld [vmem:[#allocation4 + $0x22c] sm:$0xf]  ;;  %v5006_v20 = vld [vmem:[#allocation4 + $0x84] sm:$0xf0]  ;;  %v6678_v21 = vld [vmem:[#allocation4 + $0x13c] sm:$0xf] }
  0x71   :  { %1304 = vmatpush.bf16.msrb.mxu0 %v4993_v8  ;;  %v5117_v8 = vor.u32 %v6681_v3, %v5114_v5  ;;  %v6732_v15 = vld [vmem:[#allocation4 + $0x2ec] sm:$0xf]  ;;  %v5102_v24 = vld [vmem:[#allocation4 + $0x144] sm:$0xf0]  ;;  %v5210_v27 = vld [vmem:[#allocation4 + $0x21c] sm:$0xf0] }
  0x72   :  { %1318 = vmatpush.bf16.msrb.mxu1 %v5089_v10  ;;  %v5232_v10 = vld [vmem:[#allocation4 + $0x240] sm:$0xf]  ;;  %v5105_v25 = vor.u32 %v6678_v21, %v5102_v24  ;;  %v4994_v33 = vld [vmem:[#allocation4 + $0x6c] sm:$0xf0]  ;;  %v6702_v39 = vld [vmem:[#allocation4 + $0x1fc] sm:$0xf] }
  0x73   :  { %1332 = vmatpush.bf16.msrb.mxu2 %v5185_v19  ;;  %v5233_v13 = vor.u32 %v6712_v11, %v5232_v10  ;;  %v6654_v19 = vld [vmem:[#allocation4 + $0x7c] sm:$0xf]  ;;  %v5306_v30 = vld [vmem:[#allocation4 + $0x2dc] sm:$0xf0]  ;;  %v5090_v37 = vld [vmem:[#allocation4 + $0x12c] sm:$0xf0] }
  0x74   :  { %1346 = vmatpush.bf16.msrb.mxu3 %v5281_v22  ;;  %v7861_v22 = vld [vmem:[#allocation24] ss:$8 sm:$0xf]  ;;  %v5009_v23 = vor.u32 %v6654_v19, %v5006_v20  ;;  %v6726_v41 = vld [vmem:[#allocation4 + $0x2bc] sm:$0xf] }
  0x75   :  { %1305 = vmatpush.bf16.msrb.mxu0 %v4981_v14  ;;  %v5222_v14 = vld [vmem:[#allocation4 + $0x234] sm:$0xf0]  ;;  %v322_v35 = vperm.slane %v7861_v22, 0  ;;  %v323_v42 = vperm.slane %v7861_v22, 1  ;;  %v6672_v48 = vld [vmem:[#allocation4 + $0x10c] sm:$0xf] }
  0x76   :  { %1319 = vmatpush.bf16.msrb.mxu1 %v5077_v16  ;;  %v5318_v16 = vld [vmem:[#allocation4 + $0x2f4] sm:$0xf0]  ;;  %v5225_v17 = vor.u32 %v6708_v12, %v5222_v14  ;;  %v5186_v56 = vld [vmem:[#allocation4 + $0x1ec] sm:$0xf0]  ;;  %v6723_v57 = vld [vmem:[#allocation4 + $0x2a4] sm:$0xf] }
  0x77   :  { %1333 = vmatpush.bf16.msrb.mxu2 %v5173_v32  ;;  %v5321_v18 = vor.u32 %v6732_v15, %v5318_v16  ;;  %v6651_v32 = vld [vmem:[#allocation4 + $0x64] sm:$0xf]  ;;  %v4982_v47 = vld [vmem:[#allocation4 + $0x54] sm:$0xf0]  ;;  %v5282_v60 = vld [vmem:[#allocation4 + $0x2ac] sm:$0xf0] }
  0x78   :  { %1347 = vmatpush.bf16.msrb.mxu3 %v5269_v34  ;;  %v6675_v34 = vld [vmem:[#allocation4 + $0x124] sm:$0xf]  ;;  %v4997_v36 = vor.u32 %v6651_v32, %v4994_v33  ;;  %v5078_v51 = vld [vmem:[#allocation4 + $0x114] sm:$0xf0]  ;;  %v324_v62 = vperm.slane %v7861_v22, 2  ;;  %v325_v3 = vperm.slane %v7861_v22, 3 }
  0x79   :  { %1306 = vmatpush.bf16.msrb.mxu0 %v4969_v26  ;;  %v6705_v26 = vld [vmem:[#allocation4 + $0x214] sm:$0xf]  ;;  %v4970_v1 = vld [vmem:[#allocation4 + $0x3c] sm:$0xf0]  ;;  %v6720_v10 = vld [vmem:[#allocation4 + $0x28c] sm:$0xf] }
  0x7a   :  { %1320 = vmatpush.bf16.msrb.mxu1 %v5065_v28  ;;  %v6729_v28 = vld [vmem:[#allocation4 + $0x2d4] sm:$0xf]  ;;  %v5213_v29 = vor.u32 %v6705_v26, %v5210_v27  ;;  %v5066_v6 = vld [vmem:[#allocation4 + $0xfc] sm:$0xf0]  ;;  %v5270_v12 = vld [vmem:[#allocation4 + $0x294] sm:$0xf0] }
  0x7b   :  { %1334 = vmatpush.bf16.msrb.mxu2 %v5161_v44  ;;  %v5309_v31 = vor.u32 %v6729_v28, %v5306_v30  ;;  %v5294_v44 = vld [vmem:[#allocation4 + $0x2c4] sm:$0xf0]  ;;  %v6669_v5 = vld [vmem:[#allocation4 + $0xf4] sm:$0xf]  ;;  %v5273_v14 = vor.u32 %v6720_v10, %v5270_v12  ;;  %v6642_v15 = vld [vmem:[#allocation4 + $0x1c] sm:$0xf] }
  0x7c   :  { %1348 = vmatpush.bf16.msrb.mxu3 %v5257_v46  ;;  %v5297_v45 = vor.u32 %v6726_v41, %v5294_v44  ;;  %v6648_v46 = vld [vmem:[#allocation4 + $0x4c] sm:$0xf]  ;;  %v5069_v7 = vor.u32 %v6669_v5, %v5066_v6  ;;  %v4958_v16 = vld [vmem:[#allocation4 + $0x24] sm:$0xf0]  ;;  %v6693_v28 = vld [vmem:[#allocation4 + $0x1b4] sm:$0xf] }
  0x7d   :  { %1307 = vmatpush.bf16.msrb.mxu0 %v4957_v38  ;;  %v5093_v38 = vor.u32 %v6675_v34, %v5090_v37  ;;  %v4961_v21 = vor.u32 %v6642_v15, %v4958_v16  ;;  %v6717_v30 = vld [vmem:[#allocation4 + $0x274] sm:$0xf]  ;;  %v5258_v34 = vld [vmem:[#allocation4 + $0x27c] sm:$0xf0]  ;;  %v5042_v44 = vld [vmem:[#allocation4 + $0xcc] sm:$0xf0] }
  0x7e   :  { %1321 = vmatpush.bf16.msrb.mxu1 %v5053_v40  ;;  %v5198_v40 = vld [vmem:[#allocation4 + $0x204] sm:$0xf0] }
  0x7f   :  { %1335 = vmatpush.bf16.msrb.mxu2 %v5149_v63  ;;  %v5201_v43 = vor.u32 %v6702_v39, %v5198_v40  ;;  %v5285_v63 = vor.u32 %v6723_v57, %v5282_v60  ;;  %v6639_v39 = vld [vmem:[#allocation4 + $0x4] sm:$0xf]  ;;  %v6714_v57 = vld [vmem:[#allocation4 + $0x25c] sm:$0xf] }
  0x80   :  { %1349 = vmatpush.bf16.msrb.mxu3 %v5245_v0  ;;  %v6645_v0 = vld [vmem:[#allocation4 + $0x34] sm:$0xf] }
  0x81   :  { %1308 = vmatpush.bf16.msrb.mxu0 %v4945_v50  ;;  %v4985_v50 = vor.u32 %v6648_v46, %v4982_v47 }
  0x82   :  { %1322 = vmatpush.bf16.msrb.mxu1 %v5041_v54  ;;  %v5081_v54 = vor.u32 %v6672_v48, %v5078_v51 }
  0x83   :  { %1336 = vmatpush.bf16.msrb.mxu2 %v5137_v9  ;;  %v5174_v9 = vld [vmem:[#allocation4 + $0x1d4] sm:$0xf0] }
  0x84   :  { %1350 = vmatpush.bf16.msrb.mxu3 %v5233_v13 }
  0x85   :  { %1357 = vmatpush.bf16.msra.mxu0 %v5033_v55  ;;  %v6699_v55 = vld [vmem:[#allocation4 + $0x1e4] sm:$0xf] }
  0x86   :  { %1371 = vmatpush.bf16.msra.mxu1 %v5129_v59  ;;  %v5189_v59 = vor.u32 %v6699_v55, %v5186_v56  ;;  %v5150_v56 = vld [vmem:[#allocation4 + $0x1a4] sm:$0xf0] }
  0x87   :  { %1385 = vmatpush.bf16.msra.mxu2 %v5225_v17  ;;  %v6666_v17 = vld [vmem:[#allocation4 + $0xdc] sm:$0xf] }
  0x88   :  { %1399 = vmatpush.bf16.msra.mxu3 %v5321_v18 }
  0x89   :  { %1358 = vmatpush.bf16.msra.mxu0 %v5021_v4  ;;  %v4973_v4 = vor.u32 %v6645_v0, %v4970_v1 }
  0x8a   :  { %1372 = vmatpush.bf16.msra.mxu1 %v5117_v8  ;;  %v6696_v8 = vld [vmem:[#allocation4 + $0x1cc] sm:$0xf] }
  0x8b   :  { %1386 = vmatpush.bf16.msra.mxu2 %v5213_v29  ;;  %v5177_v11 = vor.u32 %v6696_v8, %v5174_v9  ;;  %v5162_v29 = vld [vmem:[#allocation4 + $0x1bc] sm:$0xf0]  ;;  %v5138_v8 = vld [vmem:[#allocation4 + $0x18c] sm:$0xf0] }
  0x8c   :  { %1400 = vmatpush.bf16.msra.mxu3 %v5309_v31  ;;  %v5165_v33 = vor.u32 %v6693_v28, %v5162_v29 }
  0x8d   :  { %1359 = vmatpush.bf16.msra.mxu0 %v5009_v23  ;;  %v5054_v23 = vld [vmem:[#allocation4 + $0xe4] sm:$0xf0] }
  0x8e   :  { %1373 = vmatpush.bf16.msra.mxu1 %v5105_v25  ;;  %v5057_v27 = vor.u32 %v6666_v17, %v5054_v23 }
  0x8f   :  { %1387 = vmatpush.bf16.msra.mxu2 %v5201_v43  ;;  %v6663_v43 = vld [vmem:[#allocation4 + $0xc4] sm:$0xf] }
  0x90   :  { %1401 = vmatpush.bf16.msra.mxu3 %v5297_v45  ;;  %v5045_v51 = vor.u32 %v6663_v43, %v5042_v44 }
  0x91   :  { %1360 = vmatpush.bf16.msra.mxu0 %v4997_v36 }
  0x92   :  { %1374 = vmatpush.bf16.msra.mxu1 %v5093_v38  ;;  %v5261_v38 = vor.u32 %v6717_v30, %v5258_v34 }
  0x93   :  { %1388 = vmatpush.bf16.msra.mxu2 %v5189_v59  ;;  %v5246_v59 = vld [vmem:[#allocation4 + $0x264] sm:$0xf0] }
  0x94   :  { %1402 = vmatpush.bf16.msra.mxu3 %v5285_v63  ;;  %v5249_v63 = vor.u32 %v6714_v57, %v5246_v59 }
  0x95   :  { %1361 = vmatpush.bf16.msra.mxu0 %v4985_v50 }
  0x96   :  { %1375 = vmatpush.bf16.msra.mxu1 %v5081_v54 }
  0x97   :  { %1389 = vmatpush.bf16.msra.mxu2 %v5177_v11 }
  0x98   :  { %1403 = vmatpush.bf16.msra.mxu3 %v5273_v14  ;;  %v5234_v14 = vld [vmem:[#allocation4 + $0x24c] sm:$0xf0] }
  0x99   :  { %1362 = vmatpush.bf16.msra.mxu0 %v4973_v4 }
  0x9a   :  { %1376 = vmatpush.bf16.msra.mxu1 %v5069_v7  ;;  %v6687_v7 = vld [vmem:[#allocation4 + $0x184] sm:$0xf] }
  0x9b   :  { %1390 = vmatpush.bf16.msra.mxu2 %v5165_v33  ;;  %v5141_v16 = vor.u32 %v6687_v7, %v5138_v8 }
  0x9c   :  { %1404 = vmatpush.bf16.msra.mxu3 %v5261_v38 }
  0x9d   :  { %1363 = vmatpush.bf16.msra.mxu0 %v4961_v21 }
  0x9e   :  { %1377 = vmatpush.bf16.msra.mxu1 %v5057_v27 }
  0xa0   :  { %1405 = vmatpush.bf16.msra.mxu3 %v5249_v63 }
  0xa2   :  { %1378 = vmatpush.bf16.msra.mxu1 %v5045_v51 }
  0xe1   :  { %v505_v49 = vpop.f32.mrf.mxu0 }
  0xe2   :  { %v7867_v52 = vadd.f32 %v505_v49, %v322_v35  ;;  %v519_v53 = vpop.f32.mrf.mxu1 }
  0xe3   :  { %v7871_v58 = vadd.f32 %v519_v53, %v323_v42  ;;  %v6690_v53 = vld [vmem:[#allocation4 + $0x19c] sm:$0xf] }
  0xe4   :  { %v552_v61 = vmul.f32 0.5, %v7867_v52 }
  0xe5   :  { %v553_v2 = vmul.f32 0.5, %v7871_v58 }
  0xe6   :  { %7080 = vtanh.f32 %v552_v61  ;;  %v5153_v61 = vor.u32 %v6690_v53, %v5150_v56 }
  0xe7   :  { %7082 = vtanh.f32 %v553_v2 }
  0xe8   :  { %1391 = vmatpush.bf16.msra.mxu2 %v5153_v61 }
  0xe9   :  { %v533_v13 = vpop.f32.mrf.mxu2  ;;  %v507_v20 = vpop.f32.mrf.mxu0 }
  0xea   :  { %v7879_v18 = vadd.f32 %v533_v13, %v324_v62  ;;  %v547_v19 = vpop.f32.mrf.mxu3  ;;  %v7887_v25 = vadd.f32 %v507_v20, %v322_v35  ;;  %v521_v26 = vpop.f32.mrf.mxu1  ;;  %v6711_v13 = vld [vmem:[#allocation4 + $0x244] sm:$0xf] }
  0xeb   :  { %v7883_v24 = vadd.f32 %v547_v19, %v325_v3  ;;  %v7892_v32 = vadd.f32 %v521_v26, %v323_v42  ;;  %v4946_v42 = vld [vmem:[#allocation4 + $0xc] sm:$0xf0]  ;;  %v5237_v26 = vor.u32 %v6711_v13, %v5234_v14 }
  0xec   :  { %v554_v31 = vmul.f32 0.5, %v7879_v18  ;;  %v7894_v36 = vpop.eup %7080  ;;  %v556_v37 = vmul.f32 0.5, %v7887_v25  ;;  %v4949_v50 = vor.u32 %v6639_v39, %v4946_v42  ;;  %1392 = vmatpush.bf16.msra.mxu2 %v5141_v16 }
  0xed   :  { %v555_v35 = vmul.f32 0.5, %v7883_v24  ;;  %v7898_v40 = vpop.eup %7082  ;;  %v592_v41 = vmul.f32 %v7894_v36, %v7894_v36  ;;  %v557_v47 = vmul.f32 0.5, %v7892_v32  ;;  %v584_v9 = vmul.f32 2.0, %v7894_v36  ;;  %1406 = vmatpush.bf16.msra.mxu3 %v5237_v26 }
  0xee   :  { %7084 = vtanh.f32 %v554_v31  ;;  %v593_v45 = vmul.f32 %v7898_v40, %v7898_v40  ;;  %1364 = vmatpush.bf16.msra.mxu0 %v4949_v50  ;;  %v585_v19 = vmul.f32 2.0, %v7898_v40  ;;  %v568_v27 = vadd.f32 1.0, %v7894_v36  ;;  %v6662_v50 = vld [vmem:[#allocation4 + $0xb8] sm:$0xf0] }
  0xef   :  { %7086 = vtanh.f32 %v555_v35  ;;  %v600_v46 = vadd.f32 1.0, %v592_v41  ;;  %v569_v28 = vadd.f32 1.0, %v7898_v40 }
  0xf0   :  { %7088 = vtanh.f32 %v556_v37  ;;  %v601_v48 = vadd.f32 1.0, %v593_v45  ;;  %v576_v44 = vmul.f32 0.5, %v568_v27 }
  0xf1   :  { %v535_v49 = vpop.f32.mrf.mxu2  ;;  %7090 = vrcp.f32 %v600_v46  ;;  %v577_v45 = vmul.f32 0.5, %v569_v28 }
  0xf2   :  { %v7907_v54 = vadd.f32 %v535_v49, %v324_v62  ;;  %v549_v55 = vpop.f32.mrf.mxu3  ;;  %7092 = vtanh.f32 %v557_v47  ;;  %v5036_v49 = vld [vmem:[#allocation4 + $0xb0] sm:$0xf] }
  0xf3   :  { %v7911_v60 = vadd.f32 %v549_v55, %v325_v3  ;;  %7094 = vrcp.f32 %v601_v48 }
  0xf4   :  { %v7085_v0 = vpop.eup %7084  ;;  %v558_v1 = vmul.f32 0.5, %v7907_v54 }
  0xf5   :  { %v7914_v2 = vpop.eup %7086  ;;  %v594_v62 = vmul.f32 %v7085_v0, %v7085_v0  ;;  %v559_v4 = vmul.f32 0.5, %v7911_v60  ;;  %v586_v39 = vmul.f32 2.0, %v7085_v0  ;;  %v570_v40 = vadd.f32 1.0, %v7085_v0 }
  0xf6   :  { %v7089_v5 = vpop.eup %7088  ;;  %v595_v22 = vmul.f32 %v7914_v2, %v7914_v2  ;;  %7096 = vtanh.f32 %v558_v1  ;;  %v587_v53 = vmul.f32 2.0, %v7914_v2 }
  0xf7   :  { %v602_v3 = vadd.f32 1.0, %v594_v62  ;;  %v596_v6 = vmul.f32 %v7089_v5, %v7089_v5  ;;  %7098 = vtanh.f32 %v559_v4  ;;  %v7091_v11 = vpop.eup %7090  ;;  %v572_v37 = vadd.f32 1.0, %v7089_v5 }
  0xf8   :  { %v603_v10 = vadd.f32 1.0, %v595_v22  ;;  %v7093_v15 = vpop.eup %7092  ;;  %v616_v23 = vmul.f32 %v7091_v11, %v584_v9  ;;  %v588_v41 = vmul.f32 2.0, %v7089_v5  ;;  %v5037_v62 = vor.u32 %v6662_v50, %v5036_v49  ;;  %v5012_v49 = vld [vmem:[#allocation4 + $0x80] sm:$0xf]  ;;  %v6656_v50 = vld [vmem:[#allocation4 + $0x88] sm:$0xf0] }
  0xf9   :  { %7100 = vrcp.f32 %v602_v3  ;;  %v604_v12 = vadd.f32 1.0, %v596_v6  ;;  %v7095_v17 = vpop.eup %7094  ;;  %v597_v20 = vmul.f32 %v7093_v15, %v7093_v15  ;;  %v580_v55 = vmul.f32 0.5, %v572_v37 }
  0xfa   :  { %v617_v34 = vmul.f32 %v7095_v17, %v585_v19  ;;  %v624_v38 = vsub.f32 %v616_v23, %v7867_v52  ;;  %v573_v56 = vadd.f32 1.0, %v7093_v15  ;;  %v589_v61 = vmul.f32 2.0, %v7093_v15  ;;  %v5132_v15 = vld [vmem:[#allocation4 + $0x170] sm:$0xf]  ;;  %v6686_v19 = vld [vmem:[#allocation4 + $0x178] sm:$0xf0] }
  0xfb   :  { %7102 = vrcp.f32 %v604_v12  ;;  %v605_v29 = vadd.f32 1.0, %v597_v20  ;;  %v578_v8 = vmul.f32 0.5, %v570_v40  ;;  %v571_v9 = vadd.f32 1.0, %v7914_v2 }
  0xfc   :  { %v7097_v21 = vpop.eup %7096  ;;  %7104 = vrcp.f32 %v603_v10  ;;  %v625_v51 = vsub.f32 %v617_v34, %v7871_v58  ;;  %v632_v57 = vmul.f32 %v624_v38, %v576_v44  ;;  %v581_v10 = vmul.f32 0.5, %v573_v56  ;;  %v6710_v38 = vld [vmem:[#allocation4 + $0x238] sm:$0xf0] }
  0xfd   :  { %v598_v30 = vmul.f32 %v7097_v21, %v7097_v21  ;;  %v7099_v31 = vpop.eup %7098  ;;  %7106 = vrcp.f32 %v605_v29  ;;  %v574_v0 = vadd.f32 1.0, %v7097_v21  ;;  %v590_v22 = vmul.f32 2.0, %v7097_v21  ;;  %v6659_v29 = vld [vmem:[#allocation4 + $0xa0] sm:$0xf0] }
  0xfe   :  { %v599_v42 = vmul.f32 %v7099_v31, %v7099_v31  ;;  %v633_v7 = vmul.f32 %v625_v51, %v577_v45  ;;  %v640_v11 = vadd.f32 %v632_v57, %v7867_v52  ;;  %v591_v17 = vmul.f32 2.0, %v7099_v31  ;;  %v5024_v52 = vld [vmem:[#allocation4 + $0x98] sm:$0xf] }
  0xff   :  { %v7101_v33 = vpop.eup %7100  ;;  %v606_v35 = vadd.f32 1.0, %v598_v30  ;;  %v582_v20 = vmul.f32 0.5, %v574_v0  ;;  %v575_v21 = vadd.f32 1.0, %v7099_v31  ;;  %v579_v30 = vmul.f32 0.5, %v571_v9  ;;  %v5228_v31 = vld [vmem:[#allocation4 + $0x230] sm:$0xf] }
 0x100   :  { %v618_v46 = vmul.f32 %v7101_v33, %v586_v39  ;;  %v607_v48 = vadd.f32 1.0, %v599_v42  ;;  %v5025_v42 = vor.u32 %v6659_v29, %v5024_v52  ;;  %v6677_v9 = vld [vmem:[#allocation4 + $0x130] sm:$0xf0]  ;;  %v4976_v52 = vld [vmem:[#allocation4 + $0x38] sm:$0xf] }
 0x101   :  { %v7103_v43 = vpop.eup %7102  ;;  %7108 = vrcp.f32 %v606_v35  ;;  %v5133_v35 = vor.u32 %v6686_v19, %v5132_v15  ;;  %v5192_v15 = vld [vmem:[#allocation4 + $0x1e8] sm:$0xf]  ;;  %v6647_v29 = vld [vmem:[#allocation4 + $0x40] sm:$0xf0] }
 0x102   :  { %v7105_v36 = vpop.eup %7104  ;;  %v620_v47 = vmul.f32 %v7103_v43, %v588_v41  ;;  %7110 = vrcp.f32 %v607_v48  ;;  %v626_v4 = vsub.f32 %v618_v46, %v7879_v18  ;;  %v583_v43 = vmul.f32 0.5, %v575_v21  ;;  %v5324_v46 = vld [vmem:[#allocation4 + $0x2f0] sm:$0xf]  ;;  %v6734_v48 = vld [vmem:[#allocation4 + $0x2f8] sm:$0xf0] }
 0x103   :  { %v7107_v63 = vpop.eup %7106  ;;  %v619_v1 = vmul.f32 %v7105_v36, %v587_v53  ;;  %v5120_v36 = vld [vmem:[#allocation4 + $0x158] sm:$0xf]  ;;  %v5084_v21 = vld [vmem:[#allocation4 + $0x110] sm:$0xf] }
 0x104   :  { %v628_v59 = vsub.f32 %v620_v47, %v7887_v25  ;;  %v621_v5 = vmul.f32 %v7107_v63, %v589_v61  ;;  %v634_v26 = vmul.f32 %v626_v4, %v578_v8  ;;  %v5229_v47 = vor.u32 %v6710_v38, %v5228_v31  ;;  %v5216_v53 = vld [vmem:[#allocation4 + $0x218] sm:$0xf]  ;;  %v5108_v61 = vld [vmem:[#allocation4 + $0x140] sm:$0xf]  ;;  %v6680_v63 = vld [vmem:[#allocation4 + $0x148] sm:$0xf0] }
 0x105   :  { %v627_v16 = vsub.f32 %v619_v1, %v7883_v24  ;;  %v5312_v1 = vld [vmem:[#allocation4 + $0x2d8] sm:$0xf]  ;;  %v6731_v4 = vld [vmem:[#allocation4 + $0x2e0] sm:$0xf0]  ;;  %v5096_v8 = vld [vmem:[#allocation4 + $0x128] sm:$0xf] }
 0x106   :  { %v636_v3 = vmul.f32 %v628_v59, %v580_v55  ;;  %v629_v12 = vsub.f32 %v621_v5, %v7892_v32  ;;  %v642_v44 = vadd.f32 %v634_v26, %v7879_v18  ;;  %v6707_v55 = vld [vmem:[#allocation4 + $0x220] sm:$0xf0]  ;;  %v5013_v59 = vor.u32 %v6656_v50, %v5012_v49  ;;  %v5000_v5 = vld [vmem:[#allocation4 + $0x68] sm:$0xf]  ;;  %v5276_v38 = vld [vmem:[#allocation4 + $0x290] sm:$0xf] }
 0x107   :  { %v7109_v6 = vpop.eup %7108  ;;  %v635_v39 = vmul.f32 %v627_v16, %v579_v30  ;;  %v5217_v0 = vor.u32 %v6707_v55, %v5216_v53  ;;  %v6701_v16 = vld [vmem:[#allocation4 + $0x1f0] sm:$0xf0]  ;;  %v5288_v26 = vld [vmem:[#allocation4 + $0x2a8] sm:$0xf]  ;;  %v6671_v31 = vld [vmem:[#allocation4 + $0x100] sm:$0xf0] }
 0x108   :  { %v622_v13 = vmul.f32 %v7109_v6, %v590_v22  ;;  %v644_v14 = vadd.f32 %v636_v3, %v7887_v25  ;;  %v7111_v23 = vpop.eup %7110  ;;  %v637_v28 = vmul.f32 %v629_v12, %v581_v10  ;;  %v641_v25 = vadd.f32 %v633_v7, %v7871_v58  ;;  %v6683_v58 = vld [vmem:[#allocation4 + $0x160] sm:$0xf0]  ;;  %v6653_v22 = vld [vmem:[#allocation4 + $0x70] sm:$0xf0]  ;;  %v6704_v3 = vld [vmem:[#allocation4 + $0x208] sm:$0xf0] }
 0x109   :  { %v623_v33 = vmul.f32 %v7111_v23, %v591_v17  ;;  %v643_v18 = vadd.f32 %v635_v39, %v7883_v24  ;;  %v5121_v56 = vor.u32 %v6683_v58, %v5120_v36  ;;  %v5204_v24 = vld [vmem:[#allocation4 + $0x200] sm:$0xf]  ;;  %v5313_v6 = vor.u32 %v6731_v4, %v5312_v1  ;;  %v6728_v12 = vld [vmem:[#allocation4 + $0x2c8] sm:$0xf0]  ;;  %v6674_v23 = vld [vmem:[#allocation4 + $0x118] sm:$0xf0] }
 0x10a   :  { %v630_v27 = vsub.f32 %v622_v13, %v7907_v54  ;;  %v7934_v2 = vpack.c.bf16 %v644_v14, %v640_v11  ;;  %v645_v34 = vadd.f32 %v637_v28, %v7892_v32  ;;  %v5001_v7 = vor.u32 %v6653_v22, %v5000_v5  ;;  %v5300_v10 = vld [vmem:[#allocation4 + $0x2c0] sm:$0xf]  ;;  %v4988_v13 = vld [vmem:[#allocation4 + $0x50] sm:$0xf]  ;;  %v6650_v14 = vld [vmem:[#allocation4 + $0x58] sm:$0xf0] }
 0x10b   :  { %v631_v41 = vsub.f32 %v623_v33, %v7911_v60  ;;  %v5205_v11 = vor.u32 %v6704_v3, %v5204_v24  ;;  %v5097_v17 = vor.u32 %v6677_v9, %v5096_v8  ;;  %v5301_v19 = vor.u32 %v6728_v12, %v5300_v10  ;;  %v6725_v28 = vld [vmem:[#allocation4 + $0x2b0] sm:$0xf0]  ;;  %v5180_v33 = vld [vmem:[#allocation4 + $0x1d0] sm:$0xf]  ;;  %v6722_v39 = vld [vmem:[#allocation4 + $0x298] sm:$0xf0] }
 0x10c   :  { %1309 = vmatmul.bf16.vlgmr.msrb.gmra.mxu0 %v7934_v2  ;;  %v638_v37 = vmul.f32 %v630_v27, %v582_v20  ;;  %v7941_v45 = vpack.c.bf16 %v645_v34, %v641_v25  ;;  %v4989_v20 = vor.u32 %v6650_v14, %v4988_v13  ;;  %v5193_v27 = vor.u32 %v6701_v16, %v5192_v15  ;;  %v6698_v25 = vld [vmem:[#allocation4 + $0x1d8] sm:$0xf0]  ;;  %v5168_v36 = vld [vmem:[#allocation4 + $0x1b8] sm:$0xf]  ;;  %v6695_v58 = vld [vmem:[#allocation4 + $0x1c0] sm:$0xf0] }
 0x10d   :  { %1413 = vmatpush.bf16.msrb.mxu0 %v5037_v62  ;;  %v639_v32 = vmul.f32 %v631_v41, %v583_v43  ;;  %v5085_v30 = vor.u32 %v6674_v23, %v5084_v21  ;;  %v5289_v34 = vor.u32 %v6725_v28, %v5288_v26  ;;  %v4964_v41 = vld [vmem:[#allocation4 + $0x20] sm:$0xf]  ;;  %v5181_v43 = vor.u32 %v6698_v25, %v5180_v33  ;;  %v6719_v49 = vld [vmem:[#allocation4 + $0x280] sm:$0xf0]  ;;  %v4952_v50 = vld [vmem:[#allocation4 + $0x8] sm:$0xf] }
 0x10e   :  { %v646_v40 = vadd.f32 %v638_v37, %v7907_v54  ;;  %1323 = vmatmul.bf16.vlgmr.msrb.gmra.mxu1 %v7941_v45  ;;  %v5325_v54 = vor.u32 %v6734_v48, %v5324_v46  ;;  %v5072_v37 = vld [vmem:[#allocation4 + $0xf8] sm:$0xf]  ;;  %v6641_v53 = vld [vmem:[#allocation4 + $0x10] sm:$0xf0]  ;;  %v5169_v55 = vor.u32 %v6695_v58, %v5168_v36  ;;  %v5048_v1 = vld [vmem:[#allocation4 + $0xc8] sm:$0xf] }
 0x10f   :  { %1427 = vmatpush.bf16.msrb.mxu1 %v5133_v35  ;;  %v647_v57 = vadd.f32 %v639_v32, %v7911_v60  ;;  %v5109_v60 = vor.u32 %v6680_v63, %v5108_v61  ;;  %v4977_v35 = vor.u32 %v6647_v29, %v4976_v52  ;;  %v5060_v32 = vld [vmem:[#allocation4 + $0xe0] sm:$0xf]  ;;  %v5264_v48 = vld [vmem:[#allocation4 + $0x278] sm:$0xf]  ;;  %v4953_v63 = vor.u32 %v6641_v53, %v4952_v50  ;;  %v6716_v5 = vld [vmem:[#allocation4 + $0x268] sm:$0xf0] }
 0x110   :  { %v7945_v51 = vpack.c.bf16 %v646_v40, %v642_v44  ;;  %v5073_v44 = vor.u32 %v6671_v31, %v5072_v37  ;;  %v5277_v40 = vor.u32 %v6722_v39, %v5276_v38  ;;  %v5265_v61 = vor.u32 %v6719_v49, %v5264_v48  ;;  %v5252_v4 = vld [vmem:[#allocation4 + $0x260] sm:$0xf]  ;;  %v5240_v8 = vld [vmem:[#allocation4 + $0x248] sm:$0xf]  ;;  %v6713_v9 = vld [vmem:[#allocation4 + $0x250] sm:$0xf0] }
 0x111   :  { %1414 = vmatpush.bf16.msrb.mxu0 %v5025_v42  ;;  %v7950_v62 = vpack.c.bf16 %v647_v57, %v643_v18  ;;  %v6644_v42 = vld [vmem:[#allocation4 + $0x28] sm:$0xf0]  ;;  %v5412_v18 = vld [vmem:[#allocation6 + $0xa8] sm:$0xf]  ;;  %v5400_v12 = vld [vmem:[#allocation6 + $0x90] sm:$0xf] }
 0x112   :  { %1337 = vmatmul.bf16.vlgmr.msrb.gmra.mxu2 %v7945_v51  ;;  %v4965_v46 = vor.u32 %v6644_v42, %v4964_v41  ;;  %v6754_v13 = vld [vmem:[#allocation6 + $0x98] sm:$0xf0]  ;;  %v5388_v15 = vld [vmem:[#allocation6 + $0x78] sm:$0xf]  ;;  %v6751_v16 = vld [vmem:[#allocation6 + $0x80] sm:$0xf0] }
 0x113   :  { %1441 = vmatpush.bf16.msrb.mxu2 %v5229_v47  ;;  %1428 = vmatpush.bf16.msrb.mxu1 %v5121_v56  ;;  %v6668_v47 = vld [vmem:[#allocation4 + $0xe8] sm:$0xf0]  ;;  %v6757_v56 = vld [vmem:[#allocation6 + $0xb0] sm:$0xf0]  ;;  %v5401_v14 = vor.u32 %v6754_v13, %v5400_v12  ;;  %v5414_v23 = vld [vmem:[#allocation6 + $0xb4] sm:$0xf0] }
 0x114   :  { %1351 = vmatmul.bf16.vlgmr.msrb.gmra.mxu3 %v7950_v62  ;;  %v5061_v57 = vor.u32 %v6668_v47, %v5060_v32  ;;  %v5413_v22 = vor.u32 %v6757_v56, %v5412_v18  ;;  %v6756_v21 = vld [vmem:[#allocation6 + $0xac] sm:$0xf]  ;;  %v5364_v26 = vld [vmem:[#allocation6 + $0x48] sm:$0xf]  ;;  %v5402_v28 = vld [vmem:[#allocation6 + $0x9c] sm:$0xf0] }
 0x115   :  { %1455 = vmatpush.bf16.msrb.mxu3 %v5325_v54  ;;  %1415 = vmatpush.bf16.msrb.mxu0 %v5013_v59  ;;  %v5156_v54 = vld [vmem:[#allocation4 + $0x1a0] sm:$0xf]  ;;  %v6692_v59 = vld [vmem:[#allocation4 + $0x1a8] sm:$0xf0]  ;;  %v5352_v29 = vld [vmem:[#allocation6 + $0x30] sm:$0xf] }
 0x116   :  { %v5157_v24 = vor.u32 %v6692_v59, %v5156_v54  ;;  %v6750_v25 = vld [vmem:[#allocation6 + $0x7c] sm:$0xf]  ;;  %v5340_v37 = vld [vmem:[#allocation6 + $0x18] sm:$0xf]  ;;  %v6739_v31 = vld [vmem:[#allocation6 + $0x20] sm:$0xf0] }
 0x117   :  { %1442 = vmatpush.bf16.msrb.mxu2 %v5217_v0  ;;  %1429 = vmatpush.bf16.msrb.mxu1 %v5109_v60  ;;  %v6665_v0 = vld [vmem:[#allocation4 + $0xd0] sm:$0xf0]  ;;  %v5144_v60 = vld [vmem:[#allocation4 + $0x188] sm:$0xf]  ;;  %v5341_v38 = vor.u32 %v6739_v31, %v5340_v37  ;;  %v6747_v39 = vld [vmem:[#allocation6 + $0x64] sm:$0xf] }
 0x118   :  { %v5049_v3 = vor.u32 %v6665_v0, %v5048_v1  ;;  %v5378_v41 = vld [vmem:[#allocation6 + $0x6c] sm:$0xf0]  ;;  %v5508_v58 = vld [vmem:[#allocation6 + $0x168] sm:$0xf]  ;;  %v5366_v47 = vld [vmem:[#allocation6 + $0x54] sm:$0xf0] }
 0x119   :  { %1456 = vmatpush.bf16.msrb.mxu3 %v5313_v6  ;;  %1416 = vmatpush.bf16.msrb.mxu0 %v5001_v7  ;;  %v6689_v6 = vld [vmem:[#allocation4 + $0x190] sm:$0xf0]  ;;  %v5253_v7 = vor.u32 %v6716_v5, %v5252_v4  ;;  %v5381_v42 = vor.u32 %v6747_v39, %v5378_v41  ;;  %v6780_v48 = vld [vmem:[#allocation6 + $0x16c] sm:$0xf]  ;;  %v5510_v49 = vld [vmem:[#allocation6 + $0x174] sm:$0xf0] }
 0x11a   :  { %v5145_v10 = vor.u32 %v6689_v6, %v5144_v60  ;;  %v5513_v53 = vor.u32 %v6780_v48, %v5510_v49  ;;  %v5496_v56 = vld [vmem:[#allocation6 + $0x150] sm:$0xf]  ;;  %v6741_v54 = vld [vmem:[#allocation6 + $0x34] sm:$0xf]  ;;  %v5498_v1 = vld [vmem:[#allocation6 + $0x15c] sm:$0xf0] }
 0x11b   :  { %1443 = vmatpush.bf16.msrb.mxu2 %v5205_v11  ;;  %1430 = vmatpush.bf16.msrb.mxu1 %v5097_v17  ;;  %v5241_v11 = vor.u32 %v6713_v9, %v5240_v8  ;;  %v5389_v17 = vor.u32 %v6751_v16, %v5388_v15  ;;  %v6738_v60 = vld [vmem:[#allocation6 + $0x1c] sm:$0xf]  ;;  %v5486_v9 = vld [vmem:[#allocation6 + $0x144] sm:$0xf0]  ;;  %v6772_v15 = vld [vmem:[#allocation6 + $0x128] sm:$0xf0] }
 0x11c   :  { %1365 = vmatmul.bf16.vlgmr.msra.gmra.mxu0 %v7934_v2  ;;  %v6774_v8 = vld [vmem:[#allocation6 + $0x13c] sm:$0xf]  ;;  %v6735_v16 = vld [vmem:[#allocation6 + $0x4] sm:$0xf]  ;;  %v5462_v37 = vld [vmem:[#allocation6 + $0x114] sm:$0xf0] }
 0x11d   :  { %1457 = vmatpush.bf16.msrb.mxu3 %v5301_v19  ;;  %1417 = vmatpush.bf16.msrb.mxu0 %v4989_v20  ;;  %v5376_v19 = vld [vmem:[#allocation6 + $0x60] sm:$0xf]  ;;  %v5504_v39 = vld [vmem:[#allocation6 + $0x158] sm:$0xf]  ;;  %v6779_v41 = vld [vmem:[#allocation6 + $0x160] sm:$0xf0] }
 0x11e   :  { %1379 = vmatmul.bf16.vlgmr.msra.gmra.mxu1 %v7941_v45  ;;  %v6802_v48 = vld [vmem:[#allocation6 + $0x218] sm:$0xf0]  ;;  %v6765_v49 = vld [vmem:[#allocation6 + $0xf4] sm:$0xf] }
 0x11f   :  { %1444 = vmatpush.bf16.msrb.mxu2 %v5193_v27  ;;  %1431 = vmatpush.bf16.msrb.mxu1 %v5085_v30  ;;  %v6742_v30 = vld [vmem:[#allocation6 + $0x38] sm:$0xf0] }
 0x120   :  { %v5353_v33 = vor.u32 %v6742_v30, %v5352_v29  ;;  %v6769_v29 = vld [vmem:[#allocation6 + $0x110] sm:$0xf0]  ;;  %v5604_v30 = vld [vmem:[#allocation6 + $0x228] sm:$0xf] }
 0x121   :  { %1458 = vmatpush.bf16.msrb.mxu3 %v5289_v34  ;;  %1418 = vmatpush.bf16.msrb.mxu0 %v4977_v35  ;;  %v5390_v34 = vld [vmem:[#allocation6 + $0x84] sm:$0xf0] }
 0x122   :  { %1393 = vmatmul.bf16.vlgmr.msra.gmra.mxu2 %v7945_v51  ;;  %v5393_v35 = vor.u32 %v6750_v25, %v5390_v34  ;;  %v6805_v34 = vld [vmem:[#allocation6 + $0x230] sm:$0xf0] }
 0x123   :  { %1445 = vmatpush.bf16.msrb.mxu2 %v5181_v43  ;;  %1432 = vmatpush.bf16.msrb.mxu1 %v5073_v44  ;;  %v5328_v43 = vld [vmem:[#allocation6] sm:$0xf]  ;;  %v6736_v44 = vld [vmem:[#allocation6 + $0x8] sm:$0xf0]  ;;  %v5605_v31 = vor.u32 %v6805_v34, %v5604_v30 }
 0x124   :  { %1407 = vmatmul.bf16.vlgmr.msra.gmra.mxu3 %v7950_v62  ;;  %v5329_v36 = vor.u32 %v6736_v44, %v5328_v43  ;;  %v5505_v44 = vor.u32 %v6779_v41, %v5504_v39  ;;  %v6793_v39 = vld [vmem:[#allocation6 + $0x1d0] sm:$0xf0] }
 0x125   :  { %1459 = vmatpush.bf16.msrb.mxu3 %v5277_v40  ;;  %1419 = vmatpush.bf16.msrb.mxu0 %v4965_v46  ;;  %v6781_v40 = vld [vmem:[#allocation6 + $0x170] sm:$0xf0]  ;;  %v6744_v46 = vld [vmem:[#allocation6 + $0x4c] sm:$0xf] }
 0x126   :  { %v5509_v32 = vor.u32 %v6781_v40, %v5508_v58  ;;  %v5369_v50 = vor.u32 %v6744_v46, %v5366_v47  ;;  %v5448_v40 = vld [vmem:[#allocation6 + $0xf0] sm:$0xf]  ;;  %v6766_v46 = vld [vmem:[#allocation6 + $0xf8] sm:$0xf0]  ;;  %v6801_v41 = vld [vmem:[#allocation6 + $0x214] sm:$0xf] }
 0x127   :  { %1446 = vmatpush.bf16.msrb.mxu2 %v5169_v55  ;;  %1433 = vmatpush.bf16.msrb.mxu1 %v5061_v57  ;;  %v7961_v55 = vld [vmem:[#allocation24 + $0x1] ss:$8 sm:$0xf]  ;;  %v6778_v57 = vld [vmem:[#allocation6 + $0x158] sm:$0xf0]  ;;  %v5449_v47 = vor.u32 %v6766_v46, %v5448_v40 }
 0x128   :  { %v5497_v59 = vor.u32 %v6778_v57, %v5496_v56  ;;  %v783_v5 = vperm.slane %v7961_v55, 0  ;;  %v5492_v57 = vld [vmem:[#allocation6 + $0x140] sm:$0xf]  ;;  %v6767_v40 = vld [vmem:[#allocation6 + $0x100] sm:$0xf0] }
 0x129   :  { %1460 = vmatpush.bf16.msrb.mxu3 %v5265_v61  ;;  %1420 = vmatpush.bf16.msrb.mxu0 %v4953_v63  ;;  %v5354_v61 = vld [vmem:[#allocation6 + $0x3c] sm:$0xf0]  ;;  %v6777_v63 = vld [vmem:[#allocation6 + $0x154] sm:$0xf] }
 0x12a   :  { %v5357_v0 = vor.u32 %v6741_v54, %v5354_v61  ;;  %v5501_v4 = vor.u32 %v6777_v63, %v5498_v1  ;;  %v6776_v54 = vld [vmem:[#allocation6 + $0x148] sm:$0xf0]  ;;  %v784_v61 = vperm.slane %v7961_v55, 1 }
 0x12b   :  { %1447 = vmatpush.bf16.msrb.mxu2 %v5157_v24  ;;  %1434 = vmatpush.bf16.msrb.mxu1 %v5049_v3  ;;  %v5484_v24 = vld [vmem:[#allocation6 + $0x138] sm:$0xf]  ;;  %v6775_v3 = vld [vmem:[#allocation6 + $0x140] sm:$0xf0]  ;;  %v5493_v63 = vor.u32 %v6776_v54, %v5492_v57  ;;  %v6798_v57 = vld [vmem:[#allocation6 + $0x1fc] sm:$0xf] }
 0x12c   :  { %1421 = vmatmul.bf16.vlgmr.msrb.gmra.mxu0 %v7934_v2  ;;  %v6748_v2 = vld [vmem:[#allocation6 + $0x68] sm:$0xf0]  ;;  %v5485_v6 = vor.u32 %v6775_v3, %v5484_v24  ;;  %v5582_v54 = vld [vmem:[#allocation6 + $0x204] sm:$0xf0] }
 0x12d   :  { %2033 = vmatpush.bf16.msra.mxu0 %v5413_v22  ;;  %1461 = vmatpush.bf16.msrb.mxu3 %v5253_v7  ;;  %v5377_v20 = vor.u32 %v6748_v2, %v5376_v19  ;;  %v5342_v7 = vld [vmem:[#allocation6 + $0x24] sm:$0xf0]  ;;  %v5330_v19 = vld [vmem:[#allocation6 + $0xc] sm:$0xf0]  ;;  %v6771_v2 = vld [vmem:[#allocation6 + $0x124] sm:$0xf] }
 0x12e   :  { %1435 = vmatmul.bf16.vlgmr.msrb.gmra.mxu1 %v7941_v45  ;;  %v5417_v45 = vor.u32 %v6756_v21, %v5414_v23  ;;  %v5333_v21 = vor.u32 %v6735_v16, %v5330_v19  ;;  %v5424_v16 = vld [vmem:[#allocation6 + $0xc0] sm:$0xf] }
 0x12f   :  { %1448 = vmatpush.bf16.msrb.mxu2 %v5145_v10  ;;  %2047 = vmatpush.bf16.msra.mxu1 %v5509_v32  ;;  %v5345_v10 = vor.u32 %v6738_v60, %v5342_v7  ;;  %v5592_v32 = vld [vmem:[#allocation6 + $0x210] sm:$0xf]  ;;  %v6799_v60 = vld [vmem:[#allocation6 + $0x200] sm:$0xf0]  ;;  %v5438_v7 = vld [vmem:[#allocation6 + $0xe4] sm:$0xf0] }
 0x130   :  { %v5568_v19 = vld [vmem:[#allocation6 + $0x1e0] sm:$0xf] }
 0x131   :  { %1462 = vmatpush.bf16.msrb.mxu3 %v5241_v11  ;;  %2034 = vmatpush.bf16.msra.mxu0 %v5401_v14  ;;  %v5489_v11 = vor.u32 %v6774_v8, %v5486_v9  ;;  %v5472_v14 = vld [vmem:[#allocation6 + $0x120] sm:$0xf] }
 0x132   :  { %1449 = vmatmul.bf16.vlgmr.msrb.gmra.mxu2 %v7945_v51  ;;  %v6745_v51 = vld [vmem:[#allocation6 + $0x50] sm:$0xf0] }
 0x133   :  { %v5365_v27 = vor.u32 %v6745_v51, %v5364_v26  ;;  %2048 = vmatpush.bf16.msra.mxu1 %v5497_v59  ;;  %v6782_v26 = vld [vmem:[#allocation6 + $0x178] sm:$0xf0]  ;;  %2061 = vmatpush.bf16.msra.mxu2 %v5605_v31 }
 0x134   :  { %1463 = vmatmul.bf16.vlgmr.msrb.gmra.mxu3 %v7950_v62  ;;  %v6753_v62 = vld [vmem:[#allocation6 + $0x94] sm:$0xf] }
 0x135   :  { %2035 = vmatpush.bf16.msra.mxu0 %v5389_v17  ;;  %2075 = vmatpush.bf16.msra.mxu3 %v5417_v45  ;;  %v5405_v52 = vor.u32 %v6753_v62, %v5402_v28  ;;  %v5473_v17 = vor.u32 %v6772_v15, %v5472_v14  ;;  %v5516_v45 = vld [vmem:[#allocation6 + $0x170] sm:$0xf] }
 0x137   :  { %2049 = vmatpush.bf16.msra.mxu1 %v5485_v6  ;;  %v6762_v6 = vld [vmem:[#allocation6 + $0xdc] sm:$0xf] }
 0x138   :  { %v5441_v9 = vor.u32 %v6762_v6, %v5438_v7  ;;  %v6787_v6 = vld [vmem:[#allocation6 + $0x1a0] sm:$0xf0] }
 0x139   :  { %2036 = vmatpush.bf16.msra.mxu0 %v5377_v20  ;;  %2076 = vmatpush.bf16.msra.mxu3 %v5405_v52  ;;  %v5474_v20 = vld [vmem:[#allocation6 + $0x12c] sm:$0xf0]  ;;  %v5460_v52 = vld [vmem:[#allocation6 + $0x108] sm:$0xf] }
 0x13a   :  { %v5477_v23 = vor.u32 %v6771_v2, %v5474_v20  ;;  %v5461_v25 = vor.u32 %v6769_v29, %v5460_v52  ;;  %v5606_v52 = vld [vmem:[#allocation6 + $0x234] sm:$0xf0] }
 0x13b   :  { %2050 = vmatpush.bf16.msra.mxu1 %v5473_v17  ;;  %v6760_v17 = vld [vmem:[#allocation6 + $0xc8] sm:$0xf0] }
 0x13c   :  { %v5425_v20 = vor.u32 %v6760_v17, %v5424_v16  ;;  %v5432_v17 = vld [vmem:[#allocation6 + $0xc8] sm:$0xf] }
 0x13d   :  { %2037 = vmatpush.bf16.msra.mxu0 %v5365_v27  ;;  %2077 = vmatpush.bf16.msra.mxu3 %v5393_v35  ;;  %v5517_v27 = vor.u32 %v6782_v26, %v5516_v45  ;;  %v6768_v35 = vld [vmem:[#allocation6 + $0x10c] sm:$0xf]  ;;  %v5426_v45 = vld [vmem:[#allocation6 + $0xcc] sm:$0xf0] }
 0x13f   :  { %2051 = vmatpush.bf16.msra.mxu1 %v5461_v25  ;;  %v6770_v25 = vld [vmem:[#allocation6 + $0x118] sm:$0xf0] }
 0x141   :  { %2038 = vmatpush.bf16.msra.mxu0 %v5353_v33  ;;  %2078 = vmatpush.bf16.msra.mxu3 %v5381_v42 }
 0x143   :  { %2052 = vmatpush.bf16.msra.mxu1 %v5449_v47 }
 0x145   :  { %2039 = vmatpush.bf16.msra.mxu0 %v5341_v38  ;;  %2079 = vmatpush.bf16.msra.mxu3 %v5369_v50  ;;  %v5465_v38 = vor.u32 %v6768_v35, %v5462_v37  ;;  %v5450_v50 = vld [vmem:[#allocation6 + $0xfc] sm:$0xf0]  ;;  %v5556_v37 = vld [vmem:[#allocation6 + $0x1c8] sm:$0xf] }
 0x146   :  { %v5453_v56 = vor.u32 %v6765_v49, %v5450_v50 }
 0x149   :  { %2040 = vmatpush.bf16.msra.mxu0 %v5329_v36  ;;  %2080 = vmatpush.bf16.msra.mxu3 %v5357_v0  ;;  %v5436_v0 = vld [vmem:[#allocation6 + $0xd8] sm:$0xf] }
 0x14d   :  { %2089 = vmatpush.bf16.msrb.mxu0 %v5513_v53  ;;  %2081 = vmatpush.bf16.msra.mxu3 %v5345_v10  ;;  %v5480_v10 = vld [vmem:[#allocation6 + $0x128] sm:$0xf] }
 0x151   :  { %2090 = vmatpush.bf16.msrb.mxu0 %v5501_v4  ;;  %2082 = vmatpush.bf16.msra.mxu3 %v5333_v21  ;;  %v6763_v4 = vld [vmem:[#allocation6 + $0xe0] sm:$0xf0]  ;;  %v6796_v21 = vld [vmem:[#allocation6 + $0x1e8] sm:$0xf0] }
 0x152   :  { %v5437_v3 = vor.u32 %v6763_v4, %v5436_v0  ;;  %v5585_v0 = vor.u32 %v6798_v57, %v5582_v54  ;;  %v6764_v4 = vld [vmem:[#allocation6 + $0xe8] sm:$0xf0] }
 0x154   :  { %2053 = vmatpush.bf16.msra.mxu1 %v5437_v3  ;;  %v785_v3 = vperm.slane %v7961_v55, 2 }
 0x155   :  { %2091 = vmatpush.bf16.msrb.mxu0 %v5489_v11  ;;  %2131 = vmatpush.bf16.msrb.mxu3 %v5517_v27  ;;  %v6773_v11 = vld [vmem:[#allocation6 + $0x130] sm:$0xf0]  ;;  %v5569_v27 = vor.u32 %v6796_v21, %v5568_v19 }
 0x156   :  { %v6761_v19 = vld [vmem:[#allocation6 + $0xd0] sm:$0xf0] }
 0x158   :  { %2054 = vmatpush.bf16.msra.mxu1 %v5425_v20  ;;  %v5433_v20 = vor.u32 %v6761_v19, %v5432_v17  ;;  %v6803_v17 = vld [vmem:[#allocation6 + $0x220] sm:$0xf0] }
 0x159   :  { %2092 = vmatpush.bf16.msrb.mxu0 %v5477_v23  ;;  %2132 = vmatpush.bf16.msrb.mxu3 %v5505_v44  ;;  %v6759_v23 = vld [vmem:[#allocation6 + $0xc4] sm:$0xf]  ;;  %v5594_v44 = vld [vmem:[#allocation6 + $0x21c] sm:$0xf0] }
 0x15a   :  { %v5597_v47 = vor.u32 %v6801_v41, %v5594_v44 }
 0x15d   :  { %2093 = vmatpush.bf16.msrb.mxu0 %v5465_v38  ;;  %2133 = vmatpush.bf16.msrb.mxu3 %v5493_v63 }
 0x161   :  { %2094 = vmatpush.bf16.msrb.mxu0 %v5453_v56 }
 0x165   :  { %2095 = vmatpush.bf16.msrb.mxu0 %v5441_v9 }
 0x189   :  { %v1310_v18 = vpop.f32.mrf.mxu0 }
 0x18a   :  { %v1311_v12 = vadd.f32 %v1310_v18, %v783_v5  ;;  %v5593_v18 = vor.u32 %v6802_v48, %v5592_v32 }
 0x18b   :  { %v1324_v22 = vpop.f32.mrf.mxu1 }
 0x18c   :  { %v1325_v51 = vadd.f32 %v1324_v22, %v1311_v12  ;;  %2062 = vmatpush.bf16.msra.mxu2 %v5593_v18  ;;  %v6790_v18 = vld [vmem:[#allocation6 + $0x1b8] sm:$0xf0] }
 0x191   :  { %v1312_v13 = vpop.f32.mrf.mxu0 }
 0x192   :  { %v1313_v42 = vadd.f32 %v1312_v13, %v783_v5  ;;  %v5580_v5 = vld [vmem:[#allocation6 + $0x1f8] sm:$0xf]  ;;  %v5481_v13 = vor.u32 %v6773_v11, %v5480_v10  ;;  %v6795_v11 = vld [vmem:[#allocation6 + $0x1e4] sm:$0xf] }
 0x193   :  { %v1326_v62 = vpop.f32.mrf.mxu1  ;;  %v5581_v8 = vor.u32 %v6799_v60, %v5580_v5  ;;  %v5532_v60 = vld [vmem:[#allocation6 + $0x198] sm:$0xf] }
 0x194   :  { %v1327_v59 = vadd.f32 %v1326_v62, %v1313_v42  ;;  %2134 = vmatpush.bf16.msrb.mxu3 %v5481_v13  ;;  %v5429_v62 = vor.u32 %v6759_v23, %v5426_v45  ;;  %v5533_v10 = vor.u32 %v6787_v6, %v5532_v60 }
 0x195   :  { %v1338_v28 = vpop.f32.mrf.mxu2  ;;  %2063 = vmatpush.bf16.msra.mxu2 %v5581_v8 }
 0x196   :  { %v1339_v33 = vadd.f32 %v1338_v28, %v1325_v51  ;;  %v6804_v28 = vld [vmem:[#allocation6 + $0x22c] sm:$0xf]  ;;  %2096 = vmatpush.bf16.msrb.mxu0 %v5429_v62 }
 0x197   :  { %v1352_v43 = vpop.f32.mrf.mxu3  ;;  %v5609_v30 = vor.u32 %v6804_v28, %v5606_v52  ;;  %v6792_v52 = vld [vmem:[#allocation6 + $0x1cc] sm:$0xf] }
 0x198   :  { %v7964_v36 = vadd.f32 %v1352_v43, %v1339_v33  ;;  %v5468_v33 = vld [vmem:[#allocation6 + $0x110] sm:$0xf]  ;;  %v5557_v43 = vor.u32 %v6793_v39, %v5556_v37  ;;  %v6758_v37 = vld [vmem:[#allocation6 + $0xb8] sm:$0xf0] }
 0x199   :  { %v1366_v58 = vpop.f32.mrf.mxu0  ;;  %2064 = vmatpush.bf16.msra.mxu2 %v5569_v27  ;;  %v5469_v35 = vor.u32 %v6770_v25, %v5468_v33  ;;  %2103 = vmatpush.bf16.msrb.mxu1 %v5609_v30  ;;  %v6784_v27 = vld [vmem:[#allocation6 + $0x188] sm:$0xf0]  ;;  %v5420_v30 = vld [vmem:[#allocation6 + $0xb0] sm:$0xf] }
 0x19a   :  { %v1469_v53 = vmul.f32 0.5, %v7964_v36  ;;  %v1367_v14 = vadd.f32 %v1366_v58, %v784_v61  ;;  %v5456_v58 = vld [vmem:[#allocation6 + $0xf8] sm:$0xf]  ;;  %v5421_v39 = vor.u32 %v6758_v37, %v5420_v30  ;;  %v5372_v37 = vld [vmem:[#allocation6 + $0x50] sm:$0xf] }
 0x19b   :  { %v1380_v22 = vpop.f32.mrf.mxu1  ;;  %2135 = vmatpush.bf16.msrb.mxu3 %v5469_v35  ;;  %v5457_v48 = vor.u32 %v6767_v40, %v5456_v58 }
 0x19c   :  { %7112 = vtanh.f32 %v1469_v53  ;;  %v1381_v34 = vadd.f32 %v1380_v22, %v1367_v14  ;;  %v5544_v53 = vld [vmem:[#allocation6 + $0x1b0] sm:$0xf] }
 0x19d   :  { %v1340_v1 = vpop.f32.mrf.mxu2  ;;  %2065 = vmatpush.bf16.msra.mxu2 %v5557_v43  ;;  %2104 = vmatpush.bf16.msrb.mxu1 %v5597_v47  ;;  %v5545_v56 = vor.u32 %v6790_v18, %v5544_v53  ;;  %v5408_v18 = vld [vmem:[#allocation6 + $0x98] sm:$0xf] }
 0x19e   :  { %v1341_v24 = vadd.f32 %v1340_v1, %v1327_v59  ;;  %v5444_v59 = vld [vmem:[#allocation6 + $0xe0] sm:$0xf] }
 0x19f   :  { %v1354_v12 = vpop.f32.mrf.mxu3  ;;  %2136 = vmatpush.bf16.msrb.mxu3 %v5457_v48 }
 0x1a0   :  { %v7970_v15 = vadd.f32 %v1354_v12, %v1341_v24  ;;  %v5445_v24 = vor.u32 %v6764_v4, %v5444_v59  ;;  %v5570_v12 = vld [vmem:[#allocation6 + $0x1ec] sm:$0xf0] }
 0x1a1   :  { %v1368_v2 = vpop.f32.mrf.mxu0  ;;  %2066 = vmatpush.bf16.msra.mxu2 %v5545_v56  ;;  %2105 = vmatpush.bf16.msrb.mxu1 %v5585_v0  ;;  %v5573_v16 = vor.u32 %v6795_v11, %v5570_v12  ;;  %v6755_v56 = vld [vmem:[#allocation6 + $0xa0] sm:$0xf0] }
 0x1a2   :  { %v7972_v26 = vpop.eup %7112  ;;  %v1472_v51 = vmul.f32 0.5, %v7970_v15  ;;  %v1369_v49 = vadd.f32 %v1368_v2, %v784_v61  ;;  %v5409_v59 = vor.u32 %v6755_v56, %v5408_v18  ;;  %v5576_v56 = vld [vmem:[#allocation6 + $0x1e8] sm:$0xf] }
 0x1a3   :  { %v1499_v29 = vmul.f32 %v7972_v26, %v7972_v26  ;;  %v1382_v46 = vpop.f32.mrf.mxu1  ;;  %v1493_v13 = vmul.f32 2.0, %v7972_v26  ;;  %2137 = vmatpush.bf16.msrb.mxu3 %v5445_v24  ;;  %v1481_v25 = vadd.f32 1.0, %v7972_v26  ;;  %v5534_v24 = vld [vmem:[#allocation6 + $0x1a4] sm:$0xf0] }
 0x1a4   :  { %7114 = vtanh.f32 %v1472_v51  ;;  %v1383_v61 = vadd.f32 %v1382_v46, %v1369_v49  ;;  %v5520_v51 = vld [vmem:[#allocation6 + $0x180] sm:$0xf]  ;;  %v6789_v46 = vld [vmem:[#allocation6 + $0x1b4] sm:$0xf] }
 0x1a5   :  { %v1505_v31 = vadd.f32 1.0, %v1499_v29  ;;  %v1394_v38 = vpop.f32.mrf.mxu2  ;;  %2067 = vmatpush.bf16.msra.mxu2 %v5533_v10  ;;  %2106 = vmatpush.bf16.msrb.mxu1 %v5573_v16  ;;  %v5521_v28 = vor.u32 %v6784_v27, %v5520_v51  ;;  %v5558_v29 = vld [vmem:[#allocation6 + $0x1d4] sm:$0xf0]  ;;  %v1487_v47 = vmul.f32 0.5, %v1481_v25  ;;  %v6752_v10 = vld [vmem:[#allocation6 + $0x88] sm:$0xf0] }
 0x1a6   :  { %v1395_v42 = vadd.f32 %v1394_v38, %v1381_v34  ;;  %v5561_v35 = vor.u32 %v6792_v52, %v5558_v29  ;;  %v5600_v16 = vld [vmem:[#allocation6 + $0x218] sm:$0xf]  ;;  %v5522_v51 = vld [vmem:[#allocation6 + $0x18c] sm:$0xf0]  ;;  %v5384_v52 = vld [vmem:[#allocation6 + $0x68] sm:$0xf] }
 0x1a7   :  { %7116 = vrcp.f32 %v1505_v31  ;;  %v1408_v32 = vpop.f32.mrf.mxu3  ;;  %2138 = vmatpush.bf16.msrb.mxu3 %v5433_v20 }
 0x1a8   :  { %v7979_v50 = vadd.f32 %v1408_v32, %v1395_v42  ;;  %v5546_v32 = vld [vmem:[#allocation6 + $0x1bc] sm:$0xf0] }
 0x1a9   :  { %v1422_v22 = vpop.f32.mrf.mxu0  ;;  %2068 = vmatpush.bf16.msra.mxu2 %v5521_v28  ;;  %2107 = vmatpush.bf16.msrb.mxu1 %v5561_v35  ;;  %v5549_v53 = vor.u32 %v6789_v46, %v5546_v32  ;;  %v5601_v35 = vor.u32 %v6803_v17, %v5600_v16  ;;  %v5552_v17 = vld [vmem:[#allocation6 + $0x1b8] sm:$0xf] }
 0x1aa   :  { %v7115_v63 = vpop.eup %7114  ;;  %v1470_v1 = vmul.f32 0.5, %v7979_v50  ;;  %v1423_v23 = vadd.f32 %v1422_v22, %v785_v3  ;;  %v6786_v22 = vld [vmem:[#allocation6 + $0x19c] sm:$0xf] }
 0x1ab   :  { %v1502_v5 = vmul.f32 %v7115_v63, %v7115_v63  ;;  %v1436_v62 = vpop.f32.mrf.mxu1  ;;  %v1484_v31 = vadd.f32 1.0, %v7115_v63  ;;  %v1496_v42 = vmul.f32 2.0, %v7115_v63 }
 0x1ac   :  { %7118 = vtanh.f32 %v1470_v1  ;;  %v1437_v43 = vadd.f32 %v1436_v62, %v1423_v23  ;;  %v6783_v23 = vld [vmem:[#allocation6 + $0x184] sm:$0xf] }
 0x1ad   :  { %v7117_v7 = vpop.eup %7116  ;;  %v1508_v8 = vadd.f32 1.0, %v1502_v5  ;;  %v1396_v9 = vpop.f32.mrf.mxu2  ;;  %2117 = vmatpush.bf16.msrb.mxu2 %v5421_v39  ;;  %v1490_v57 = vmul.f32 0.5, %v1484_v31  ;;  %v5612_v5 = vld [vmem:[#allocation6 + $0x230] sm:$0xf]  ;;  %2108 = vmatpush.bf16.msrb.mxu1 %v5549_v53  ;;  %v6746_v31 = vld [vmem:[#allocation6 + $0x58] sm:$0xf0] }
 0x1ae   :  { %v1397_v14 = vadd.f32 %v1396_v9, %v1383_v61  ;;  %v1517_v21 = vmul.f32 %v7117_v7, %v1493_v13  ;;  %v5396_v61 = vld [vmem:[#allocation6 + $0x80] sm:$0xf]  ;;  %v5537_v9 = vor.u32 %v6786_v22, %v5534_v24 }
 0x1af   :  { %7120 = vrcp.f32 %v1508_v8  ;;  %v1410_v2 = vpop.f32.mrf.mxu3  ;;  %v6806_v8 = vld [vmem:[#allocation6 + $0x238] sm:$0xf0]  ;;  %v5397_v13 = vor.u32 %v6752_v10, %v5396_v61  ;;  %v6737_v10 = vld [vmem:[#allocation6 + $0x10] sm:$0xf0] }
 0x1b0   :  { %v7986_v45 = vadd.f32 %v1410_v2, %v1397_v14  ;;  %v1523_v41 = vsub.f32 %v1517_v21, %v7964_v36  ;;  %v5613_v21 = vor.u32 %v6806_v8, %v5612_v5 }
 0x1b1   :  { %v1424_v40 = vpop.f32.mrf.mxu0  ;;  %2118 = vmatpush.bf16.msrb.mxu2 %v5409_v59  ;;  %2109 = vmatpush.bf16.msrb.mxu1 %v5537_v9  ;;  %v5348_v59 = vld [vmem:[#allocation6 + $0x20] sm:$0xf]  ;;  %v5336_v9 = vld [vmem:[#allocation6 + $0x8] sm:$0xf] }
 0x1b2   :  { %v7988_v33 = vpop.eup %7118  ;;  %v1473_v34 = vmul.f32 0.5, %v7986_v45  ;;  %v1529_v63 = vmul.f32 %v1523_v41, %v1487_v47  ;;  %v1425_v0 = vadd.f32 %v1424_v40, %v785_v3  ;;  %v5360_v40 = vld [vmem:[#allocation6 + $0x38] sm:$0xf] }
 0x1b3   :  { %v1500_v38 = vmul.f32 %v7988_v33, %v7988_v33  ;;  %v1438_v12 = vpop.f32.mrf.mxu1  ;;  %v1494_v27 = vmul.f32 2.0, %v7988_v33  ;;  %v1482_v39 = vadd.f32 1.0, %v7988_v33 }
 0x1b4   :  { %7122 = vtanh.f32 %v1473_v34  ;;  %v1535_v55 = vadd.f32 %v1529_v63, %v7964_v36  ;;  %v1439_v14 = vadd.f32 %v1438_v12, %v1425_v0  ;;  %v5525_v36 = vor.u32 %v6783_v23, %v5522_v51  ;;  %v6740_v63 = vld [vmem:[#allocation6 + $0x28] sm:$0xf0]  ;;  %v5540_v23 = vld [vmem:[#allocation6 + $0x1a0] sm:$0xf] }
 0x1b5   :  { %v7121_v44 = vpop.eup %7120  ;;  %v1506_v58 = vadd.f32 1.0, %v1500_v38  ;;  %v1450_v26 = vpop.f32.mrf.mxu2  ;;  %2119 = vmatpush.bf16.msrb.mxu2 %v5397_v13  ;;  %v1488_v18 = vmul.f32 0.5, %v1482_v39 }
 0x1b6   :  { %v1520_v48 = vmul.f32 %v7121_v44, %v1496_v42  ;;  %v1451_v49 = vadd.f32 %v1450_v26, %v1437_v43  ;;  %2110 = vmatpush.bf16.msrb.mxu1 %v5525_v36  ;;  %v5588_v42 = vld [vmem:[#allocation6 + $0x200] sm:$0xf]  ;;  %v6800_v43 = vld [vmem:[#allocation6 + $0x208] sm:$0xf0]  ;;  %v5373_v44 = vor.u32 %v6746_v31, %v5372_v37  ;;  %v6743_v26 = vld [vmem:[#allocation6 + $0x40] sm:$0xf0] }
 0x1b7   :  { %7124 = vrcp.f32 %v1506_v58  ;;  %v1464_v54 = vpop.f32.mrf.mxu3  ;;  %v5589_v53 = vor.u32 %v6800_v43, %v5588_v42 }
 0x1b8   :  { %v1526_v1 = vsub.f32 %v1520_v48, %v7970_v15  ;;  %v7998_v4 = vadd.f32 %v1464_v54, %v1451_v49  ;;  %v5361_v54 = vor.u32 %v6743_v26, %v5360_v40  ;;  %v5688_v26 = vld [vmem:[#allocation7 + $0x90] sm:$0xf] }
 0x1ba   :  { %v7123_v60 = vpop.eup %7122  ;;  %v1532_v6 = vmul.f32 %v1526_v1, %v1490_v57  ;;  %v1471_v7 = vmul.f32 0.5, %v7998_v4  ;;  %v6797_v57 = vld [vmem:[#allocation6 + $0x1f0] sm:$0xf0] }
 0x1bb   :  { %v1503_v11 = vmul.f32 %v7123_v60, %v7123_v60  ;;  %v1485_v32 = vadd.f32 1.0, %v7123_v60  ;;  %v1497_v47 = vmul.f32 2.0, %v7123_v60  ;;  %v5577_v22 = vor.u32 %v6797_v57, %v5576_v56  ;;  %v5564_v60 = vld [vmem:[#allocation6 + $0x1d0] sm:$0xf]  ;;  %v5652_v57 = vld [vmem:[#allocation7 + $0x48] sm:$0xf] }
 0x1bc   :  { %v1538_v3 = vadd.f32 %v1532_v6, %v7970_v15  ;;  %7126 = vtanh.f32 %v1471_v7  ;;  %v6749_v15 = vld [vmem:[#allocation6 + $0x70] sm:$0xf0]  ;;  %v6794_v6 = vld [vmem:[#allocation6 + $0x1d8] sm:$0xf0]  ;;  %v5349_v7 = vor.u32 %v6740_v63, %v5348_v59  ;;  %v5796_v63 = vld [vmem:[#allocation7 + $0x168] sm:$0xf] }
 0x1bd   :  { %v7125_v19 = vpop.eup %7124  ;;  %v1509_v2 = vadd.f32 1.0, %v1503_v11  ;;  %v1452_v20 = vpop.f32.mrf.mxu2  ;;  %v5385_v30 = vor.u32 %v6749_v15, %v5384_v52  ;;  %v1491_v0 = vmul.f32 0.5, %v1485_v32 }
 0x1be   :  { %v1453_v62 = vadd.f32 %v1452_v20, %v1439_v14  ;;  %v8004_v28 = vpack.c.bf16 %v1538_v3, %v1535_v55  ;;  %v1518_v25 = vmul.f32 %v7125_v19, %v1494_v27  ;;  %v5565_v3 = vor.u32 %v6794_v6, %v5564_v60  ;;  %v6791_v19 = vld [vmem:[#allocation6 + $0x1c0] sm:$0xf0]  ;;  %v6814_v60 = vld [vmem:[#allocation7 + $0x38] sm:$0xf0] }
 0x1bf   :  { %7128 = vrcp.f32 %v1509_v2  ;;  %v1466_v29 = vpop.f32.mrf.mxu3  ;;  %2120 = vmatpush.bf16.msrb.mxu2 %v5385_v30  ;;  %v5337_v2 = vor.u32 %v6737_v10, %v5336_v9  ;;  %v5528_v30 = vld [vmem:[#allocation6 + $0x188] sm:$0xf]  ;;  %v6822_v9 = vld [vmem:[#allocation7 + $0x7c] sm:$0xf] }
 0x1c0   :  { %v8006_v34 = vadd.f32 %v1466_v29, %v1453_v62  ;;  %2041 = vmatmul.bf16.vlgmr.msra.gmra.mxu0 %v8004_v28  ;;  %2083 = vmatmul.bf16.vlgmr.msra.gmra.mxu3 %v8004_v28  ;;  %v1524_v46 = vsub.f32 %v1518_v25, %v7979_v50  ;;  %v6785_v25 = vld [vmem:[#allocation6 + $0x190] sm:$0xf0] }
 0x1c1   :  { %2145 = vmatpush.bf16.msra.mxu0 %v5613_v21  ;;  %v5553_v21 = vor.u32 %v6791_v19, %v5552_v17  ;;  %v6819_v17 = vld [vmem:[#allocation7 + $0x64] sm:$0xf] }
 0x1c2   :  { %v7127_v38 = vpop.eup %7126  ;;  %v1474_v41 = vmul.f32 0.5, %v8006_v34  ;;  %v1530_v1 = vmul.f32 %v1524_v46, %v1488_v18  ;;  %v6826_v46 = vld [vmem:[#allocation7 + $0x98] sm:$0xf0]  ;;  %v6828_v18 = vld [vmem:[#allocation7 + $0xac] sm:$0xf] }
 0x1c3   :  { %v1501_v58 = vmul.f32 %v7127_v38, %v7127_v38  ;;  %2121 = vmatpush.bf16.msrb.mxu2 %v5373_v44  ;;  %v1495_v16 = vmul.f32 2.0, %v7127_v38  ;;  %v5700_v44 = vld [vmem:[#allocation7 + $0xa8] sm:$0xf]  ;;  %v5689_v32 = vor.u32 %v6826_v46, %v5688_v26  ;;  %v5642_v46 = vld [vmem:[#allocation7 + $0x3c] sm:$0xf0] }
 0x1c4   :  { %7130 = vtanh.f32 %v1474_v41  ;;  %v1536_v11 = vadd.f32 %v1530_v1, %v7979_v50  ;;  %v1483_v50 = vadd.f32 1.0, %v7127_v38  ;;  %v5529_v38 = vor.u32 %v6785_v25, %v5528_v30  ;;  %v6853_v1 = vld [vmem:[#allocation7 + $0x170] sm:$0xf0]  ;;  %v5798_v30 = vld [vmem:[#allocation7 + $0x174] sm:$0xf0] }
 0x1c5   :  { %v7129_v48 = vpop.eup %7128  ;;  %v1507_v49 = vadd.f32 1.0, %v1501_v58  ;;  %2146 = vmatpush.bf16.msra.mxu0 %v5601_v35  ;;  %v6829_v58 = vld [vmem:[#allocation7 + $0xb0] sm:$0xf0] }
 0x1c6   :  { %v1521_v33 = vmul.f32 %v7129_v48, %v1497_v47  ;;  %v1489_v15 = vmul.f32 0.5, %v1483_v50  ;;  %v5701_v40 = vor.u32 %v6829_v58, %v5700_v44  ;;  %v5676_v47 = vld [vmem:[#allocation7 + $0x78] sm:$0xf]  ;;  %v6823_v48 = vld [vmem:[#allocation7 + $0x80] sm:$0xf0] }
 0x1c7   :  { %7132 = vrcp.f32 %v1507_v49  ;;  %2122 = vmatpush.bf16.msrb.mxu2 %v5361_v54  ;;  %v6820_v49 = vld [vmem:[#allocation7 + $0x68] sm:$0xf0]  ;;  %v6817_v54 = vld [vmem:[#allocation7 + $0x50] sm:$0xf0] }
 0x1c8   :  { %v1527_v5 = vsub.f32 %v1521_v33, %v7986_v45  ;;  %v5702_v33 = vld [vmem:[#allocation7 + $0xb4] sm:$0xf0]  ;;  %v5653_v59 = vor.u32 %v6817_v54, %v5652_v57  ;;  %v6877_v58 = vld [vmem:[#allocation7 + $0x230] sm:$0xf0]  ;;  %v6810_v57 = vld [vmem:[#allocation7 + $0x1c] sm:$0xf] }
 0x1c9   :  { %2147 = vmatpush.bf16.msra.mxu0 %v5589_v53  ;;  %v5705_v56 = vor.u32 %v6828_v18, %v5702_v33  ;;  %v5880_v18 = vld [vmem:[#allocation7 + $0x210] sm:$0xf]  ;;  %v5630_v54 = vld [vmem:[#allocation7 + $0x24] sm:$0xf0] }
 0x1ca   :  { %v7131_v24 = vpop.eup %7130  ;;  %v1533_v61 = vmul.f32 %v1527_v5, %v1491_v0  ;;  %v6825_v0 = vld [vmem:[#allocation7 + $0x94] sm:$0xf]  ;;  %v5797_v5 = vor.u32 %v6853_v1, %v5796_v63  ;;  %v5633_v1 = vor.u32 %v6810_v57, %v5630_v54 }
 0x1cb   :  { %v1504_v8 = vmul.f32 %v7131_v24, %v7131_v24  ;;  %2123 = vmatpush.bf16.msrb.mxu2 %v5349_v7  ;;  %v1486_v27 = vadd.f32 1.0, %v7131_v24  ;;  %v1498_v62 = vmul.f32 2.0, %v7131_v24  ;;  %v5784_v7 = vld [vmem:[#allocation7 + $0x150] sm:$0xf] }
 0x1cc   :  { %v1539_v12 = vadd.f32 %v1533_v61, %v7986_v45  ;;  %v6788_v45 = vld [vmem:[#allocation6 + $0x1a8] sm:$0xf0]  ;;  %v5640_v61 = vld [vmem:[#allocation7 + $0x30] sm:$0xf] }
 0x1cd   :  { %v7133_v13 = vpop.eup %7132  ;;  %v1510_v55 = vadd.f32 1.0, %v1504_v8  ;;  %2148 = vmatpush.bf16.msra.mxu0 %v5577_v22  ;;  %v5541_v52 = vor.u32 %v6788_v45, %v5540_v23  ;;  %v1492_v37 = vmul.f32 0.5, %v1486_v27  ;;  %v5690_v22 = vld [vmem:[#allocation7 + $0x9c] sm:$0xf0]  ;;  %v5641_v6 = vor.u32 %v6814_v60, %v5640_v61  ;;  %v6850_v8 = vld [vmem:[#allocation7 + $0x158] sm:$0xf0] }
 0x1ce   :  { %v1640_v14 = vpack.c.bf16 %v1539_v12, %v1536_v11  ;;  %v1519_v20 = vmul.f32 %v7133_v13, %v1495_v16  ;;  %v5693_v24 = vor.u32 %v6825_v0, %v5690_v22  ;;  %v5785_v10 = vor.u32 %v6850_v8, %v5784_v7  ;;  %v5678_v11 = vld [vmem:[#allocation7 + $0x84] sm:$0xf0]  ;;  %v5628_v13 = vld [vmem:[#allocation7 + $0x18] sm:$0xf]  ;;  %v6847_v16 = vld [vmem:[#allocation7 + $0x140] sm:$0xf0] }
 0x1cf   :  { %7134 = vrcp.f32 %v1510_v55  ;;  %2124 = vmatpush.bf16.msrb.mxu2 %v5337_v2  ;;  %v5681_v12 = vor.u32 %v6822_v9, %v5678_v11  ;;  %v6811_v55 = vld [vmem:[#allocation7 + $0x20] sm:$0xf0]  ;;  %v5616_v23 = vld [vmem:[#allocation7] sm:$0xf]  ;;  %v6808_v45 = vld [vmem:[#allocation7 + $0x8] sm:$0xf0] }
 0x1d0   :  { %2055 = vmatmul.bf16.vlgmr.msra.gmra.mxu1 %v1640_v14  ;;  %2097 = vmatmul.bf16.vlgmr.msrb.gmra.mxu0 %v1640_v14  ;;  %v1525_v51 = vsub.f32 %v1519_v20, %v7998_v4  ;;  %v5760_v27 = vld [vmem:[#allocation7 + $0x120] sm:$0xf]  ;;  %v6846_v0 = vld [vmem:[#allocation7 + $0x13c] sm:$0xf]  ;;  %v5724_v60 = vld [vmem:[#allocation7 + $0xd8] sm:$0xf] }
 0x1d1   :  { %2139 = vmatmul.bf16.vlgmr.msrb.gmra.mxu3 %v1640_v14  ;;  %2149 = vmatpush.bf16.msra.mxu0 %v5565_v3  ;;  %v5629_v3 = vor.u32 %v6811_v55, %v5628_v13  ;;  %v5772_v14 = vld [vmem:[#allocation7 + $0x138] sm:$0xf]  ;;  %v6807_v11 = vld [vmem:[#allocation7 + $0x4] sm:$0xf] }
 0x1d2   :  { %v1531_v35 = vmul.f32 %v1525_v51, %v1489_v15  ;;  %2723 = vmatpush.bf16.msra.mxu1 %v5701_v40  ;;  %v5773_v20 = vor.u32 %v6847_v16, %v5772_v14  ;;  %v5617_v51 = vor.u32 %v6808_v45, %v5616_v23  ;;  %v5654_v15 = vld [vmem:[#allocation7 + $0x54] sm:$0xf0]  ;;  %v6813_v40 = vld [vmem:[#allocation7 + $0x34] sm:$0xf]  ;;  %v6843_v14 = vld [vmem:[#allocation7 + $0x124] sm:$0xf] }
 0x1d3   :  { %v5868_v7 = vld [vmem:[#allocation7 + $0x1f8] sm:$0xf]  ;;  %v5762_v16 = vld [vmem:[#allocation7 + $0x12c] sm:$0xf0] }
 0x1d4   :  { %v1537_v41 = vadd.f32 %v1531_v35, %v7998_v4  ;;  %v5677_v4 = vor.u32 %v6823_v48, %v5676_v47  ;;  %v5786_v47 = vld [vmem:[#allocation7 + $0x15c] sm:$0xf0] }
 0x1d5   :  { %v7135_v36 = vpop.eup %7134  ;;  %2150 = vmatpush.bf16.msra.mxu0 %v5553_v21  ;;  %v5666_v21 = vld [vmem:[#allocation7 + $0x6c] sm:$0xf0] }
 0x1d6   :  { %v1522_v29 = vmul.f32 %v7135_v36, %v1498_v62  ;;  %2724 = vmatpush.bf16.msra.mxu1 %v5689_v32  ;;  %v5669_v50 = vor.u32 %v6819_v17, %v5666_v21  ;;  %v6844_v62 = vld [vmem:[#allocation7 + $0x128] sm:$0xf0]  ;;  %v6849_v32 = vld [vmem:[#allocation7 + $0x154] sm:$0xf]  ;;  %v5804_v17 = vld [vmem:[#allocation7 + $0x170] sm:$0xf]  ;;  %v5765_v21 = vor.u32 %v6843_v14, %v5762_v16 }
 0x1d7   :  { %v6816_v36 = vld [vmem:[#allocation7 + $0x4c] sm:$0xf]  ;;  %v6845_v16 = vld [vmem:[#allocation7 + $0x130] sm:$0xf0] }
 0x1d8   :  { %v1528_v31 = vsub.f32 %v1522_v29, %v8006_v34  ;;  %v6852_v29 = vld [vmem:[#allocation7 + $0x16c] sm:$0xf]  ;;  %v5657_v25 = vor.u32 %v6816_v36, %v5654_v15  ;;  %v5856_v15 = vld [vmem:[#allocation7 + $0x1e0] sm:$0xf] }
 0x1d9   :  { %2151 = vmatpush.bf16.msra.mxu0 %v5541_v52  ;;  %v5761_v52 = vor.u32 %v6844_v62, %v5760_v27  ;;  %v5801_v35 = vor.u32 %v6852_v29, %v5798_v30  ;;  %v5712_v27 = vld [vmem:[#allocation7 + $0xc0] sm:$0xf]  ;;  %v6832_v62 = vld [vmem:[#allocation7 + $0xc8] sm:$0xf0] }
 0x1da   :  { %v1534_v39 = vmul.f32 %v1528_v31, %v1492_v37  ;;  %2725 = vmatpush.bf16.msra.mxu1 %v5677_v4  ;;  %v8027_v37 = vld [vmem:[#allocation24 + $0x2] ss:$8 sm:$0xf]  ;;  %v5645_v4 = vor.u32 %v6813_v40, %v5642_v46  ;;  %v6868_v29 = vld [vmem:[#allocation7 + $0x1e8] sm:$0xf0] }
 0x1db   :  { %v5748_v31 = vld [vmem:[#allocation7 + $0x108] sm:$0xf]  ;;  %v1643_v22 = vperm.slane %v8027_v37, 0  ;;  %v6840_v30 = vld [vmem:[#allocation7 + $0x10c] sm:$0xf] }
 0x1dc   :  { %v1540_v42 = vadd.f32 %v1534_v39, %v8006_v34  ;;  %v5664_v34 = vld [vmem:[#allocation7 + $0x60] sm:$0xf]  ;;  %v5892_v39 = vld [vmem:[#allocation7 + $0x228] sm:$0xf]  ;;  %v5792_v40 = vld [vmem:[#allocation7 + $0x158] sm:$0xf] }
 0x1dd   :  { %2152 = vmatpush.bf16.msra.mxu0 %v5529_v38  ;;  %v5665_v53 = vor.u32 %v6820_v49, %v5664_v34  ;;  %v6841_v38 = vld [vmem:[#allocation7 + $0x110] sm:$0xf0]  ;;  %v5893_v26 = vor.u32 %v6877_v58, %v5892_v39  ;;  %v5789_v34 = vor.u32 %v6849_v32, %v5786_v47  ;;  %v5736_v49 = vld [vmem:[#allocation7 + $0xf0] sm:$0xf]  ;;  %v5894_v39 = vld [vmem:[#allocation7 + $0x234] sm:$0xf0] }
 0x1de   :  { %v1641_v43 = vpack.c.bf16 %v1540_v42, %v1537_v41  ;;  %v1644_v41 = vperm.slane %v8027_v37, 1  ;;  %v5749_v44 = vor.u32 %v6841_v38, %v5748_v31  ;;  %v5750_v31 = vld [vmem:[#allocation7 + $0x114] sm:$0xf0]  ;;  %v6876_v38 = vld [vmem:[#allocation7 + $0x22c] sm:$0xf] }
 0x1df   :  { %2726 = vmatpush.bf16.msra.mxu1 %v5665_v53  ;;  %2751 = vmatpush.bf16.msra.mxu3 %v5893_v26  ;;  %v6838_v53 = vld [vmem:[#allocation7 + $0xf8] sm:$0xf0]  ;;  %v5897_v58 = vor.u32 %v6876_v38, %v5894_v39  ;;  %v6851_v26 = vld [vmem:[#allocation7 + $0x160] sm:$0xf0]  ;;  %v5808_v38 = vld [vmem:[#allocation7 + $0x180] sm:$0xf] }
 0x1e0   :  { %2069 = vmatmul.bf16.vlgmr.msra.gmra.mxu2 %v1641_v43  ;;  %2111 = vmatmul.bf16.vlgmr.msrb.gmra.mxu1 %v1641_v43  ;;  %v5737_v33 = vor.u32 %v6838_v53, %v5736_v49  ;;  %v5793_v47 = vor.u32 %v6851_v26, %v5792_v40  ;;  %v5738_v49 = vld [vmem:[#allocation7 + $0xfc] sm:$0xf0]  ;;  %v6873_v53 = vld [vmem:[#allocation7 + $0x214] sm:$0xf]  ;;  %v6856_v39 = vld [vmem:[#allocation7 + $0x188] sm:$0xf0] }
 0x1e1   :  { %2153 = vmatmul.bf16.vlgmr.msra.gmra.mxu0 %v1641_v43  ;;  %2737 = vmatpush.bf16.msra.mxu2 %v5797_v5  ;;  %v5774_v5 = vld [vmem:[#allocation7 + $0x144] sm:$0xf0]  ;;  %v5809_v40 = vor.u32 %v6856_v39, %v5808_v38  ;;  %v5846_v26 = vld [vmem:[#allocation7 + $0x1d4] sm:$0xf0]  ;;  %v6855_v38 = vld [vmem:[#allocation7 + $0x184] sm:$0xf] }
 0x1e2   :  { %2765 = vmatpush.bf16.msrb.mxu0 %v5705_v56  ;;  %v6874_v56 = vld [vmem:[#allocation7 + $0x218] sm:$0xf0]  ;;  %v5810_v39 = vld [vmem:[#allocation7 + $0x18c] sm:$0xf0] }
 0x1e3   :  { %2727 = vmatpush.bf16.msra.mxu1 %v5653_v59  ;;  %v5881_v63 = vor.u32 %v6874_v56, %v5880_v18  ;;  %v5882_v18 = vld [vmem:[#allocation7 + $0x21c] sm:$0xf0] }
 0x1e4   :  { %v5885_v54 = vor.u32 %v6873_v53, %v5882_v18 }
 0x1e5   :  { %2738 = vmatpush.bf16.msra.mxu2 %v5785_v10  ;;  %2752 = vmatpush.bf16.msra.mxu3 %v5881_v63  ;;  %v6871_v10 = vld [vmem:[#allocation7 + $0x200] sm:$0xf0]  ;;  %v6848_v63 = vld [vmem:[#allocation7 + $0x148] sm:$0xf0] }
 0x1e6   :  { %2766 = vmatpush.bf16.msrb.mxu0 %v5693_v24  ;;  %v5777_v24 = vor.u32 %v6846_v0, %v5774_v5  ;;  %v5869_v55 = vor.u32 %v6871_v10, %v5868_v7 }
 0x1e7   :  { %2728 = vmatpush.bf16.msra.mxu1 %v5641_v6  ;;  %v6835_v6 = vld [vmem:[#allocation7 + $0xe0] sm:$0xf0] }
 0x1e8   :  { %v5725_v9 = vor.u32 %v6835_v6, %v5724_v60  ;;  %v6862_v60 = vld [vmem:[#allocation7 + $0x1b8] sm:$0xf0] }
 0x1e9   :  { %2739 = vmatpush.bf16.msra.mxu2 %v5773_v20  ;;  %2753 = vmatpush.bf16.msra.mxu3 %v5869_v55 }
 0x1ea   :  { %2767 = vmatpush.bf16.msrb.mxu0 %v5681_v12  ;;  %v5618_v12 = vld [vmem:[#allocation7 + $0xc] sm:$0xf0] }
 0x1eb   :  { %2729 = vmatpush.bf16.msra.mxu1 %v5629_v3  ;;  %v5621_v3 = vor.u32 %v6807_v11, %v5618_v12  ;;  %v5768_v12 = vld [vmem:[#allocation7 + $0x128] sm:$0xf] }
 0x1ed   :  { %2740 = vmatpush.bf16.msra.mxu2 %v5761_v52  ;;  %v5713_v52 = vor.u32 %v6832_v62, %v5712_v27  ;;  %v5858_v27 = vld [vmem:[#allocation7 + $0x1ec] sm:$0xf0] }
 0x1ee   :  { %2768 = vmatpush.bf16.msrb.mxu0 %v5669_v50  ;;  %v6854_v50 = vld [vmem:[#allocation7 + $0x178] sm:$0xf0] }
 0x1ef   :  { %2730 = vmatpush.bf16.msra.mxu1 %v5617_v51  ;;  %v5805_v51 = vor.u32 %v6854_v50, %v5804_v17  ;;  %v6859_v50 = vld [vmem:[#allocation7 + $0x1a0] sm:$0xf0] }
 0x1f0   :  { %2125 = vmatmul.bf16.vlgmr.msrb.gmra.mxu2 %v8004_v28 }
 0x1f1   :  { %2741 = vmatpush.bf16.msra.mxu2 %v5749_v44  ;;  %v5753_v44 = vor.u32 %v6840_v30, %v5750_v31  ;;  %v6842_v30 = vld [vmem:[#allocation7 + $0x118] sm:$0xf0]  ;;  %v1645_v31 = vperm.slane %v8027_v37, 2 }
 0x1f2   :  { %2769 = vmatpush.bf16.msrb.mxu0 %v5657_v25 }
 0x1f3   :  { %2779 = vmatpush.bf16.msrb.mxu1 %v5801_v35 }
 0x1f5   :  { %2742 = vmatpush.bf16.msra.mxu2 %v5737_v33 }
 0x1f6   :  { %2770 = vmatpush.bf16.msrb.mxu0 %v5645_v4 }
 0x1f7   :  { %2780 = vmatpush.bf16.msrb.mxu1 %v5789_v34 }
 0x1f9   :  { %2743 = vmatpush.bf16.msra.mxu2 %v5725_v9  ;;  %v5726_v9 = vld [vmem:[#allocation7 + $0xe4] sm:$0xf0] }
 0x1fa   :  { %2771 = vmatpush.bf16.msrb.mxu0 %v5633_v1 }
 0x1fb   :  { %2781 = vmatpush.bf16.msrb.mxu1 %v5777_v24 }
 0x1fd   :  { %2744 = vmatpush.bf16.msra.mxu2 %v5713_v52 }
 0x1fe   :  { %2772 = vmatpush.bf16.msrb.mxu0 %v5621_v3 }
 0x1ff   :  { %2782 = vmatpush.bf16.msrb.mxu1 %v5765_v21  ;;  %v5820_v21 = vld [vmem:[#allocation7 + $0x198] sm:$0xf] }
 0x201   :  { %2793 = vmatpush.bf16.msrb.mxu2 %v5897_v58 }
 0x202   :  { %2821 = vmatpush.bf16.msra.mxu0 %v5805_v51  ;;  %v6867_v51 = vld [vmem:[#allocation7 + $0x1e4] sm:$0xf] }
 0x203   :  { %2783 = vmatpush.bf16.msrb.mxu1 %v5753_v44  ;;  %v6864_v44 = vld [vmem:[#allocation7 + $0x1cc] sm:$0xf] }
 0x205   :  { %2794 = vmatpush.bf16.msrb.mxu2 %v5885_v54 }
 0x206   :  { %2822 = vmatpush.bf16.msra.mxu0 %v5793_v47  ;;  %v6830_v47 = vld [vmem:[#allocation7 + $0xb8] sm:$0xf0] }
 0x23d   :  { %v8021_v28 = vpop.f32.mrf.mxu0 }
 0x23e   :  { %v2043_v23 = vadd.f32 %v8021_v28, %v1643_v22  ;;  %v5857_v28 = vor.u32 %v6868_v29, %v5856_v15  ;;  %v5861_v15 = vor.u32 %v6867_v51, %v5858_v27  ;;  %v5756_v29 = vld [vmem:[#allocation7 + $0x110] sm:$0xf] }
 0x240   :  { %2754 = vmatpush.bf16.msra.mxu3 %v5857_v28 }
 0x243   :  { %v2084_v42 = vpop.f32.mrf.mxu3 }
 0x244   :  { %v2085_v59 = vadd.f32 %v2084_v42, %v1644_v41 }
 0x245   :  { %v8023_v19 = vpop.f32.mrf.mxu0 }
 0x246   :  { %v2045_v5 = vadd.f32 %v8023_v19, %v1643_v22  ;;  %v6870_v19 = vld [vmem:[#allocation7 + $0x1fc] sm:$0xf]  ;;  %v5870_v22 = vld [vmem:[#allocation7 + $0x204] sm:$0xf0] }
 0x247   :  { %v5873_v14 = vor.u32 %v6870_v19, %v5870_v22 }
 0x249   :  { %2795 = vmatpush.bf16.msrb.mxu2 %v5873_v14 }
 0x24b   :  { %v2086_v20 = vpop.f32.mrf.mxu3 }
 0x24c   :  { %v2087_v25 = vadd.f32 %v2086_v20, %v1644_v41  ;;  %v5844_v41 = vld [vmem:[#allocation7 + $0x1c8] sm:$0xf]  ;;  %v5769_v20 = vor.u32 %v6845_v16, %v5768_v12  ;;  %v6858_v16 = vld [vmem:[#allocation7 + $0x19c] sm:$0xf] }
 0x24d   :  { %v8025_v2 = vpop.f32.mrf.mxu1  ;;  %v2098_v48 = vpop.f32.mrf.mxu0  ;;  %2796 = vmatpush.bf16.msrb.mxu2 %v5861_v15  ;;  %v6833_v15 = vld [vmem:[#allocation7 + $0xd0] sm:$0xf0] }
 0x24e   :  { %v2099_v61 = vadd.f32 %v2098_v48, %v2085_v59  ;;  %v2057_v35 = vadd.f32 %v8025_v2, %v2043_v23  ;;  %v6865_v48 = vld [vmem:[#allocation7 + $0x1d0] sm:$0xf0]  ;;  %v5780_v59 = vld [vmem:[#allocation7 + $0x140] sm:$0xf]  ;;  %v6831_v23 = vld [vmem:[#allocation7 + $0xc4] sm:$0xf] }
 0x24f   :  { %v6837_v2 = vld [vmem:[#allocation7 + $0xf4] sm:$0xf]  ;;  %v5845_v34 = vor.u32 %v6865_v48, %v5844_v41  ;;  %v5781_v1 = vor.u32 %v6848_v63, %v5780_v59 }
 0x250   :  { %v5741_v57 = vor.u32 %v6837_v2, %v5738_v49  ;;  %v5849_v2 = vor.u32 %v6864_v44, %v5846_v26  ;;  %v6839_v49 = vld [vmem:[#allocation7 + $0x100] sm:$0xf0]  ;;  %v6861_v63 = vld [vmem:[#allocation7 + $0x1b4] sm:$0xf] }
 0x251   :  { %2755 = vmatpush.bf16.msra.mxu3 %v5845_v34  ;;  %2823 = vmatpush.bf16.msra.mxu0 %v5781_v1  ;;  %v5744_v34 = vld [vmem:[#allocation7 + $0xf8] sm:$0xf]  ;;  %v5834_v1 = vld [vmem:[#allocation7 + $0x1bc] sm:$0xf0]  ;;  %v6821_v26 = vld [vmem:[#allocation7 + $0x70] sm:$0xf0] }
 0x252   :  { %2784 = vmatpush.bf16.msrb.mxu1 %v5741_v57  ;;  %v5745_v54 = vor.u32 %v6839_v49, %v5744_v34  ;;  %2797 = vmatpush.bf16.msrb.mxu2 %v5849_v2 }
 0x254   :  { %v2140_v41 = vpop.f32.mrf.mxu3 }
 0x255   :  { %v8030_v43 = vpop.f32.mrf.mxu1  ;;  %v2100_v36 = vpop.f32.mrf.mxu0  ;;  %2824 = vmatpush.bf16.msra.mxu0 %v5769_v20  ;;  %v5822_v20 = vld [vmem:[#allocation7 + $0x1a4] sm:$0xf0] }
 0x256   :  { %v2101_v46 = vadd.f32 %v2100_v36, %v2087_v25  ;;  %v2059_v10 = vadd.f32 %v8030_v43, %v2045_v5  ;;  %v5821_v43 = vor.u32 %v6859_v50, %v5820_v21  ;;  %v5696_v5 = vld [vmem:[#allocation7 + $0x98] sm:$0xf] }
 0x25d   :  { %v2112_v8 = vpop.f32.mrf.mxu1 }
 0x25e   :  { %v8035_v13 = vadd.f32 %v2112_v8, %v2099_v61  ;;  %v5832_v61 = vld [vmem:[#allocation7 + $0x1b0] sm:$0xf]  ;;  %v6834_v8 = vld [vmem:[#allocation7 + $0xdc] sm:$0xf]  ;;  %v2154_v59 = vpop.f32.mrf.mxu0 }
 0x25f   :  { %v5833_v7 = vor.u32 %v6862_v60, %v5832_v61  ;;  %v5729_v11 = vor.u32 %v6834_v8, %v5726_v9  ;;  %v5837_v60 = vor.u32 %v6861_v63, %v5834_v1  ;;  %v6836_v8 = vld [vmem:[#allocation7 + $0xe8] sm:$0xf0] }
 0x260   :  { %v2160_v45 = vmul.f32 0.5, %v8035_v13 }
 0x261   :  { %2756 = vmatpush.bf16.msra.mxu3 %v5833_v7  ;;  %2785 = vmatpush.bf16.msrb.mxu1 %v5729_v11  ;;  %v5732_v7 = vld [vmem:[#allocation7 + $0xe0] sm:$0xf] }
 0x262   :  { %7136 = vtanh.f32 %v2160_v45  ;;  %v5714_v45 = vld [vmem:[#allocation7 + $0xcc] sm:$0xf0]  ;;  %v5733_v12 = vor.u32 %v6836_v8, %v5732_v7  ;;  %2798 = vmatpush.bf16.msrb.mxu2 %v5837_v60  ;;  %v6815_v60 = vld [vmem:[#allocation7 + $0x40] sm:$0xf0] }
 0x263   :  { %v2070_v42 = vpop.f32.mrf.mxu2  ;;  %v5717_v52 = vor.u32 %v6831_v23, %v5714_v45  ;;  %v5825_v23 = vor.u32 %v6858_v16, %v5822_v20  ;;  %v6824_v45 = vld [vmem:[#allocation7 + $0x88] sm:$0xf0]  ;;  %v5636_v16 = vld [vmem:[#allocation7 + $0x20] sm:$0xf] }
 0x264   :  { %v8044_v32 = vadd.f32 %v2070_v42, %v2057_v35  ;;  %v5757_v35 = vor.u32 %v6842_v30, %v5756_v29  ;;  %v6812_v20 = vld [vmem:[#allocation7 + $0x28] sm:$0xf0] }
 0x265   :  { %v2114_v4 = vpop.f32.mrf.mxu1  ;;  %2757 = vmatpush.bf16.msra.mxu3 %v5821_v43  ;;  %2786 = vmatpush.bf16.msrb.mxu1 %v5717_v52  ;;  %v5684_v43 = vld [vmem:[#allocation7 + $0x80] sm:$0xf]  ;;  %v5720_v52 = vld [vmem:[#allocation7 + $0xc8] sm:$0xf] }
 0x266   :  { %v2159_v33 = vmul.f32 0.5, %v8044_v32  ;;  %v8047_v56 = vadd.f32 %v2114_v4, %v2101_v46  ;;  %2825 = vmatpush.bf16.msra.mxu0 %v5757_v35  ;;  %v5708_v46 = vld [vmem:[#allocation7 + $0xb0] sm:$0xf]  ;;  %v5721_v35 = vor.u32 %v6833_v15, %v5720_v52  ;;  %2799 = vmatpush.bf16.msrb.mxu2 %v5825_v23 }
 0x267   :  { %v5709_v4 = vor.u32 %v6830_v47, %v5708_v46 }
 0x268   :  { %v8049_v0 = vpop.eup %7136  ;;  %7138 = vtanh.f32 %v2159_v33  ;;  %v2163_v24 = vmul.f32 0.5, %v8047_v56 }
 0x269   :  { %v2190_v6 = vmul.f32 %v8049_v0, %v8049_v0  ;;  %v2184_v18 = vmul.f32 2.0, %v8049_v0  ;;  %2758 = vmatpush.bf16.msra.mxu3 %v5809_v40  ;;  %v2172_v19 = vadd.f32 1.0, %v8049_v0  ;;  %v5672_v40 = vld [vmem:[#allocation7 + $0x68] sm:$0xf] }
 0x26a   :  { %7140 = vtanh.f32 %v2163_v24  ;;  %2826 = vmatpush.bf16.msra.mxu0 %v5745_v54 }
 0x26b   :  { %v2196_v55 = vadd.f32 1.0, %v2190_v6  ;;  %v2072_v3 = vpop.f32.mrf.mxu2  ;;  %v6827_v6 = vld [vmem:[#allocation7 + $0xa0] sm:$0xf0]  ;;  %v2178_v44 = vmul.f32 0.5, %v2172_v19 }
 0x26c   :  { %v8058_v17 = vadd.f32 %v2072_v3, %v2059_v10  ;;  %v5697_v11 = vor.u32 %v6827_v6, %v5696_v5 }
 0x26d   :  { %7142 = vrcp.f32 %v2196_v55  ;;  %2807 = vmatpush.bf16.msrb.mxu3 %v5709_v4 }
 0x26e   :  { %v8060_v62 = vpop.eup %7138  ;;  %v2162_v36 = vmul.f32 0.5, %v8058_v17  ;;  %2827 = vmatpush.bf16.msra.mxu0 %v5733_v12  ;;  %v5900_v12 = vld [vmem:[#allocation7 + $0x230] sm:$0xf] }
 0x26f   :  { %v2189_v25 = vmul.f32 %v8060_v62, %v8060_v62  ;;  %v2183_v3 = vmul.f32 2.0, %v8060_v62  ;;  %v2171_v46 = vadd.f32 1.0, %v8060_v62 }
 0x270   :  { %v8065_v28 = vpop.eup %7140  ;;  %7144 = vtanh.f32 %v2162_v36  ;;  %v5685_v36 = vor.u32 %v6824_v45, %v5684_v43  ;;  %v5888_v45 = vld [vmem:[#allocation7 + $0x218] sm:$0xf] }
 0x271   :  { %v2195_v42 = vadd.f32 1.0, %v2189_v25  ;;  %v2193_v58 = vmul.f32 %v8065_v28, %v8065_v28  ;;  %2808 = vmatpush.bf16.msrb.mxu3 %v5697_v11  ;;  %v2175_v21 = vadd.f32 1.0, %v8065_v28  ;;  %v2187_v51 = vmul.f32 2.0, %v8065_v28 }
 0x272   :  { %v5813_v28 = vor.u32 %v6855_v38, %v5810_v39  ;;  %2828 = vmatpush.bf16.msra.mxu0 %v5721_v35  ;;  %v2177_v63 = vmul.f32 0.5, %v2171_v46 }
 0x273   :  { %7146 = vrcp.f32 %v2195_v42  ;;  %v2126_v48 = vpop.f32.mrf.mxu2  ;;  %v7143_v53 = vpop.eup %7142  ;;  %v2199_v33 = vadd.f32 1.0, %v2193_v58  ;;  %v2181_v2 = vmul.f32 0.5, %v2175_v21 }
 0x274   :  { %v2127_v57 = vadd.f32 %v2126_v48, %v1645_v31  ;;  %v2208_v9 = vmul.f32 %v7143_v53, %v2184_v18  ;;  %v2142_v42 = vpop.f32.mrf.mxu3  ;;  %v5660_v18 = vld [vmem:[#allocation7 + $0x50] sm:$0xf]  ;;  %2800 = vmatpush.bf16.msrb.mxu2 %v5813_v28 }
 0x275   :  { %7148 = vrcp.f32 %v2199_v33  ;;  %2809 = vmatpush.bf16.msrb.mxu3 %v5685_v36  ;;  %v6818_v33 = vld [vmem:[#allocation7 + $0x58] sm:$0xf0]  ;;  %v6809_v36 = vld [vmem:[#allocation7 + $0x10] sm:$0xf0] }
 0x276   :  { %v7145_v24 = vpop.eup %7144  ;;  %v2141_v61 = vadd.f32 %v2140_v41, %v2127_v57  ;;  %v2214_v0 = vsub.f32 %v2208_v9, %v8035_v13  ;;  %v5673_v41 = vor.u32 %v6821_v26, %v5672_v40  ;;  %v5661_v62 = vor.u32 %v6818_v33, %v5660_v18  ;;  %v5840_v18 = vld [vmem:[#allocation7 + $0x1b8] sm:$0xf]  ;;  %v6863_v33 = vld [vmem:[#allocation7 + $0x1c0] sm:$0xf0] }
 0x277   :  { %v2192_v10 = vmul.f32 %v7145_v24, %v7145_v24  ;;  %v2174_v34 = vadd.f32 1.0, %v7145_v24  ;;  %v2186_v49 = vmul.f32 2.0, %v7145_v24 }
 0x278   :  { %v8074_v22 = vadd.f32 %v2154_v59, %v2141_v61  ;;  %v2220_v48 = vmul.f32 %v2214_v0, %v2178_v44  ;;  %v5648_v61 = vld [vmem:[#allocation7 + $0x38] sm:$0xf]  ;;  %v6875_v0 = vld [vmem:[#allocation7 + $0x220] sm:$0xf0]  ;;  %v6869_v44 = vld [vmem:[#allocation7 + $0x1f0] sm:$0xf0] }
 0x279   :  { %v7147_v55 = vpop.eup %7146  ;;  %v2198_v14 = vadd.f32 1.0, %v2192_v10  ;;  %2810 = vmatpush.bf16.msrb.mxu3 %v5673_v41  ;;  %v2180_v9 = vmul.f32 0.5, %v2174_v34 }
 0x27a   :  { %v2161_v50 = vmul.f32 0.5, %v8074_v22  ;;  %v2207_v30 = vmul.f32 %v7147_v55, %v2183_v3  ;;  %v2226_v6 = vadd.f32 %v2220_v48, %v8035_v13  ;;  %v5649_v55 = vor.u32 %v6815_v60, %v5648_v61  ;;  %v5852_v48 = vld [vmem:[#allocation7 + $0x1d0] sm:$0xf]  ;;  %v5816_v61 = vld [vmem:[#allocation7 + $0x188] sm:$0xf] }
 0x27b   :  { %7150 = vrcp.f32 %v2198_v14  ;;  %v2128_v27 = vpop.f32.mrf.mxu2  ;;  %v7149_v29 = vpop.eup %7148  ;;  %v6878_v14 = vld [vmem:[#allocation7 + $0x238] sm:$0xf0]  ;;  %v6857_v60 = vld [vmem:[#allocation7 + $0x190] sm:$0xf0] }
 0x27c   :  { %7152 = vtanh.f32 %v2161_v50  ;;  %v2129_v25 = vadd.f32 %v2128_v27, %v1645_v31  ;;  %v2211_v58 = vmul.f32 %v7149_v29, %v2187_v51  ;;  %v2156_v31 = vpop.f32.mrf.mxu0  ;;  %v2213_v4 = vsub.f32 %v2207_v30, %v8044_v32  ;;  %v5624_v27 = vld [vmem:[#allocation7 + $0x8] sm:$0xf] }
 0x27d   :  { %2811 = vmatpush.bf16.msrb.mxu3 %v5661_v62  ;;  %v5901_v21 = vor.u32 %v6878_v14, %v5900_v12  ;;  %v5637_v50 = vor.u32 %v6812_v20, %v5636_v16  ;;  %v5889_v29 = vor.u32 %v6875_v0, %v5888_v45  ;;  %v5841_v62 = vor.u32 %v6863_v33, %v5840_v18  ;;  %v5944_v12 = vld [vmem:[#allocation9 + $0x50] sm:$0xf]  ;;  %v6908_v20 = vld [vmem:[#allocation9 + $0xe4] sm:$0xf0]  ;;  %v6893_v45 = vld [vmem:[#allocation9 + $0x74] sm:$0xf] }
 0x27e   :  { %v2143_v47 = vadd.f32 %v2142_v42, %v2129_v25  ;;  %v2217_v37 = vsub.f32 %v2211_v58, %v8047_v56  ;;  %v2219_v8 = vmul.f32 %v2213_v4, %v2177_v63  ;;  %v6872_v25 = vld [vmem:[#allocation7 + $0x208] sm:$0xf0]  ;;  %v5864_v42 = vld [vmem:[#allocation7 + $0x1e8] sm:$0xf]  ;;  %v5828_v63 = vld [vmem:[#allocation7 + $0x1a0] sm:$0xf] }
 0x27f   :  { %v5865_v46 = vor.u32 %v6869_v44, %v5864_v42  ;;  %v5962_v0 = vld [vmem:[#allocation9 + $0x78] sm:$0xf0]  ;;  %v5920_v42 = vld [vmem:[#allocation9 + $0x20] sm:$0xf]  ;;  %v6884_v44 = vld [vmem:[#allocation9 + $0x24] sm:$0xf0] }
 0x280   :  { %v8086_v53 = vadd.f32 %v2156_v31, %v2143_v47  ;;  %v2223_v54 = vmul.f32 %v2217_v37, %v2181_v2  ;;  %v2225_v13 = vadd.f32 %v2219_v8, %v8044_v32  ;;  %v5625_v32 = vor.u32 %v6809_v36, %v5624_v27  ;;  %v6866_v2 = vld [vmem:[#allocation7 + $0x1d8] sm:$0xf0]  ;;  %v6892_v8 = vld [vmem:[#allocation9 + $0x64] sm:$0xf0]  ;;  %v5928_v36 = vld [vmem:[#allocation9 + $0x30] sm:$0xf] }
 0x281   :  { %v7151_v57 = vpop.eup %7150  ;;  %2812 = vmatpush.bf16.msrb.mxu3 %v5649_v55  ;;  %v5853_v34 = vor.u32 %v6866_v2, %v5852_v48  ;;  %v6890_v55 = vld [vmem:[#allocation9 + $0x54] sm:$0xf0]  ;;  %v5965_v27 = vor.u32 %v6893_v45, %v5962_v0  ;;  %v5912_v2 = vld [vmem:[#allocation9 + $0x10] sm:$0xf]  ;;  %v5938_v18 = vld [vmem:[#allocation9 + $0x48] sm:$0xf0] }
 0x282   :  { %v7153_v59 = vpop.eup %7152  ;;  %v2210_v1 = vmul.f32 %v7151_v57, %v2186_v49  ;;  %v2164_v5 = vmul.f32 0.5, %v8086_v53  ;;  %v2229_v24 = vadd.f32 %v2223_v54, %v8047_v56  ;;  %v5945_v16 = vor.u32 %v6890_v55, %v5944_v12  ;;  %v5968_v55 = vld [vmem:[#allocation9 + $0x80] sm:$0xf]  ;;  %v6018_v45 = vld [vmem:[#allocation9 + $0xe8] sm:$0xf0] }
 0x283   :  { %v2191_v7 = vmul.f32 %v7153_v59, %v7153_v59  ;;  %v2185_v30 = vmul.f32 2.0, %v7153_v59  ;;  %v2173_v39 = vadd.f32 1.0, %v7153_v59 }
 0x284   :  { %v2216_v10 = vsub.f32 %v2210_v1, %v8058_v17  ;;  %7154 = vtanh.f32 %v2164_v5  ;;  %v2330_v11 = vpack.c.bf16 %v2229_v24, %v2226_v6  ;;  %v6860_v1 = vld [vmem:[#allocation7 + $0x1a8] sm:$0xf0]  ;;  %v5817_v6 = vor.u32 %v6857_v60, %v5816_v61  ;;  %v5976_v61 = vld [vmem:[#allocation9 + $0x90] sm:$0xf] }
 0x285   :  { %v2197_v19 = vadd.f32 1.0, %v2191_v7  ;;  %2813 = vmatpush.bf16.msrb.mxu3 %v5637_v50  ;;  %v2179_v47 = vmul.f32 0.5, %v2173_v39  ;;  %v5829_v5 = vor.u32 %v6860_v1, %v5828_v63  ;;  %v5952_v7 = vld [vmem:[#allocation9 + $0x60] sm:$0xf]  ;;  %v6008_v50 = vld [vmem:[#allocation9 + $0xd0] sm:$0xf] }
 0x286   :  { %v2222_v3 = vmul.f32 %v2216_v10, %v2180_v9  ;;  %2745 = vmatmul.bf16.vlgmr.msra.gmra.mxu2 %v2330_v11  ;;  %v6024_v9 = vld [vmem:[#allocation9 + $0xf0] sm:$0xf]  ;;  %v5953_v10 = vor.u32 %v6892_v8, %v5952_v7  ;;  %v5904_v1 = vld [vmem:[#allocation9] sm:$0xf] }
 0x287   :  { %7156 = vrcp.f32 %v2197_v19 }
 0x288   :  { %v2228_v56 = vadd.f32 %v2222_v3, %v8058_v17  ;;  %v5876_v17 = vld [vmem:[#allocation7 + $0x200] sm:$0xf] }
 0x289   :  { %v5877_v38 = vor.u32 %v6872_v25, %v5876_v17  ;;  %2814 = vmatpush.bf16.msrb.mxu3 %v5625_v32  ;;  %v6016_v3 = vld [vmem:[#allocation9 + $0xe0] sm:$0xf]  ;;  %v6891_v17 = vld [vmem:[#allocation9 + $0x64] sm:$0xf]  ;;  %v5954_v25 = vld [vmem:[#allocation9 + $0x68] sm:$0xf0] }
 0x28a   :  { %v7155_v23 = vpop.eup %7154  ;;  %v2329_v43 = vpack.c.bf16 %v2228_v56, %v2225_v13  ;;  %v6017_v13 = vor.u32 %v6908_v20, %v6016_v3  ;;  %v5936_v56 = vld [vmem:[#allocation9 + $0x40] sm:$0xf]  ;;  %v6896_v3 = vld [vmem:[#allocation9 + $0x84] sm:$0xf0]  ;;  %v6088_v20 = vld [vmem:[#allocation9 + $0x170] sm:$0xf] }
 0x28b   :  { %v2194_v51 = vmul.f32 %v7155_v23, %v7155_v23  ;;  %v2176_v28 = vadd.f32 1.0, %v7155_v23  ;;  %v2188_v40 = vmul.f32 2.0, %v7155_v23 }
 0x28c   :  { %2731 = vmatmul.bf16.vlgmr.msra.gmra.mxu1 %v2329_v43  ;;  %2773 = vmatmul.bf16.vlgmr.msrb.gmra.mxu0 %v2329_v43 }
 0x28d   :  { %v7157_v52 = vpop.eup %7156  ;;  %v2200_v15 = vadd.f32 1.0, %v2194_v51  ;;  %2835 = vmatpush.bf16.msra.mxu1 %v5901_v21  ;;  %v2182_v31 = vmul.f32 0.5, %v2176_v28  ;;  %v6888_v21 = vld [vmem:[#allocation9 + $0x44] sm:$0xf0]  ;;  %v5921_v28 = vor.u32 %v6884_v44, %v5920_v42 }
 0x28e   :  { %v2209_v35 = vmul.f32 %v7157_v52, %v2185_v30  ;;  %v5937_v23 = vor.u32 %v6888_v21, %v5936_v56  ;;  %v6886_v52 = vld [vmem:[#allocation9 + $0x34] sm:$0xf0]  ;;  %v6904_v30 = vld [vmem:[#allocation9 + $0xc4] sm:$0xf0]  ;;  %v6883_v56 = vld [vmem:[#allocation9 + $0x24] sm:$0xf] }
 0x28f   :  { %7158 = vrcp.f32 %v2200_v15  ;;  %v6000_v15 = vld [vmem:[#allocation9 + $0xc0] sm:$0xf]  ;;  %v5929_v32 = vor.u32 %v6886_v52, %v5928_v36  ;;  %v6925_v52 = vld [vmem:[#allocation9 + $0x174] sm:$0xf] }
 0x290   :  { %v2215_v58 = vsub.f32 %v2209_v35, %v8074_v22  ;;  %v6001_v35 = vor.u32 %v6904_v30, %v6000_v15  ;;  %v6090_v15 = vld [vmem:[#allocation9 + $0x178] sm:$0xf0] }
 0x291   :  { %2836 = vmatpush.bf16.msra.mxu1 %v5889_v29 }
 0x292   :  { %v2221_v37 = vmul.f32 %v2215_v58, %v2179_v47  ;;  %v5992_v58 = vld [vmem:[#allocation9 + $0xb0] sm:$0xf]  ;;  %v5946_v47 = vld [vmem:[#allocation9 + $0x58] sm:$0xf0] }
 0x294   :  { %v2227_v57 = vadd.f32 %v2221_v37, %v8074_v22  ;;  %v5960_v22 = vld [vmem:[#allocation9 + $0x70] sm:$0xf]  ;;  %v6882_v37 = vld [vmem:[#allocation9 + $0x14] sm:$0xf0] }
 0x295   :  { %v7159_v26 = vpop.eup %7158  ;;  %2837 = vmatpush.bf16.msra.mxu1 %v5877_v38  ;;  %v5957_v38 = vor.u32 %v6891_v17, %v5954_v25  ;;  %v6093_v17 = vor.u32 %v6925_v52, %v6090_v15  ;;  %v5986_v52 = vld [vmem:[#allocation9 + $0xa8] sm:$0xf0] }
 0x296   :  { %v2212_v41 = vmul.f32 %v7159_v26, %v2188_v40  ;;  %v6902_v40 = vld [vmem:[#allocation9 + $0xb4] sm:$0xf0]  ;;  %v6889_v26 = vld [vmem:[#allocation9 + $0x54] sm:$0xf] }
 0x297   :  { %v5949_v48 = vor.u32 %v6889_v26, %v5946_v47  ;;  %v6905_v26 = vld [vmem:[#allocation9 + $0xd4] sm:$0xf] }
 0x298   :  { %v2218_v4 = vsub.f32 %v2212_v41, %v8086_v53  ;;  %v8104_v41 = vld [vmem:[#allocation24 + $0x3] ss:$8 sm:$0xf] }
 0x299   :  { %2838 = vmatpush.bf16.msra.mxu1 %v5865_v46  ;;  %v5993_v46 = vor.u32 %v6902_v40, %v5992_v58  ;;  %v2333_v33 = vperm.slane %v8104_v41, 0  ;;  %v5914_v40 = vld [vmem:[#allocation9 + $0x18] sm:$0xf0] }
 0x29a   :  { %v2224_v49 = vmul.f32 %v2218_v4, %v2182_v31  ;;  %v5984_v31 = vld [vmem:[#allocation9 + $0xa0] sm:$0xf]  ;;  %v5913_v4 = vor.u32 %v6882_v37, %v5912_v2  ;;  %v6923_v2 = vld [vmem:[#allocation9 + $0x164] sm:$0xf]  ;;  %v6082_v37 = vld [vmem:[#allocation9 + $0x168] sm:$0xf0] }
 0x29c   :  { %v2230_v54 = vadd.f32 %v2224_v49, %v8086_v53  ;;  %2787 = vmatmul.bf16.vlgmr.msrb.gmra.mxu1 %v2330_v11  ;;  %2829 = vmatmul.bf16.vlgmr.msra.gmra.mxu0 %v2330_v11  ;;  %v6894_v53 = vld [vmem:[#allocation9 + $0x74] sm:$0xf0]  ;;  %v6887_v49 = vld [vmem:[#allocation9 + $0x44] sm:$0xf] }
 0x29d   :  { %2839 = vmatpush.bf16.msra.mxu1 %v5853_v34  ;;  %v5961_v24 = vor.u32 %v6894_v53, %v5960_v22  ;;  %v6910_v11 = vld [vmem:[#allocation9 + $0xf4] sm:$0xf0]  ;;  %v6900_v34 = vld [vmem:[#allocation9 + $0xa4] sm:$0xf0]  ;;  %v6885_v53 = vld [vmem:[#allocation9 + $0x34] sm:$0xf] }
 0x29e   :  { %v2331_v59 = vpack.c.bf16 %v2230_v54, %v2227_v57  ;;  %v6025_v19 = vor.u32 %v6910_v11, %v6024_v9  ;;  %v5985_v57 = vor.u32 %v6900_v34, %v5984_v31  ;;  %v5941_v54 = vor.u32 %v6887_v49, %v5938_v18  ;;  %v6898_v22 = vld [vmem:[#allocation9 + $0x94] sm:$0xf0]  ;;  %v6026_v11 = vld [vmem:[#allocation9 + $0xf8] sm:$0xf0]  ;;  %v6072_v34 = vld [vmem:[#allocation9 + $0x150] sm:$0xf] }
 0x29f   :  { %3219 = vmatpush.bf16.msra.mxu2 %v5961_v24  ;;  %v5930_v24 = vld [vmem:[#allocation9 + $0x38] sm:$0xf0]  ;;  %v5977_v8 = vor.u32 %v6898_v22, %v5976_v61  ;;  %v6922_v49 = vld [vmem:[#allocation9 + $0x154] sm:$0xf0]  ;;  %v6879_v18 = vld [vmem:[#allocation9 + $0x4] sm:$0xf] }
 0x2a0   :  { %2759 = vmatmul.bf16.vlgmr.msra.gmra.mxu3 %v2331_v59  ;;  %2801 = vmatmul.bf16.vlgmr.msrb.gmra.mxu2 %v2331_v59  ;;  %v5933_v9 = vor.u32 %v6885_v53, %v5930_v24  ;;  %v6921_v22 = vld [vmem:[#allocation9 + $0x154] sm:$0xf]  ;;  %v6074_v53 = vld [vmem:[#allocation9 + $0x158] sm:$0xf0] }
 0x2a1   :  { %2840 = vmatpush.bf16.msra.mxu1 %v5841_v62  ;;  %3233 = vmatpush.bf16.msra.mxu3 %v6025_v19  ;;  %v2334_v62 = vperm.slane %v8104_v41, 1 }
 0x2a3   :  { %3220 = vmatpush.bf16.msra.mxu2 %v5953_v10  ;;  %v6909_v10 = vld [vmem:[#allocation9 + $0xf4] sm:$0xf] }
 0x2a4   :  { %v6029_v19 = vor.u32 %v6909_v10, %v6026_v11  ;;  %v6901_v10 = vld [vmem:[#allocation9 + $0xb4] sm:$0xf] }
 0x2a5   :  { %2841 = vmatpush.bf16.msra.mxu1 %v5829_v5  ;;  %3234 = vmatpush.bf16.msra.mxu3 %v6017_v13  ;;  %v6880_v5 = vld [vmem:[#allocation9 + $0x4] sm:$0xf0]  ;;  %v6926_v13 = vld [vmem:[#allocation9 + $0x174] sm:$0xf0] }
 0x2a7   :  { %3221 = vmatpush.bf16.msra.mxu2 %v5945_v16  ;;  %v5969_v16 = vor.u32 %v6896_v3, %v5968_v55  ;;  %v5994_v3 = vld [vmem:[#allocation9 + $0xb8] sm:$0xf0] }
 0x2a9   :  { %2842 = vmatpush.bf16.msra.mxu1 %v5817_v6  ;;  %v5905_v6 = vor.u32 %v6880_v5, %v5904_v1  ;;  %v6903_v1 = vld [vmem:[#allocation9 + $0xc4] sm:$0xf]  ;;  %v6002_v5 = vld [vmem:[#allocation9 + $0xc8] sm:$0xf0] }
 0x2ab   :  { %3222 = vmatpush.bf16.msra.mxu2 %v5937_v23  ;;  %v5922_v23 = vld [vmem:[#allocation9 + $0x28] sm:$0xf0] }
 0x2ac   :  { %2843 = vmatmul.bf16.vlgmr.msra.gmra.mxu1 %v2331_v59 }
 0x2ad   :  { %3261 = vmatpush.bf16.msrb.mxu1 %v5965_v27  ;;  %v5925_v27 = vor.u32 %v6883_v56, %v5922_v23  ;;  %v5997_v56 = vor.u32 %v6901_v10, %v5994_v3 }
 0x2af   :  { %3223 = vmatpush.bf16.msra.mxu2 %v5929_v32 }
 0x2b0   :  { %2815 = vmatmul.bf16.vlgmr.msrb.gmra.mxu3 %v2329_v43  ;;  %v6906_v43 = vld [vmem:[#allocation9 + $0xd4] sm:$0xf0] }
 0x2b1   :  { %v6009_v51 = vor.u32 %v6906_v43, %v6008_v50  ;;  %3262 = vmatpush.bf16.msrb.mxu1 %v5957_v38  ;;  %v6089_v50 = vor.u32 %v6926_v13, %v6088_v20  ;;  %v6907_v43 = vld [vmem:[#allocation9 + $0xe4] sm:$0xf]  ;;  %v6881_v38 = vld [vmem:[#allocation9 + $0x14] sm:$0xf] }
 0x2b2   :  { %v6021_v36 = vor.u32 %v6907_v43, %v6018_v45  ;;  %v5917_v47 = vor.u32 %v6881_v38, %v5914_v40  ;;  %v6056_v45 = vld [vmem:[#allocation9 + $0x130] sm:$0xf] }
 0x2b3   :  { %3235 = vmatpush.bf16.msra.mxu3 %v6009_v51  ;;  %3224 = vmatpush.bf16.msra.mxu2 %v5921_v28 }
 0x2b4   :  { %3247 = vmatpush.bf16.msrb.mxu0 %v6089_v50  ;;  %v2335_v50 = vperm.slane %v8104_v41, 2 }
 0x2b5   :  { %3263 = vmatpush.bf16.msrb.mxu1 %v5949_v48  ;;  %v6010_v48 = vld [vmem:[#allocation9 + $0xd8] sm:$0xf0] }
 0x2b7   :  { %3236 = vmatpush.bf16.msra.mxu3 %v6001_v35  ;;  %3225 = vmatpush.bf16.msra.mxu2 %v5913_v4  ;;  %v6924_v35 = vld [vmem:[#allocation9 + $0x164] sm:$0xf0]  ;;  %v6013_v4 = vor.u32 %v6905_v26, %v6010_v48  ;;  %v6915_v48 = vld [vmem:[#allocation9 + $0x124] sm:$0xf] }
 0x2b9   :  { %3264 = vmatpush.bf16.msrb.mxu1 %v5941_v54  ;;  %v6073_v54 = vor.u32 %v6922_v49, %v6072_v34 }
 0x2bb   :  { %3237 = vmatpush.bf16.msra.mxu3 %v5993_v46  ;;  %3226 = vmatpush.bf16.msra.mxu2 %v5905_v6  ;;  %v6005_v6 = vor.u32 %v6903_v1, %v6002_v5 }
 0x2bd   :  { %3265 = vmatpush.bf16.msrb.mxu1 %v5933_v9  ;;  %v6920_v9 = vld [vmem:[#allocation9 + $0x144] sm:$0xf0] }
 0x2bf   :  { %3238 = vmatpush.bf16.msra.mxu3 %v5985_v57  ;;  %3275 = vmatpush.bf16.msrb.mxu2 %v6029_v19 }
 0x2c1   :  { %3266 = vmatpush.bf16.msrb.mxu1 %v5925_v27 }
 0x2c3   :  { %3239 = vmatpush.bf16.msra.mxu3 %v5977_v8  ;;  %3276 = vmatpush.bf16.msrb.mxu2 %v6021_v36  ;;  %v6077_v8 = vor.u32 %v6921_v22, %v6074_v53  ;;  %v6899_v36 = vld [vmem:[#allocation9 + $0xa4] sm:$0xf]  ;;  %v5970_v53 = vld [vmem:[#allocation9 + $0x88] sm:$0xf0] }
 0x2c5   :  { %3267 = vmatpush.bf16.msrb.mxu1 %v5917_v47  ;;  %v5978_v47 = vld [vmem:[#allocation9 + $0x98] sm:$0xf0] }
 0x2c7   :  { %3240 = vmatpush.bf16.msra.mxu3 %v5969_v16  ;;  %3277 = vmatpush.bf16.msrb.mxu2 %v6013_v4  ;;  %v6919_v16 = vld [vmem:[#allocation9 + $0x144] sm:$0xf] }
 0x2cb   :  { %3289 = vmatpush.bf16.msrb.mxu3 %v6093_v17  ;;  %3278 = vmatpush.bf16.msrb.mxu2 %v6005_v6 }
 0x2cf   :  { %3279 = vmatpush.bf16.msrb.mxu2 %v5997_v56  ;;  %v6911_v56 = vld [vmem:[#allocation9 + $0x104] sm:$0xf] }
 0x309   :  { %v8098_v14 = vpop.f32.mrf.mxu1  ;;  %v8100_v29 = vpop.f32.mrf.mxu2 }
 0x30a   :  { %v2774_v59 = vpop.f32.mrf.mxu0  ;;  %v2733_v7 = vadd.f32 %v8098_v14, %v2333_v33 }
 0x30b   :  { %v2775_v12 = vadd.f32 %v2774_v59, %v2334_v62  ;;  %v5906_v59 = vld [vmem:[#allocation9 + $0x8] sm:$0xf0] }
 0x30c   :  { %v2747_v14 = vadd.f32 %v8100_v29, %v2733_v7  ;;  %v6080_v29 = vld [vmem:[#allocation9 + $0x160] sm:$0xf] }
 0x30d   :  { %v6081_v28 = vor.u32 %v6924_v35, %v6080_v29  ;;  %v6917_v29 = vld [vmem:[#allocation9 + $0x134] sm:$0xf]  ;;  %v6058_v35 = vld [vmem:[#allocation9 + $0x138] sm:$0xf0] }
 0x30e   :  { %v6061_v38 = vor.u32 %v6917_v29, %v6058_v35 }
 0x30f   :  { %3248 = vmatpush.bf16.msrb.mxu0 %v6081_v28  ;;  %v6897_v28 = vld [vmem:[#allocation9 + $0x94] sm:$0xf] }
 0x310   :  { %v5981_v4 = vor.u32 %v6897_v28, %v5978_v47 }
 0x311   :  { %v8102_v39 = vpop.f32.mrf.mxu1  ;;  %v8108_v63 = vpop.f32.mrf.mxu2 }
 0x312   :  { %v2776_v25 = vpop.f32.mrf.mxu0  ;;  %v2735_v42 = vadd.f32 %v8102_v39, %v2333_v33  ;;  %v6085_v39 = vor.u32 %v6923_v2, %v6082_v37  ;;  %v6050_v2 = vld [vmem:[#allocation9 + $0x128] sm:$0xf0] }
 0x313   :  { %v2777_v31 = vadd.f32 %v2776_v25, %v2334_v62  ;;  %3249 = vmatpush.bf16.msrb.mxu0 %v6073_v54  ;;  %v5989_v25 = vor.u32 %v6899_v36, %v5986_v52  ;;  %v6914_v54 = vld [vmem:[#allocation9 + $0x114] sm:$0xf0] }
 0x314   :  { %v2749_v33 = vadd.f32 %v8108_v63, %v2735_v42  ;;  %3290 = vmatpush.bf16.msrb.mxu3 %v6085_v39  ;;  %v6064_v63 = vld [vmem:[#allocation9 + $0x140] sm:$0xf] }
 0x315   :  { %v6065_v55 = vor.u32 %v6920_v9, %v6064_v63  ;;  %3280 = vmatpush.bf16.msrb.mxu2 %v5989_v25  ;;  %v6042_v63 = vld [vmem:[#allocation9 + $0x118] sm:$0xf0] }
 0x317   :  { %3250 = vmatpush.bf16.msrb.mxu0 %v6065_v55 }
 0x318   :  { %3291 = vmatpush.bf16.msrb.mxu3 %v6077_v8  ;;  %v6913_v8 = vld [vmem:[#allocation9 + $0x114] sm:$0xf] }
 0x319   :  { %v2788_v60 = vpop.f32.mrf.mxu1  ;;  %3281 = vmatpush.bf16.msrb.mxu2 %v5981_v4  ;;  %v6045_v3 = vor.u32 %v6913_v8, %v6042_v63 }
 0x31a   :  { %v2789_v21 = vadd.f32 %v2788_v60, %v2775_v12  ;;  %v5909_v60 = vor.u32 %v6879_v18, %v5906_v59  ;;  %v2830_v15 = vpop.f32.mrf.mxu0 }
 0x31c   :  { %3268 = vmatpush.bf16.msrb.mxu1 %v5909_v60  ;;  %v6895_v60 = vld [vmem:[#allocation9 + $0x84] sm:$0xf] }
 0x321   :  { %v2790_v46 = vpop.f32.mrf.mxu1 }
 0x322   :  { %v2791_v57 = vadd.f32 %v2790_v46, %v2777_v31 }
 0x323   :  { %v2760_v0 = vpop.f32.mrf.mxu3  ;;  %v2802_v51 = vpop.f32.mrf.mxu2 }
 0x324   :  { %v8114_v32 = vadd.f32 %v2760_v0, %v2747_v14  ;;  %v8116_v30 = vadd.f32 %v2802_v51, %v2789_v21  ;;  %v6066_v14 = vld [vmem:[#allocation9 + $0x148] sm:$0xf0]  ;;  %v6918_v0 = vld [vmem:[#allocation9 + $0x134] sm:$0xf0] }
 0x325   :  { %v6069_v43 = vor.u32 %v6919_v16, %v6066_v14  ;;  %v6057_v27 = vor.u32 %v6918_v0, %v6056_v45  ;;  %v6032_v16 = vld [vmem:[#allocation9 + $0x100] sm:$0xf] }
 0x326   :  { %v2849_v44 = vmul.f32 0.5, %v8114_v32  ;;  %v2850_v58 = vmul.f32 0.5, %v8116_v30 }
 0x327   :  { %3292 = vmatpush.bf16.msrb.mxu3 %v6069_v43  ;;  %3251 = vmatpush.bf16.msrb.mxu0 %v6057_v27  ;;  %v6034_v43 = vld [vmem:[#allocation9 + $0x108] sm:$0xf0] }
 0x328   :  { %7160 = vtanh.f32 %v2849_v44  ;;  %v6048_v44 = vld [vmem:[#allocation9 + $0x120] sm:$0xf] }
 0x329   :  { %7162 = vtanh.f32 %v2850_v58  ;;  %v2844_v42 = vpop.f32.mrf.mxu1  ;;  %v6916_v58 = vld [vmem:[#allocation9 + $0x124] sm:$0xf0] }
 0x32a   :  { %v6049_v46 = vor.u32 %v6916_v58, %v6048_v44 }
 0x32b   :  { %v2762_v61 = vpop.f32.mrf.mxu3  ;;  %v2804_v62 = vpop.f32.mrf.mxu2  ;;  %3293 = vmatpush.bf16.msrb.mxu3 %v6061_v38 }
 0x32c   :  { %v8124_v24 = vadd.f32 %v2762_v61, %v2749_v33  ;;  %v8126_v7 = vadd.f32 %v2804_v62, %v2791_v57  ;;  %3252 = vmatpush.bf16.msrb.mxu0 %v6049_v46  ;;  %v6053_v33 = vor.u32 %v6915_v48, %v6050_v2  ;;  %v6040_v57 = vld [vmem:[#allocation9 + $0x110] sm:$0xf] }
 0x32d   :  { %v6041_v22 = vor.u32 %v6914_v54, %v6040_v57 }
 0x32e   :  { %v8128_v11 = vpop.eup %7160  ;;  %v2852_v19 = vmul.f32 0.5, %v8124_v24  ;;  %v2853_v12 = vmul.f32 0.5, %v8126_v7 }
 0x32f   :  { %v8132_v20 = vpop.eup %7162  ;;  %v2879_v13 = vmul.f32 %v8128_v11, %v8128_v11  ;;  %v2873_v1 = vmul.f32 2.0, %v8128_v11  ;;  %3294 = vmatpush.bf16.msrb.mxu3 %v6053_v33  ;;  %v2861_v14 = vadd.f32 1.0, %v8128_v11 }
 0x330   :  { %v2880_v21 = vmul.f32 %v8132_v20, %v8132_v20  ;;  %7164 = vtanh.f32 %v2852_v19  ;;  %v2874_v5 = vmul.f32 2.0, %v8132_v20  ;;  %v5973_v19 = vor.u32 %v6895_v60, %v5970_v53  ;;  %3253 = vmatpush.bf16.msrb.mxu0 %v6041_v22 }
 0x331   :  { %v2885_v23 = vadd.f32 1.0, %v2879_v13  ;;  %7166 = vtanh.f32 %v2853_v12  ;;  %v2832_v12 = vpop.f32.mrf.mxu0  ;;  %v6912_v13 = vld [vmem:[#allocation9 + $0x104] sm:$0xf0]  ;;  %v2862_v45 = vadd.f32 1.0, %v8132_v20  ;;  %v2846_v0 = vpop.f32.mrf.mxu1  ;;  %v2867_v35 = vmul.f32 0.5, %v2861_v14 }
 0x332   :  { %v2886_v51 = vadd.f32 1.0, %v2880_v21  ;;  %3282 = vmatpush.bf16.msrb.mxu2 %v5973_v19 }
 0x333   :  { %7168 = vrcp.f32 %v2885_v23  ;;  %v2816_v17 = vpop.f32.mrf.mxu3  ;;  %v6033_v23 = vor.u32 %v6912_v13, %v6032_v16  ;;  %3295 = vmatpush.bf16.msrb.mxu3 %v6045_v3  ;;  %v2868_v20 = vmul.f32 0.5, %v2862_v45  ;;  %v6942_v3 = vld [vmem:[#allocation10 + $0x74] sm:$0xf0]  ;;  %v6941_v16 = vld [vmem:[#allocation10 + $0x74] sm:$0xf] }
 0x334   :  { %7170 = vrcp.f32 %v2886_v51  ;;  %v2817_v41 = vadd.f32 %v2816_v17, %v2335_v50 }
 0x335   :  { %3254 = vmatpush.bf16.msrb.mxu0 %v6033_v23  ;;  %v6940_v23 = vld [vmem:[#allocation10 + $0x64] sm:$0xf0] }
 0x336   :  { %v7165_v40 = vpop.eup %7164  ;;  %v2831_v26 = vadd.f32 %v2830_v15, %v2817_v41 }
 0x337   :  { %v7167_v37 = vpop.eup %7166  ;;  %v2882_v31 = vmul.f32 %v7165_v40, %v7165_v40  ;;  %v2864_v27 = vadd.f32 1.0, %v7165_v40  ;;  %v2876_v36 = vmul.f32 2.0, %v7165_v40 }
 0x338   :  { %v2883_v39 = vmul.f32 %v7167_v37, %v7167_v37  ;;  %v8139_v34 = vadd.f32 %v2844_v42, %v2831_v26  ;;  %v2865_v25 = vadd.f32 1.0, %v7167_v37  ;;  %v2877_v29 = vmul.f32 2.0, %v7167_v37 }
 0x339   :  { %v7169_v49 = vpop.eup %7168  ;;  %v2888_v18 = vadd.f32 1.0, %v2882_v31  ;;  %v2870_v28 = vmul.f32 0.5, %v2864_v27  ;;  %v6957_v27 = vld [vmem:[#allocation10 + $0xf4] sm:$0xf] }
 0x33a   :  { %v7171_v59 = vpop.eup %7170  ;;  %v2889_v61 = vadd.f32 1.0, %v2883_v39  ;;  %v2851_v62 = vmul.f32 0.5, %v8139_v34  ;;  %v2897_v9 = vmul.f32 %v7169_v49, %v2873_v1  ;;  %v2871_v47 = vmul.f32 0.5, %v2865_v25  ;;  %v6136_v25 = vld [vmem:[#allocation10 + $0x50] sm:$0xf] }
 0x33b   :  { %7172 = vrcp.f32 %v2888_v18  ;;  %v2818_v6 = vpop.f32.mrf.mxu3  ;;  %v2898_v55 = vmul.f32 %v7171_v59, %v2874_v5 }
 0x33c   :  { %7174 = vrcp.f32 %v2889_v61  ;;  %v2819_v10 = vadd.f32 %v2818_v6, %v2335_v50  ;;  %v6037_v50 = vor.u32 %v6911_v56, %v6034_v43  ;;  %v2903_v51 = vsub.f32 %v2897_v9, %v8114_v32  ;;  %v6154_v56 = vld [vmem:[#allocation10 + $0x78] sm:$0xf0]  ;;  %v6939_v43 = vld [vmem:[#allocation10 + $0x64] sm:$0xf] }
 0x33d   :  { %7176 = vtanh.f32 %v2851_v62  ;;  %v2904_v17 = vsub.f32 %v2898_v55, %v8116_v30  ;;  %v6152_v55 = vld [vmem:[#allocation10 + $0x70] sm:$0xf]  ;;  %v6157_v14 = vor.u32 %v6941_v16, %v6154_v56 }
 0x33e   :  { %v2833_v21 = vadd.f32 %v2832_v12, %v2819_v10  ;;  %3296 = vmatpush.bf16.msrb.mxu3 %v6037_v50  ;;  %v2909_v58 = vmul.f32 %v2903_v51, %v2867_v35  ;;  %v6153_v13 = vor.u32 %v6942_v3, %v6152_v55  ;;  %v6216_v51 = vld [vmem:[#allocation10 + $0xf0] sm:$0xf] }
 0x33f   :  { %v2910_v46 = vmul.f32 %v2904_v17, %v2868_v20  ;;  %v6956_v20 = vld [vmem:[#allocation10 + $0xe4] sm:$0xf0] }
 0x340   :  { %v2847_v52 = vadd.f32 %v2846_v0, %v2833_v21  ;;  %v2915_v4 = vadd.f32 %v2909_v58, %v8114_v32  ;;  %3552 = vmatpush.bf16.msra.mxu0 %v6153_v13  ;;  %v6144_v21 = vld [vmem:[#allocation10 + $0x60] sm:$0xf]  ;;  %v6146_v0 = vld [vmem:[#allocation10 + $0x68] sm:$0xf0] }
 0x341   :  { %v7173_v15 = vpop.eup %7172  ;;  %v2916_v49 = vadd.f32 %v2910_v46, %v8116_v30  ;;  %v6145_v45 = vor.u32 %v6940_v23, %v6144_v21  ;;  %v6149_v50 = vor.u32 %v6939_v43, %v6146_v0  ;;  %v8156_v58 = vld [vmem:[#allocation24 + $0x4] ss:$8 sm:$0xf]  ;;  %v6184_v21 = vld [vmem:[#allocation10 + $0xb0] sm:$0xf] }
 0x342   :  { %v7175_v11 = vpop.eup %7174  ;;  %v2900_v41 = vmul.f32 %v7173_v15, %v2876_v36  ;;  %v2854_v38 = vmul.f32 0.5, %v2847_v52  ;;  %v6114_v13 = vld [vmem:[#allocation10 + $0x28] sm:$0xf0]  ;;  %v6950_v23 = vld [vmem:[#allocation10 + $0xb4] sm:$0xf0] }
 0x343   :  { %v7177_v42 = vpop.eup %7176  ;;  %v2901_v44 = vmul.f32 %v7175_v11, %v2877_v29  ;;  %v6938_v29 = vld [vmem:[#allocation10 + $0x54] sm:$0xf0]  ;;  %v6937_v11 = vld [vmem:[#allocation10 + $0x54] sm:$0xf]  ;;  %v6185_v0 = vor.u32 %v6950_v23, %v6184_v21 }
 0x344   :  { %v2906_v26 = vsub.f32 %v2900_v41, %v8124_v24  ;;  %v2881_v40 = vmul.f32 %v7177_v42, %v7177_v42  ;;  %7178 = vtanh.f32 %v2854_v38  ;;  %v2875_v61 = vmul.f32 2.0, %v7177_v42  ;;  %3553 = vmatpush.bf16.msra.mxu0 %v6145_v45  ;;  %v6138_v41 = vld [vmem:[#allocation10 + $0x58] sm:$0xf0]  ;;  %v6949_v43 = vld [vmem:[#allocation10 + $0xb4] sm:$0xf] }
 0x345   :  { %v2907_v48 = vsub.f32 %v2901_v44, %v8126_v7  ;;  %v2863_v32 = vadd.f32 1.0, %v7177_v42  ;;  %v6137_v35 = vor.u32 %v6938_v29, %v6136_v25  ;;  %v6141_v38 = vor.u32 %v6937_v11, %v6138_v41  ;;  %v6208_v42 = vld [vmem:[#allocation10 + $0xe0] sm:$0xf]  ;;  %v6955_v44 = vld [vmem:[#allocation10 + $0xe4] sm:$0xf] }
 0x346   :  { %v2912_v2 = vmul.f32 %v2906_v26, %v2870_v28  ;;  %v2887_v37 = vadd.f32 1.0, %v2881_v40  ;;  %v6209_v26 = vor.u32 %v6956_v20, %v6208_v42  ;;  %v6210_v40 = vld [vmem:[#allocation10 + $0xe8] sm:$0xf0]  ;;  %v6106_v25 = vld [vmem:[#allocation10 + $0x18] sm:$0xf0] }
 0x347   :  { %v2913_v31 = vmul.f32 %v2907_v48, %v2871_v47  ;;  %v2869_v22 = vmul.f32 0.5, %v2863_v32  ;;  %v6213_v46 = vor.u32 %v6955_v44, %v6210_v40  ;;  %v6128_v47 = vld [vmem:[#allocation10 + $0x40] sm:$0xf]  ;;  %v6936_v48 = vld [vmem:[#allocation10 + $0x44] sm:$0xf0] }
 0x348   :  { %v2918_v39 = vadd.f32 %v2912_v2, %v8124_v24  ;;  %7180 = vrcp.f32 %v2887_v37  ;;  %3554 = vmatpush.bf16.msra.mxu0 %v6137_v35  ;;  %v6935_v2 = vld [vmem:[#allocation10 + $0x44] sm:$0xf]  ;;  %v2975_v37 = vperm.slane %v8156_v58, 0  ;;  %v6948_v42 = vld [vmem:[#allocation10 + $0xa4] sm:$0xf0] }
 0x349   :  { %v2919_v18 = vadd.f32 %v2913_v31, %v8126_v7  ;;  %v6129_v31 = vor.u32 %v6936_v48, %v6128_v47  ;;  %v6947_v44 = vld [vmem:[#allocation10 + $0xa4] sm:$0xf]  ;;  %v6928_v47 = vld [vmem:[#allocation10 + $0x4] sm:$0xf0] }
 0x34a   :  { %v2971_v33 = vpack.c.bf16 %v2918_v39, %v2915_v4  ;;  %v7179_v57 = vpop.eup %7178  ;;  %v6130_v4 = vld [vmem:[#allocation10 + $0x48] sm:$0xf0]  ;;  %v6927_v48 = vld [vmem:[#allocation10 + $0x4] sm:$0xf] }
 0x34b   :  { %v2972_v54 = vpack.c.bf16 %v2919_v18, %v2916_v49  ;;  %v2884_v59 = vmul.f32 %v7179_v57, %v7179_v57  ;;  %v2866_v60 = vadd.f32 1.0, %v7179_v57  ;;  %v2878_v6 = vmul.f32 2.0, %v7179_v57  ;;  %v6200_v49 = vld [vmem:[#allocation10 + $0xd0] sm:$0xf]  ;;  %v6954_v18 = vld [vmem:[#allocation10 + $0xd4] sm:$0xf0] }
 0x34c   :  { %3227 = vmatmul.bf16.vlgmr.msra.gmra.mxu2 %v2971_v33  ;;  %3269 = vmatmul.bf16.vlgmr.msrb.gmra.mxu1 %v2971_v33  ;;  %v6133_v39 = vor.u32 %v6935_v2, %v6130_v4  ;;  %v6953_v33 = vld [vmem:[#allocation10 + $0xd4] sm:$0xf]  ;;  %v6201_v57 = vor.u32 %v6954_v18, %v6200_v49  ;;  %v6168_v18 = vld [vmem:[#allocation10 + $0x90] sm:$0xf] }
 0x34d   :  { %3241 = vmatmul.bf16.vlgmr.msra.gmra.mxu3 %v2972_v54  ;;  %v2890_v5 = vadd.f32 1.0, %v2884_v59  ;;  %v2872_v8 = vmul.f32 0.5, %v2866_v60  ;;  %3580 = vmatpush.bf16.msra.mxu2 %v6157_v14 }
 0x34e   :  { %v7181_v1 = vpop.eup %7180  ;;  %3555 = vmatpush.bf16.msra.mxu0 %v6129_v31  ;;  %v6098_v31 = vld [vmem:[#allocation10 + $0x8] sm:$0xf0] }
 0x34f   :  { %7182 = vrcp.f32 %v2890_v5  ;;  %v2899_v62 = vmul.f32 %v7181_v1, %v2875_v61  ;;  %v6120_v5 = vld [vmem:[#allocation10 + $0x30] sm:$0xf]  ;;  %v6934_v61 = vld [vmem:[#allocation10 + $0x34] sm:$0xf0]  ;;  %v6101_v49 = vor.u32 %v6927_v48, %v6098_v31 }
 0x350   :  { %v6121_v32 = vor.u32 %v6934_v61, %v6120_v5  ;;  %v6170_v5 = vld [vmem:[#allocation10 + $0x98] sm:$0xf0] }
 0x351   :  { %v2905_v24 = vsub.f32 %v2899_v62, %v8139_v34  ;;  %3581 = vmatpush.bf16.msra.mxu2 %v6149_v50  ;;  %v6933_v62 = vld [vmem:[#allocation10 + $0x34] sm:$0xf]  ;;  %v6186_v50 = vld [vmem:[#allocation10 + $0xb8] sm:$0xf0] }
 0x352   :  { %3556 = vmatpush.bf16.msra.mxu0 %v6121_v32 }
 0x353   :  { %v2911_v53 = vmul.f32 %v2905_v24, %v2869_v22  ;;  %v6122_v24 = vld [vmem:[#allocation10 + $0x38] sm:$0xf0]  ;;  %v6952_v22 = vld [vmem:[#allocation10 + $0xc4] sm:$0xf0] }
 0x355   :  { %v7183_v30 = vpop.eup %7182  ;;  %v2917_v10 = vadd.f32 %v2911_v53, %v8139_v34  ;;  %v6958_v34 = vld [vmem:[#allocation10 + $0xf4] sm:$0xf0]  ;;  %3582 = vmatpush.bf16.msra.mxu2 %v6141_v38  ;;  %v6176_v38 = vld [vmem:[#allocation10 + $0xa0] sm:$0xf] }
 0x356   :  { %v2902_v7 = vmul.f32 %v7183_v30, %v2878_v6  ;;  %v6217_v36 = vor.u32 %v6958_v34, %v6216_v51  ;;  %v6125_v6 = vor.u32 %v6933_v62, %v6122_v24  ;;  %v6192_v30 = vld [vmem:[#allocation10 + $0xc0] sm:$0xf]  ;;  %v6177_v20 = vor.u32 %v6948_v42, %v6176_v38 }
 0x357   :  { %v6193_v53 = vor.u32 %v6952_v22, %v6192_v30  ;;  %v6160_v22 = vld [vmem:[#allocation10 + $0x80] sm:$0xf] }
 0x358   :  { %v2908_v63 = vsub.f32 %v2902_v7, %v2847_v52  ;;  %3566 = vmatpush.bf16.msra.mxu1 %v6217_v36  ;;  %v6951_v7 = vld [vmem:[#allocation10 + $0xc4] sm:$0xf]  ;;  %v6104_v36 = vld [vmem:[#allocation10 + $0x10] sm:$0xf] }
 0x359   :  { %3583 = vmatpush.bf16.msra.mxu2 %v6133_v39 }
 0x35a   :  { %v2914_v9 = vmul.f32 %v2908_v63, %v2872_v8  ;;  %v6194_v8 = vld [vmem:[#allocation10 + $0xc8] sm:$0xf0] }
 0x35b   :  { %v6197_v63 = vor.u32 %v6951_v7, %v6194_v8  ;;  %v6944_v7 = vld [vmem:[#allocation10 + $0x84] sm:$0xf0] }
 0x35c   :  { %3283 = vmatmul.bf16.vlgmr.msrb.gmra.mxu2 %v2972_v54  ;;  %v2920_v19 = vadd.f32 %v2914_v9, %v2847_v52  ;;  %v6218_v52 = vld [vmem:[#allocation10 + $0xf8] sm:$0xf0]  ;;  %3567 = vmatpush.bf16.msra.mxu1 %v6209_v26  ;;  %v6112_v9 = vld [vmem:[#allocation10 + $0x20] sm:$0xf]  ;;  %v6161_v8 = vor.u32 %v6944_v7, %v6160_v22  ;;  %v6971_v22 = vld [vmem:[#allocation12 + $0x64] sm:$0xf] }
 0x35d   :  { %v6221_v17 = vor.u32 %v6957_v27, %v6218_v52  ;;  %v6202_v54 = vld [vmem:[#allocation10 + $0xd8] sm:$0xf0]  ;;  %3584 = vmatpush.bf16.msra.mxu2 %v6125_v6  ;;  %v6189_v27 = vor.u32 %v6949_v43, %v6186_v50  ;;  %v6930_v52 = vld [vmem:[#allocation10 + $0x14] sm:$0xf0] }
 0x35e   :  { %v2973_v12 = vpack.c.bf16 %v2920_v19, %v2917_v10  ;;  %v6205_v1 = vor.u32 %v6953_v33, %v6202_v54  ;;  %v6932_v10 = vld [vmem:[#allocation10 + $0x24] sm:$0xf0]  ;;  %v6931_v19 = vld [vmem:[#allocation10 + $0x24] sm:$0xf]  ;;  %v6946_v33 = vld [vmem:[#allocation10 + $0x94] sm:$0xf0] }
 0x35f   :  { %3594 = vmatpush.bf16.msra.mxu3 %v6221_v17  ;;  %v6113_v16 = vor.u32 %v6932_v10, %v6112_v9  ;;  %v6117_v14 = vor.u32 %v6931_v19, %v6114_v13  ;;  %v6105_v17 = vor.u32 %v6930_v52, %v6104_v36  ;;  %v6162_v9 = vld [vmem:[#allocation10 + $0x88] sm:$0xf0] }
 0x360   :  { %3255 = vmatmul.bf16.vlgmr.msrb.gmra.mxu0 %v2973_v12  ;;  %3297 = vmatmul.bf16.vlgmr.msrb.gmra.mxu3 %v2973_v12  ;;  %v2976_v12 = vperm.slane %v8156_v58, 1 }
 0x361   :  { %3568 = vmatpush.bf16.msra.mxu1 %v6201_v57  ;;  %3557 = vmatpush.bf16.msra.mxu0 %v6113_v16  ;;  %v6945_v57 = vld [vmem:[#allocation10 + $0x94] sm:$0xf] }
 0x362   :  { %3585 = vmatpush.bf16.msra.mxu2 %v6117_v14  ;;  %v6173_v32 = vor.u32 %v6945_v57, %v6170_v5 }
 0x363   :  { %3595 = vmatpush.bf16.msra.mxu3 %v6213_v46  ;;  %v6096_v46 = vld [vmem:[#allocation10] sm:$0xf] }
 0x365   :  { %3569 = vmatpush.bf16.msra.mxu1 %v6193_v53  ;;  %3558 = vmatpush.bf16.msra.mxu0 %v6105_v17 }
 0x367   :  { %3596 = vmatpush.bf16.msra.mxu3 %v6205_v1  ;;  %v6169_v1 = vor.u32 %v6946_v33, %v6168_v18 }
 0x369   :  { %3570 = vmatpush.bf16.msra.mxu1 %v6185_v0 }
 0x36b   :  { %3597 = vmatpush.bf16.msra.mxu3 %v6197_v63  ;;  %v6943_v63 = vld [vmem:[#allocation10 + $0x84] sm:$0xf] }
 0x36c   :  { %v6165_v19 = vor.u32 %v6943_v63, %v6162_v9  ;;  %v6344_v63 = vld [vmem:[#allocation12 + $0xf0] sm:$0xf]  ;;  %v6989_v9 = vld [vmem:[#allocation12 + $0xf4] sm:$0xf] }
 0x36d   :  { %3571 = vmatpush.bf16.msra.mxu1 %v6177_v20 }
 0x36f   :  { %3598 = vmatpush.bf16.msra.mxu3 %v6189_v27 }
 0x371   :  { %3572 = vmatpush.bf16.msra.mxu1 %v6169_v1 }
 0x375   :  { %3573 = vmatpush.bf16.msra.mxu1 %v6161_v8 }
 0x3c9   :  { %v3270_v55 = vpop.f32.mrf.mxu1 }
 0x3ca   :  { %v3271_v29 = vadd.f32 %v3270_v55, %v2976_v12 }
 0x3cf   :  { %v3228_v15 = vpop.f32.mrf.mxu2 }
 0x3d0   :  { %v3242_v28 = vpop.f32.mrf.mxu3  ;;  %v3229_v60 = vadd.f32 %v3228_v15, %v2975_v37  ;;  %v6929_v15 = vld [vmem:[#allocation10 + $0x14] sm:$0xf] }
 0x3d1   :  { %v6109_v41 = vor.u32 %v6929_v15, %v6106_v25  ;;  %v3272_v54 = vpop.f32.mrf.mxu1 }
 0x3d2   :  { %v3243_v56 = vadd.f32 %v3242_v28, %v3229_v60  ;;  %v6178_v28 = vld [vmem:[#allocation10 + $0xa8] sm:$0xf0]  ;;  %v3273_v6 = vadd.f32 %v3272_v54, %v2976_v12 }
 0x3d3   :  { %3586 = vmatpush.bf16.msra.mxu2 %v6109_v41  ;;  %v6181_v40 = vor.u32 %v6947_v44, %v6178_v28 }
 0x3d5   :  { %3599 = vmatpush.bf16.msra.mxu3 %v6181_v40 }
 0x3d7   :  { %v3230_v59 = vpop.f32.mrf.mxu2  ;;  %3587 = vmatpush.bf16.msra.mxu2 %v6101_v49 }
 0x3d8   :  { %v3244_v3 = vpop.f32.mrf.mxu3  ;;  %v3231_v11 = vadd.f32 %v3230_v59, %v2975_v37  ;;  %v6097_v37 = vor.u32 %v6928_v47, %v6096_v46 }
 0x3d9   :  { %3600 = vmatpush.bf16.msra.mxu3 %v6173_v32  ;;  %v6974_v32 = vld [vmem:[#allocation12 + $0x74] sm:$0xf0] }
 0x3da   :  { %v3245_v4 = vadd.f32 %v3244_v3, %v3231_v11  ;;  %3559 = vmatpush.bf16.msra.mxu0 %v6097_v37 }
 0x3dd   :  { %v3256_v45 = vpop.f32.mrf.mxu0  ;;  %3601 = vmatpush.bf16.msra.mxu3 %v6165_v19  ;;  %v6346_v19 = vld [vmem:[#allocation12 + $0xf8] sm:$0xf0] }
 0x3de   :  { %v8160_v51 = vadd.f32 %v3256_v45, %v3243_v56 }
 0x3df   :  { %v3284_v34 = vpop.f32.mrf.mxu2 }
 0x3e0   :  { %v3303_v35 = vmul.f32 0.5, %v8160_v51  ;;  %v3285_v26 = vadd.f32 %v3284_v34, %v3271_v29 }
 0x3e2   :  { %7184 = vtanh.f32 %v3303_v35 }
 0x3e3   :  { %v3298_v2 = vpop.f32.mrf.mxu3 }
 0x3e4   :  { %v8165_v39 = vadd.f32 %v3298_v2, %v3285_v26 }
 0x3e5   :  { %v3258_v59 = vpop.f32.mrf.mxu0 }
 0x3e6   :  { %v3304_v61 = vmul.f32 0.5, %v8165_v39  ;;  %v8168_v62 = vadd.f32 %v3258_v59, %v3245_v4 }
 0x3e7   :  { %v3286_v24 = vpop.f32.mrf.mxu2 }
 0x3e8   :  { %v7185_v60 = vpop.eup %7184  ;;  %7186 = vtanh.f32 %v3304_v61  ;;  %v3305_v30 = vmul.f32 0.5, %v8168_v62  ;;  %v3287_v10 = vadd.f32 %v3286_v24, %v3273_v6  ;;  %v6280_v61 = vld [vmem:[#allocation12 + $0x70] sm:$0xf]  ;;  %v6973_v24 = vld [vmem:[#allocation12 + $0x74] sm:$0xf] }
 0x3e9   :  { %v3323_v53 = vmul.f32 %v7185_v60, %v7185_v60  ;;  %v3319_v45 = vmul.f32 2.0, %v7185_v60  ;;  %v3311_v36 = vadd.f32 1.0, %v7185_v60  ;;  %v6281_v60 = vor.u32 %v6974_v32, %v6280_v61  ;;  %v6312_v61 = vld [vmem:[#allocation12 + $0xb0] sm:$0xf]  ;;  %v6982_v32 = vld [vmem:[#allocation12 + $0xb4] sm:$0xf0] }
 0x3ea   :  { %7188 = vtanh.f32 %v3305_v30  ;;  %v6972_v30 = vld [vmem:[#allocation12 + $0x64] sm:$0xf0] }
 0x3eb   :  { %v3327_v55 = vadd.f32 1.0, %v3323_v53  ;;  %v3300_v3 = vpop.f32.mrf.mxu3  ;;  %v3315_v41 = vmul.f32 0.5, %v3311_v36  ;;  %3857 = vmatpush.bf16.msrb.mxu0 %v6281_v60  ;;  %v6274_v53 = vld [vmem:[#allocation12 + $0x68] sm:$0xf0] }
 0x3ec   :  { %v3301_v16 = vadd.f32 %v3300_v3, %v3287_v10  ;;  %v6277_v8 = vor.u32 %v6971_v22, %v6274_v53  ;;  %v6264_v3 = vld [vmem:[#allocation12 + $0x50] sm:$0xf]  ;;  %v8179_v36 = vld [vmem:[#allocation24 + $0x5] ss:$8 sm:$0xf] }
 0x3ed   :  { %7190 = vrcp.f32 %v3327_v55  ;;  %v6349_v55 = vor.u32 %v6989_v9, %v6346_v19  ;;  %v6232_v53 = vld [vmem:[#allocation12 + $0x10] sm:$0xf]  ;;  %v6234_v9 = vld [vmem:[#allocation12 + $0x18] sm:$0xf0] }
 0x3ee   :  { %v7187_v58 = vpop.eup %7186  ;;  %v3306_v12 = vmul.f32 0.5, %v3301_v16 }
 0x3ef   :  { %v3324_v13 = vmul.f32 %v7187_v58, %v7187_v58  ;;  %v3320_v15 = vmul.f32 2.0, %v7187_v58  ;;  %v3312_v42 = vadd.f32 1.0, %v7187_v58  ;;  %v6969_v58 = vld [vmem:[#allocation12 + $0x54] sm:$0xf]  ;;  %3899 = vmatpush.bf16.msrb.mxu3 %v6349_v55  ;;  %v6304_v55 = vld [vmem:[#allocation12 + $0xa0] sm:$0xf] }
 0x3f0   :  { %v7189_v56 = vpop.eup %7188  ;;  %7192 = vtanh.f32 %v3306_v12 }
 0x3f1   :  { %v3328_v14 = vadd.f32 1.0, %v3324_v13  ;;  %v3325_v21 = vmul.f32 %v7189_v56, %v7189_v56  ;;  %v3313_v25 = vadd.f32 1.0, %v7189_v56  ;;  %v3321_v29 = vmul.f32 2.0, %v7189_v56  ;;  %v6266_v13 = vld [vmem:[#allocation12 + $0x58] sm:$0xf0] }
 0x3f2   :  { %v3316_v2 = vmul.f32 0.5, %v3312_v42  ;;  %v6269_v56 = vor.u32 %v6969_v58, %v6266_v13  ;;  %v6248_v42 = vld [vmem:[#allocation12 + $0x30] sm:$0xf]  ;;  %v6306_v13 = vld [vmem:[#allocation12 + $0xa8] sm:$0xf0] }
 0x3f3   :  { %7194 = vrcp.f32 %v3328_v14  ;;  %v7191_v23 = vpop.eup %7190  ;;  %v3329_v43 = vadd.f32 1.0, %v3325_v21  ;;  %v3317_v44 = vmul.f32 0.5, %v3313_v25  ;;  %v6336_v14 = vld [vmem:[#allocation12 + $0xe0] sm:$0xf]  ;;  %v6988_v21 = vld [vmem:[#allocation12 + $0xe4] sm:$0xf0] }
 0x3f4   :  { %v3335_v50 = vmul.f32 %v7191_v23, %v3319_v45  ;;  %v6987_v23 = vld [vmem:[#allocation12 + $0xe4] sm:$0xf]  ;;  %v6338_v45 = vld [vmem:[#allocation12 + $0xe8] sm:$0xf0]  ;;  %v6328_v25 = vld [vmem:[#allocation12 + $0xd0] sm:$0xf] }
 0x3f5   :  { %7196 = vrcp.f32 %v3329_v43  ;;  %v6337_v43 = vor.u32 %v6988_v21, %v6336_v14  ;;  %v6224_v21 = vld [vmem:[#allocation12] sm:$0xf] }
 0x3f6   :  { %v7193_v0 = vpop.eup %7192  ;;  %v3339_v17 = vsub.f32 %v3335_v50, %v8160_v51  ;;  %v6256_v50 = vld [vmem:[#allocation12 + $0x40] sm:$0xf] }
 0x3f7   :  { %v3326_v34 = vmul.f32 %v7193_v0, %v7193_v0  ;;  %v3314_v40 = vadd.f32 1.0, %v7193_v0  ;;  %v3322_v46 = vmul.f32 2.0, %v7193_v0  ;;  %v6341_v0 = vor.u32 %v6987_v23, %v6338_v45  ;;  %v6960_v23 = vld [vmem:[#allocation12 + $0x4] sm:$0xf0] }
 0x3f8   :  { %v3343_v20 = vmul.f32 %v3339_v17, %v3315_v41  ;;  %v6330_v41 = vld [vmem:[#allocation12 + $0xd8] sm:$0xf0] }
 0x3f9   :  { %v7195_v27 = vpop.eup %7194  ;;  %v3330_v52 = vadd.f32 1.0, %v3326_v34  ;;  %v3318_v18 = vmul.f32 0.5, %v3314_v40  ;;  %v6968_v34 = vld [vmem:[#allocation12 + $0x44] sm:$0xf0]  ;;  %3900 = vmatpush.bf16.msrb.mxu3 %v6341_v0  ;;  %v6250_v40 = vld [vmem:[#allocation12 + $0x38] sm:$0xf0]  ;;  %v6225_v0 = vor.u32 %v6960_v23, %v6224_v21 }
 0x3fa   :  { %v3336_v35 = vmul.f32 %v7195_v27, %v3320_v15  ;;  %v3347_v31 = vadd.f32 %v3343_v20, %v8160_v51  ;;  %v6282_v51 = vld [vmem:[#allocation12 + $0x78] sm:$0xf0]  ;;  %v6967_v27 = vld [vmem:[#allocation12 + $0x44] sm:$0xf]  ;;  %v6258_v15 = vld [vmem:[#allocation12 + $0x48] sm:$0xf0] }
 0x3fb   :  { %7198 = vrcp.f32 %v3330_v52  ;;  %v7197_v11 = vpop.eup %7196  ;;  %v6285_v6 = vor.u32 %v6973_v24, %v6282_v51  ;;  %v6257_v52 = vor.u32 %v6968_v34, %v6256_v50  ;;  %v6261_v17 = vor.u32 %v6967_v27, %v6258_v15  ;;  %v6966_v20 = vld [vmem:[#allocation12 + $0x34] sm:$0xf0]  ;;  %v6981_v24 = vld [vmem:[#allocation12 + $0xb4] sm:$0xf]  ;;  %v6226_v50 = vld [vmem:[#allocation12 + $0x8] sm:$0xf0] }
 0x3fc   :  { %v3337_v38 = vmul.f32 %v7197_v11, %v3321_v29  ;;  %v3340_v26 = vsub.f32 %v3336_v35, %v8165_v39  ;;  %v6986_v29 = vld [vmem:[#allocation12 + $0xd4] sm:$0xf0]  ;;  %v6985_v11 = vld [vmem:[#allocation12 + $0xd4] sm:$0xf]  ;;  %v3389_v51 = vperm.slane %v8179_v36, 1 }
 0x3fd   :  { %3885 = vmatpush.bf16.msrb.mxu2 %v6285_v6  ;;  %v6329_v35 = vor.u32 %v6986_v29, %v6328_v25  ;;  %v6313_v6 = vor.u32 %v6982_v32, %v6312_v61  ;;  %v6296_v15 = vld [vmem:[#allocation12 + $0x90] sm:$0xf]  ;;  %v6977_v25 = vld [vmem:[#allocation12 + $0x94] sm:$0xf] }
 0x3fe   :  { %v3341_v28 = vsub.f32 %v3337_v38, %v8168_v62  ;;  %v3344_v49 = vmul.f32 %v3340_v26, %v3316_v2  ;;  %v6333_v38 = vor.u32 %v6985_v11, %v6330_v41  ;;  %v6249_v26 = vor.u32 %v6966_v20, %v6248_v42  ;;  %v6984_v2 = vld [vmem:[#allocation12 + $0xc4] sm:$0xf0] }
 0x400   :  { %v3345_v48 = vmul.f32 %v3341_v28, %v3317_v44  ;;  %v3348_v59 = vadd.f32 %v3344_v49, %v8165_v39  ;;  %v6990_v39 = vld [vmem:[#allocation12 + $0xf4] sm:$0xf0]  ;;  %v6965_v44 = vld [vmem:[#allocation12 + $0x34] sm:$0xf]  ;;  %v3388_v28 = vperm.slane %v8179_v36, 0  ;;  %3901 = vmatpush.bf16.msrb.mxu3 %v6333_v38 }
 0x401   :  { %v7199_v47 = vpop.eup %7198  ;;  %v6345_v10 = vor.u32 %v6990_v39, %v6344_v63  ;;  %3886 = vmatpush.bf16.msrb.mxu2 %v6277_v8  ;;  %v6962_v8 = vld [vmem:[#allocation12 + $0x14] sm:$0xf0]  ;;  %v6961_v63 = vld [vmem:[#allocation12 + $0x14] sm:$0xf] }
 0x402   :  { %v3338_v37 = vmul.f32 %v7199_v47, %v3322_v46  ;;  %v3349_v4 = vadd.f32 %v3345_v48, %v8168_v62  ;;  %v6272_v62 = vld [vmem:[#allocation12 + $0x60] sm:$0xf]  ;;  %v6253_v47 = vor.u32 %v6965_v44, %v6250_v40  ;;  %v6233_v39 = vor.u32 %v6962_v8, %v6232_v53  ;;  %v6976_v40 = vld [vmem:[#allocation12 + $0x84] sm:$0xf0] }
 0x403   :  { %v6273_v7 = vor.u32 %v6972_v30, %v6272_v62  ;;  %3871 = vmatpush.bf16.msrb.mxu1 %v6345_v10  ;;  %v6320_v48 = vld [vmem:[#allocation12 + $0xc0] sm:$0xf]  ;;  %v6314_v62 = vld [vmem:[#allocation12 + $0xb8] sm:$0xf0]  ;;  %v6237_v19 = vor.u32 %v6961_v63, %v6234_v9 }
 0x404   :  { %v3342_v33 = vsub.f32 %v3338_v37, %v3301_v16  ;;  %v3385_v57 = vpack.c.bf16 %v3349_v4, %v3347_v31  ;;  %v6983_v37 = vld [vmem:[#allocation12 + $0xc4] sm:$0xf]  ;;  %v6321_v31 = vor.u32 %v6984_v2, %v6320_v48  ;;  %v6322_v4 = vld [vmem:[#allocation12 + $0xc8] sm:$0xf0] }
 0x405   :  { %3858 = vmatpush.bf16.msrb.mxu0 %v6273_v7  ;;  %3887 = vmatpush.bf16.msrb.mxu2 %v6269_v56  ;;  %v6325_v49 = vor.u32 %v6983_v37, %v6322_v4  ;;  %v6317_v7 = vor.u32 %v6981_v24, %v6314_v62  ;;  %v6975_v48 = vld [vmem:[#allocation12 + $0x84] sm:$0xf]  ;;  %v6290_v2 = vld [vmem:[#allocation12 + $0x88] sm:$0xf0] }
 0x406   :  { %v3346_v54 = vmul.f32 %v3342_v33, %v3318_v18  ;;  %3560 = vmatmul.bf16.vlgmr.msra.gmra.mxu0 %v3385_v57  ;;  %3588 = vmatmul.bf16.vlgmr.msra.gmra.mxu2 %v3385_v57  ;;  %v6240_v18 = vld [vmem:[#allocation12 + $0x20] sm:$0xf]  ;;  %v6964_v33 = vld [vmem:[#allocation12 + $0x24] sm:$0xf0]  ;;  %v6963_v57 = vld [vmem:[#allocation12 + $0x24] sm:$0xf] }
 0x407   :  { %3872 = vmatpush.bf16.msrb.mxu1 %v6337_v43  ;;  %3902 = vmatpush.bf16.msrb.mxu3 %v6325_v49  ;;  %v6959_v43 = vld [vmem:[#allocation12 + $0x4] sm:$0xf] }
 0x408   :  { %v3350_v1 = vadd.f32 %v3346_v54, %v3301_v16  ;;  %v6970_v16 = vld [vmem:[#allocation12 + $0x54] sm:$0xf0]  ;;  %v6241_v54 = vor.u32 %v6964_v33, %v6240_v18 }
 0x409   :  { %v6265_v12 = vor.u32 %v6970_v16, %v6264_v3  ;;  %3888 = vmatpush.bf16.msrb.mxu2 %v6261_v17  ;;  %v6980_v3 = vld [vmem:[#allocation12 + $0xa4] sm:$0xf0]  ;;  %v6978_v17 = vld [vmem:[#allocation12 + $0x94] sm:$0xf0] }
 0x40a   :  { %v3386_v5 = vpack.c.bf16 %v3350_v1, %v3348_v59  ;;  %v6242_v59 = vld [vmem:[#allocation12 + $0x28] sm:$0xf0]  ;;  %v6305_v58 = vor.u32 %v6980_v3, %v6304_v55  ;;  %v6297_v11 = vor.u32 %v6978_v17, %v6296_v15 }
 0x40b   :  { %3859 = vmatpush.bf16.msrb.mxu0 %v6265_v12  ;;  %3873 = vmatpush.bf16.msrb.mxu1 %v6329_v35  ;;  %v6979_v12 = vld [vmem:[#allocation12 + $0xa4] sm:$0xf]  ;;  %v6298_v35 = vld [vmem:[#allocation12 + $0x98] sm:$0xf0] }
 0x40c   :  { %3574 = vmatmul.bf16.vlgmr.msra.gmra.mxu1 %v3386_v5  ;;  %3602 = vmatmul.bf16.vlgmr.msra.gmra.mxu3 %v3386_v5  ;;  %v6245_v5 = vor.u32 %v6963_v57, %v6242_v59  ;;  %v6309_v14 = vor.u32 %v6979_v12, %v6306_v13  ;;  %v6301_v42 = vor.u32 %v6977_v25, %v6298_v35  ;;  %v6998_v35 = vld [vmem:[#allocation13 + $0x38] sm:$0xff] }
 0x40d   :  { %3889 = vmatpush.bf16.msrb.mxu2 %v6253_v47  ;;  %3903 = vmatpush.bf16.msrb.mxu3 %v6317_v7 }
 0x40f   :  { %3860 = vmatpush.bf16.msrb.mxu0 %v6257_v52  ;;  %3874 = vmatpush.bf16.msrb.mxu1 %v6321_v31  ;;  %v6229_v52 = vor.u32 %v6959_v43, %v6226_v50  ;;  %v6293_v31 = vor.u32 %v6975_v48, %v6290_v2 }
 0x411   :  { %3890 = vmatpush.bf16.msrb.mxu2 %v6245_v5  ;;  %3904 = vmatpush.bf16.msrb.mxu3 %v6309_v14 }
 0x413   :  { %3861 = vmatpush.bf16.msrb.mxu0 %v6249_v26  ;;  %3875 = vmatpush.bf16.msrb.mxu1 %v6313_v6  ;;  %v6288_v26 = vld [vmem:[#allocation12 + $0x80] sm:$0xf] }
 0x414   :  { %v6289_v47 = vor.u32 %v6976_v40, %v6288_v26 }
 0x415   :  { %3891 = vmatpush.bf16.msrb.mxu2 %v6237_v19  ;;  %3905 = vmatpush.bf16.msrb.mxu3 %v6301_v42  ;;  %v7005_v42 = vld [vmem:[#allocation13 + $0x70] sm:$0xff] }
 0x417   :  { %3862 = vmatpush.bf16.msrb.mxu0 %v6241_v54  ;;  %3876 = vmatpush.bf16.msrb.mxu1 %v6305_v58 }
 0x419   :  { %3892 = vmatpush.bf16.msrb.mxu2 %v6229_v52  ;;  %3906 = vmatpush.bf16.msrb.mxu3 %v6293_v31 }
 0x41b   :  { %3863 = vmatpush.bf16.msrb.mxu0 %v6233_v39  ;;  %3877 = vmatpush.bf16.msrb.mxu1 %v6297_v11 }
 0x41f   :  { %3864 = vmatpush.bf16.msrb.mxu0 %v6225_v0  ;;  %3878 = vmatpush.bf16.msrb.mxu1 %v6289_v47  ;;  %v6993_v47 = vld [vmem:[#allocation13 + $0x10] sm:$0xff] }
 0x423   :  { %4096 = vmatpush.bf16.msra.mxu0 %v6998_v35 }
 0x483   :  { %v3561_v46 = vpop.f32.mrf.mxu0 }
 0x484   :  { %v3562_v1 = vadd.f32 %v3561_v46, %v3388_v28 }
 0x489   :  { %v3575_v60 = vpop.f32.mrf.mxu1  ;;  %v3589_v22 = vpop.f32.mrf.mxu2 }
 0x48a   :  { %v8185_v30 = vadd.f32 %v3575_v60, %v3562_v1  ;;  %v3590_v56 = vadd.f32 %v3589_v22, %v3389_v51 }
 0x48b   :  { %v3563_v16 = vpop.f32.mrf.mxu0 }
 0x48c   :  { %v3608_v10 = vmul.f32 0.5, %v8185_v30  ;;  %v3564_v34 = vadd.f32 %v3563_v16, %v3388_v28 }
 0x48e   :  { %7200 = vtanh.f32 %v3608_v10 }
 0x48f   :  { %v3603_v45 = vpop.f32.mrf.mxu3 }
 0x490   :  { %v8192_v27 = vadd.f32 %v3603_v45, %v3590_v56 }
 0x491   :  { %v3577_v29 = vpop.f32.mrf.mxu1  ;;  %v3591_v20 = vpop.f32.mrf.mxu2 }
 0x492   :  { %v3609_v41 = vmul.f32 0.5, %v8192_v27  ;;  %v8195_v38 = vadd.f32 %v3577_v29, %v3564_v34  ;;  %v3592_v37 = vadd.f32 %v3591_v20, %v3389_v51  ;;  %v6995_v20 = vld [vmem:[#allocation13 + $0x20] sm:$0xff] }
 0x494   :  { %v7201_v44 = vpop.eup %7200  ;;  %7202 = vtanh.f32 %v3609_v41  ;;  %v3610_v28 = vmul.f32 0.5, %v8195_v38  ;;  %v6997_v41 = vld [vmem:[#allocation13 + $0x30] sm:$0xff] }
 0x495   :  { %v3628_v46 = vmul.f32 %v7201_v44, %v7201_v44  ;;  %v3624_v24 = vmul.f32 2.0, %v7201_v44  ;;  %v3616_v62 = vadd.f32 1.0, %v7201_v44  ;;  %4097 = vmatpush.bf16.msra.mxu0 %v6997_v41  ;;  %v3689_v44 = vld [vmem:[#allocation24 + $0x6] ss:$8 sm:$0xf] }
 0x496   :  { %7204 = vtanh.f32 %v3610_v28  ;;  %v7004_v28 = vld [vmem:[#allocation13 + $0x68] sm:$0xff]  ;;  %v3693_v26 = vperm.slane %v3689_v44, 0 }
 0x497   :  { %v3632_v4 = vadd.f32 1.0, %v3628_v46  ;;  %v3605_v49 = vpop.f32.mrf.mxu3  ;;  %v3620_v10 = vmul.f32 0.5, %v3616_v62  ;;  %v7003_v46 = vld [vmem:[#allocation13 + $0x60] sm:$0xff] }
 0x498   :  { %v3606_v18 = vadd.f32 %v3605_v49, %v3592_v37  ;;  %v7002_v37 = vld [vmem:[#allocation13 + $0x58] sm:$0xff] }
 0x499   :  { %7206 = vrcp.f32 %v3632_v4  ;;  %v3694_v4 = vperm.slane %v3689_v44, 1 }
 0x49a   :  { %v7203_v33 = vpop.eup %7202  ;;  %v3611_v57 = vmul.f32 0.5, %v3606_v18 }
 0x49b   :  { %v3629_v54 = vmul.f32 %v7203_v33, %v7203_v33  ;;  %v3625_v7 = vmul.f32 2.0, %v7203_v33  ;;  %v3617_v55 = vadd.f32 1.0, %v7203_v33 }
 0x49c   :  { %v7205_v59 = vpop.eup %7204  ;;  %7208 = vtanh.f32 %v3611_v57 }
 0x49d   :  { %v3633_v1 = vadd.f32 1.0, %v3629_v54  ;;  %v3630_v5 = vmul.f32 %v7205_v59, %v7205_v59  ;;  %v3618_v8 = vadd.f32 1.0, %v7205_v59  ;;  %v3626_v63 = vmul.f32 2.0, %v7205_v59  ;;  %v7001_v54 = vld [vmem:[#allocation13 + $0x50] sm:$0xff] }
 0x49e   :  { %v3621_v23 = vmul.f32 0.5, %v3617_v55 }
 0x49f   :  { %7210 = vrcp.f32 %v3633_v1  ;;  %v7207_v61 = vpop.eup %7206  ;;  %v3634_v32 = vadd.f32 1.0, %v3630_v5  ;;  %v3622_v16 = vmul.f32 0.5, %v3618_v8  ;;  %v6991_v5 = vld [vmem:[#allocation13] sm:$0xff] }
 0x4a0   :  { %v3640_v60 = vmul.f32 %v7207_v61, %v3624_v24 }
 0x4a1   :  { %7212 = vrcp.f32 %v3634_v32 }
 0x4a2   :  { %v7209_v36 = vpop.eup %7208  ;;  %v3644_v53 = vsub.f32 %v3640_v60, %v8185_v30 }
 0x4a3   :  { %v3631_v51 = vmul.f32 %v7209_v36, %v7209_v36  ;;  %v3619_v13 = vadd.f32 1.0, %v7209_v36  ;;  %v3627_v56 = vmul.f32 2.0, %v7209_v36  ;;  %v7000_v36 = vld [vmem:[#allocation13 + $0x48] sm:$0xff] }
 0x4a4   :  { %v3648_v3 = vmul.f32 %v3644_v53, %v3620_v10  ;;  %v6999_v53 = vld [vmem:[#allocation13 + $0x40] sm:$0xff] }
 0x4a5   :  { %v7211_v6 = vpop.eup %7210  ;;  %v3635_v22 = vadd.f32 1.0, %v3631_v51  ;;  %v3623_v34 = vmul.f32 0.5, %v3619_v13 }
 0x4a6   :  { %v3641_v9 = vmul.f32 %v7211_v6, %v3625_v7  ;;  %v3652_v45 = vadd.f32 %v3648_v3, %v8185_v30  ;;  %v7006_v30 = vld [vmem:[#allocation13 + $0x78] sm:$0xff] }
 0x4a7   :  { %7214 = vrcp.f32 %v3635_v22  ;;  %v7213_v39 = vpop.eup %7212  ;;  %4110 = vmatpush.bf16.msra.mxu1 %v7006_v30 }
 0x4a8   :  { %v3642_v19 = vmul.f32 %v7213_v39, %v3626_v63  ;;  %v3645_v12 = vsub.f32 %v3641_v9, %v8192_v27 }
 0x4aa   :  { %v3646_v58 = vsub.f32 %v3642_v19, %v8195_v38  ;;  %v3649_v50 = vmul.f32 %v3645_v12, %v3621_v23 }
 0x4ab   :  { %4111 = vmatpush.bf16.msra.mxu1 %v7005_v42 }
 0x4ac   :  { %v3650_v21 = vmul.f32 %v3646_v58, %v3622_v16  ;;  %v3653_v25 = vadd.f32 %v3649_v50, %v8192_v27  ;;  %v6994_v27 = vld [vmem:[#allocation13 + $0x18] sm:$0xff] }
 0x4ad   :  { %v7215_v14 = vpop.eup %7214 }
 0x4ae   :  { %v3643_v43 = vmul.f32 %v7215_v14, %v3627_v56  ;;  %v3654_v0 = vadd.f32 %v3650_v21, %v8195_v38  ;;  %v6996_v38 = vld [vmem:[#allocation13 + $0x28] sm:$0xff] }
 0x4af   :  { %4098 = vmatpush.bf16.msra.mxu0 %v6996_v38  ;;  %4112 = vmatpush.bf16.msra.mxu1 %v7004_v28 }
 0x4b0   :  { %v3647_v52 = vsub.f32 %v3643_v43, %v3606_v18  ;;  %v3690_v15 = vpack.c.bf16 %v3654_v0, %v3652_v45 }
 0x4b2   :  { %v3651_v17 = vmul.f32 %v3647_v52, %v3623_v34  ;;  %3865 = vmatmul.bf16.vlgmr.msrb.gmra.mxu0 %v3690_v15  ;;  %3893 = vmatmul.bf16.vlgmr.msrb.gmra.mxu2 %v3690_v15 }
 0x4b3   :  { %4099 = vmatpush.bf16.msra.mxu0 %v6995_v20  ;;  %4113 = vmatpush.bf16.msra.mxu1 %v7003_v46 }
 0x4b4   :  { %v3655_v29 = vadd.f32 %v3651_v17, %v3606_v18  ;;  %v6992_v18 = vld [vmem:[#allocation13 + $0x8] sm:$0xff] }
 0x4b6   :  { %v3691_v11 = vpack.c.bf16 %v3655_v29, %v3653_v25 }
 0x4b7   :  { %4100 = vmatpush.bf16.msra.mxu0 %v6994_v27  ;;  %4114 = vmatpush.bf16.msra.mxu1 %v7002_v37 }
 0x4b8   :  { %3879 = vmatmul.bf16.vlgmr.msrb.gmra.mxu1 %v3691_v11  ;;  %3907 = vmatmul.bf16.vlgmr.msrb.gmra.mxu3 %v3691_v11 }
 0x4bb   :  { %4101 = vmatpush.bf16.msra.mxu0 %v6993_v47  ;;  %4115 = vmatpush.bf16.msra.mxu1 %v7001_v54  ;;  %v7014_v54 = vld [vmem:[#allocation15 + $0x38] sm:$0xff] }
 0x4bc   :  { %4218 = vmatpush.bf16.msra.mxu2 %v7014_v54 }
 0x4bf   :  { %4102 = vmatpush.bf16.msra.mxu0 %v6992_v18  ;;  %4116 = vmatpush.bf16.msra.mxu1 %v7000_v36 }
 0x4c3   :  { %4103 = vmatpush.bf16.msra.mxu0 %v6991_v5  ;;  %4117 = vmatpush.bf16.msra.mxu1 %v6999_v53  ;;  %v7011_v5 = vld [vmem:[#allocation15 + $0x20] sm:$0xff] }
 0x4c4   :  { %v7007_v53 = vld [vmem:[#allocation15] sm:$0xff] }
 0x52f   :  { %v3866_v40 = vpop.f32.mrf.mxu0 }
 0x530   :  { %v3867_v48 = vadd.f32 %v3866_v40, %v3693_v26 }
 0x535   :  { %v3880_v2 = vpop.f32.mrf.mxu1  ;;  %v3894_v49 = vpop.f32.mrf.mxu2 }
 0x536   :  { %v8206_v31 = vadd.f32 %v3880_v2, %v3867_v48  ;;  %v3895_v59 = vadd.f32 %v3894_v49, %v3694_v4 }
 0x537   :  { %v3868_v57 = vpop.f32.mrf.mxu0 }
 0x538   :  { %v3913_v33 = vmul.f32 0.5, %v8206_v31  ;;  %v3869_v61 = vadd.f32 %v3868_v57, %v3693_v26 }
 0x53a   :  { %7216 = vtanh.f32 %v3913_v33 }
 0x53b   :  { %v3908_v1 = vpop.f32.mrf.mxu3 }
 0x53c   :  { %v8209_v32 = vadd.f32 %v3908_v1, %v3895_v59  ;;  %v7013_v59 = vld [vmem:[#allocation15 + $0x30] sm:$0xff]  ;;  %v7012_v1 = vld [vmem:[#allocation15 + $0x28] sm:$0xff] }
 0x53d   :  { %v3882_v24 = vpop.f32.mrf.mxu1  ;;  %v3896_v6 = vpop.f32.mrf.mxu2  ;;  %4219 = vmatpush.bf16.msra.mxu2 %v7013_v59 }
 0x53e   :  { %v3914_v60 = vmul.f32 0.5, %v8209_v32  ;;  %v3883_v51 = vadd.f32 %v3882_v24, %v3869_v61  ;;  %v3897_v8 = vadd.f32 %v3896_v6, %v3694_v4  ;;  %v7010_v61 = vld [vmem:[#allocation15 + $0x18] sm:$0xff] }
 0x540   :  { %v7217_v62 = vpop.eup %7216  ;;  %7218 = vtanh.f32 %v3914_v60  ;;  %v3915_v22 = vmul.f32 0.5, %v3883_v51  ;;  %v7009_v60 = vld [vmem:[#allocation15 + $0x10] sm:$0xff] }
 0x541   :  { %v3933_v7 = vmul.f32 %v7217_v62, %v7217_v62  ;;  %v3929_v56 = vmul.f32 2.0, %v7217_v62  ;;  %v3921_v45 = vadd.f32 1.0, %v7217_v62  ;;  %4220 = vmatpush.bf16.msra.mxu2 %v7012_v1  ;;  %v7008_v62 = vld [vmem:[#allocation15 + $0x8] sm:$0xff] }
 0x542   :  { %7220 = vtanh.f32 %v3915_v22 }
 0x543   :  { %v3937_v63 = vadd.f32 1.0, %v3933_v7  ;;  %v3910_v39 = vpop.f32.mrf.mxu3  ;;  %v3925_v29 = vmul.f32 0.5, %v3921_v45 }
 0x544   :  { %v3911_v9 = vadd.f32 %v3910_v39, %v3897_v8 }
 0x545   :  { %7222 = vrcp.f32 %v3937_v63  ;;  %4221 = vmatpush.bf16.msra.mxu2 %v7011_v5 }
 0x546   :  { %v7219_v10 = vpop.eup %7218  ;;  %v3916_v19 = vmul.f32 0.5, %v3911_v9 }
 0x547   :  { %v3934_v55 = vmul.f32 %v7219_v10, %v7219_v10  ;;  %v3930_v50 = vmul.f32 2.0, %v7219_v10  ;;  %v3922_v35 = vadd.f32 1.0, %v7219_v10 }
 0x548   :  { %v7221_v3 = vpop.eup %7220  ;;  %7224 = vtanh.f32 %v3916_v19 }
 0x549   :  { %v3938_v16 = vadd.f32 1.0, %v3934_v55  ;;  %v3935_v58 = vmul.f32 %v7221_v3, %v7221_v3  ;;  %v3923_v52 = vadd.f32 1.0, %v7221_v3  ;;  %v3931_v15 = vmul.f32 2.0, %v7221_v3  ;;  %4222 = vmatpush.bf16.msra.mxu2 %v7010_v61 }
 0x54a   :  { %v3926_v26 = vmul.f32 0.5, %v3922_v35  ;;  %v7022_v35 = vld [vmem:[#allocation16 + $0x38] sm:$0xff] }
 0x54b   :  { %7226 = vrcp.f32 %v3938_v16  ;;  %v7223_v12 = vpop.eup %7222  ;;  %v3939_v13 = vadd.f32 1.0, %v3935_v58  ;;  %v3927_v30 = vmul.f32 0.5, %v3923_v52  ;;  %4326 = vmatpush.bf16.msra.mxu3 %v7022_v35 }
 0x54c   :  { %v3945_v21 = vmul.f32 %v7223_v12, %v3929_v56 }
 0x54d   :  { %7228 = vrcp.f32 %v3939_v13  ;;  %4223 = vmatpush.bf16.msra.mxu2 %v7009_v60 }
 0x54e   :  { %v7225_v14 = vpop.eup %7224  ;;  %v3949_v34 = vsub.f32 %v3945_v21, %v8206_v31 }
 0x54f   :  { %v3936_v23 = vmul.f32 %v7225_v14, %v7225_v14  ;;  %v3924_v20 = vadd.f32 1.0, %v7225_v14  ;;  %v3932_v44 = vmul.f32 2.0, %v7225_v14 }
 0x550   :  { %v3953_v41 = vmul.f32 %v3949_v34, %v3925_v29 }
 0x551   :  { %v7227_v43 = vpop.eup %7226  ;;  %v3940_v0 = vadd.f32 1.0, %v3936_v23  ;;  %v3928_v2 = vmul.f32 0.5, %v3924_v20  ;;  %4224 = vmatpush.bf16.msra.mxu2 %v7008_v62  ;;  %v7018_v20 = vld [vmem:[#allocation16 + $0x18] sm:$0xff] }
 0x552   :  { %v3946_v25 = vmul.f32 %v7227_v43, %v3930_v50  ;;  %v3957_v46 = vadd.f32 %v3953_v41, %v8206_v31  ;;  %v3994_v31 = vld [vmem:[#allocation24 + $0x7] ss:$8 sm:$0xf] }
 0x553   :  { %7230 = vrcp.f32 %v3940_v0  ;;  %v7229_v17 = vpop.eup %7228  ;;  %v3998_v24 = vperm.slane %v3994_v31, 0  ;;  %v7021_v41 = vld [vmem:[#allocation16 + $0x30] sm:$0xff] }
 0x554   :  { %v3947_v11 = vmul.f32 %v7229_v17, %v3931_v15  ;;  %v3950_v42 = vsub.f32 %v3946_v25, %v8209_v32  ;;  %4327 = vmatpush.bf16.msra.mxu3 %v7021_v41 }
 0x555   :  { %4225 = vmatpush.bf16.msra.mxu2 %v7007_v53 }
 0x556   :  { %v3951_v38 = vsub.f32 %v3947_v11, %v3883_v51  ;;  %v3954_v48 = vmul.f32 %v3950_v42, %v3926_v26  ;;  %v4165_v42 = vld [vmem:[#allocation24 + $0x20] ss:$8 sm:$0xf] }
 0x558   :  { %v3955_v27 = vmul.f32 %v3951_v38, %v3927_v30  ;;  %v3958_v18 = vadd.f32 %v3954_v48, %v8209_v32  ;;  %v7020_v30 = vld [vmem:[#allocation16 + $0x28] sm:$0xff]  ;;  %v7019_v38 = vld [vmem:[#allocation16 + $0x20] sm:$0xff] }
 0x559   :  { %v7231_v28 = vpop.eup %7230  ;;  %4328 = vmatpush.bf16.msra.mxu3 %v7020_v30 }
 0x55a   :  { %v3948_v40 = vmul.f32 %v7231_v28, %v3932_v44  ;;  %v3959_v47 = vadd.f32 %v3955_v27, %v3883_v51  ;;  %v4168_v44 = vperm.slane %v4165_v42, 0  ;;  %v7017_v28 = vld [vmem:[#allocation16 + $0x10] sm:$0xff] }
 0x55c   :  { %v3952_v37 = vsub.f32 %v3948_v40, %v3911_v9  ;;  %v3995_v4 = vpack.c.bf16 %v3959_v47, %v3957_v46  ;;  %v7016_v40 = vld [vmem:[#allocation16 + $0x8] sm:$0xff]  ;;  %v7015_v47 = vld [vmem:[#allocation16] sm:$0xff] }
 0x55d   :  { %4329 = vmatpush.bf16.msra.mxu3 %v7019_v38 }
 0x55e   :  { %v3956_v49 = vmul.f32 %v3952_v37, %v3928_v2  ;;  %4104 = vmatmul.bf16.vlgmr.msra.gmra.mxu0 %v3995_v4 }
 0x560   :  { %v3960_v33 = vadd.f32 %v3956_v49, %v3911_v9 }
 0x561   :  { %4330 = vmatpush.bf16.msra.mxu3 %v7018_v20 }
 0x562   :  { %v3996_v57 = vpack.c.bf16 %v3960_v33, %v3958_v18 }
 0x564   :  { %4118 = vmatmul.bf16.vlgmr.msra.gmra.mxu1 %v3996_v57 }
 0x565   :  { %4331 = vmatpush.bf16.msra.mxu3 %v7017_v28 }
 0x569   :  { %4332 = vmatpush.bf16.msra.mxu3 %v7016_v40 }
 0x56d   :  { %4333 = vmatpush.bf16.msra.mxu3 %v7015_v47 }
 0x5db   :  { %v4105_v36 = vpop.f32.mrf.mxu0 }
 0x5dc   :  { %v4106_v51 = vadd.f32 %v4105_v36, %v3998_v24 }
 0x5e1   :  { %v4119_v6 = vpop.f32.mrf.mxu1 }
 0x5e2   :  { %v4120_v32 = vadd.f32 %v4119_v6, %v4106_v51 }
 0x5e3   :  { %v4107_v7 = vpop.f32.mrf.mxu0 }
 0x5e4   :  { %v4124_v22 = vmul.f32 0.5, %v4120_v32  ;;  %v4108_v8 = vadd.f32 %v4107_v7, %v3998_v24 }
 0x5e6   :  { %7232 = vtanh.f32 %v4124_v22 }
 0x5e9   :  { %v4121_v63 = vpop.f32.mrf.mxu1 }
 0x5ea   :  { %v4122_v39 = vadd.f32 %v4121_v63, %v4108_v8 }
 0x5ec   :  { %v7233_v9 = vpop.eup %7232  ;;  %v4125_v10 = vmul.f32 0.5, %v4122_v39 }
 0x5ed   :  { %v4134_v19 = vmul.f32 %v7233_v9, %v7233_v9  ;;  %v4132_v13 = vmul.f32 2.0, %v7233_v9  ;;  %v4128_v14 = vadd.f32 1.0, %v7233_v9  ;;  %v7029_v9 = vld [vmem:[#allocation18 + $0x30] sm:$0xff] }
 0x5ee   :  { %7234 = vtanh.f32 %v4125_v10  ;;  %v7028_v10 = vld [vmem:[#allocation18 + $0x28] sm:$0xff] }
 0x5ef   :  { %v4136_v55 = vadd.f32 1.0, %v4134_v19  ;;  %v4130_v0 = vmul.f32 0.5, %v4128_v14  ;;  %v7027_v19 = vld [vmem:[#allocation18 + $0x20] sm:$0xff] }
 0x5f1   :  { %7236 = vrcp.f32 %v4136_v55  ;;  %v4273_v55 = vld [vmem:[#allocation24 + $0x21] ss:$8 sm:$0xf] }
 0x5f4   :  { %v7235_v3 = vpop.eup %7234 }
 0x5f5   :  { %v4135_v16 = vmul.f32 %v7235_v3, %v7235_v3  ;;  %v4129_v23 = vadd.f32 1.0, %v7235_v3  ;;  %v4133_v43 = vmul.f32 2.0, %v7235_v3  ;;  %v7026_v3 = vld [vmem:[#allocation18 + $0x18] sm:$0xff] }
 0x5f7   :  { %v7237_v58 = vpop.eup %7236  ;;  %v4137_v12 = vadd.f32 1.0, %v4135_v16  ;;  %v4131_v52 = vmul.f32 0.5, %v4129_v23  ;;  %v4276_v16 = vperm.slane %v4273_v55, 0 }
 0x5f8   :  { %v4140_v56 = vmul.f32 %v7237_v58, %v4132_v13  ;;  %v7025_v58 = vld [vmem:[#allocation18 + $0x10] sm:$0xff] }
 0x5f9   :  { %7238 = vrcp.f32 %v4137_v12 }
 0x5fa   :  { %v4142_v21 = vsub.f32 %v4140_v56, %v4120_v32  ;;  %v7024_v56 = vld [vmem:[#allocation18 + $0x8] sm:$0xff] }
 0x5fc   :  { %v4144_v34 = vmul.f32 %v4142_v21, %v4130_v0  ;;  %v7023_v21 = vld [vmem:[#allocation18] sm:$0xff] }
 0x5fe   :  { %v4146_v25 = vadd.f32 %v4144_v34, %v4120_v32 }
 0x5ff   :  { %v7239_v45 = vpop.eup %7238 }
 0x600   :  { %v4141_v50 = vmul.f32 %v7239_v45, %v4133_v43 }
 0x602   :  { %v4143_v15 = vsub.f32 %v4141_v50, %v4122_v39 }
 0x604   :  { %v4145_v17 = vmul.f32 %v4143_v15, %v4131_v52 }
 0x606   :  { %v4147_v29 = vadd.f32 %v4145_v17, %v4122_v39  ;;  %v7030_v39 = vld [vmem:[#allocation18 + $0x38] sm:$0xff] }
 0x607   :  { %4434 = vmatpush.bf16.msrb.mxu0 %v7030_v39 }
 0x608   :  { %v4166_v11 = vpack.c.bf16 %v4147_v29, %v4146_v25 }
 0x60a   :  { %4226 = vmatmul.bf16.vlgmr.msra.gmra.mxu2 %v4166_v11 }
 0x60b   :  { %4435 = vmatpush.bf16.msrb.mxu0 %v7029_v9 }
 0x60f   :  { %4436 = vmatpush.bf16.msrb.mxu0 %v7028_v10 }
 0x613   :  { %4437 = vmatpush.bf16.msrb.mxu0 %v7027_v19 }
 0x617   :  { %4438 = vmatpush.bf16.msrb.mxu0 %v7026_v3 }
 0x61b   :  { %4439 = vmatpush.bf16.msrb.mxu0 %v7025_v58 }
 0x61f   :  { %4440 = vmatpush.bf16.msrb.mxu0 %v7024_v56 }
 0x623   :  { %4441 = vmatpush.bf16.msrb.mxu0 %v7023_v21 }
 0x68d   :  { %v4227_v27 = vpop.f32.mrf.mxu2 }
 0x68e   :  { %v4228_v26 = vadd.f32 %v4227_v27, %v4168_v44 }
 0x690   :  { %v4232_v46 = vmul.f32 0.5, %v4228_v26 }
 0x692   :  { %7240 = vtanh.f32 %v4232_v46 }
 0x695   :  { %v4229_v48 = vpop.f32.mrf.mxu2 }
 0x696   :  { %v4230_v2 = vadd.f32 %v4229_v48, %v4168_v44 }
 0x698   :  { %v7241_v37 = vpop.eup %7240  ;;  %v4233_v4 = vmul.f32 0.5, %v4230_v2 }
 0x699   :  { %v4242_v49 = vmul.f32 %v7241_v37, %v7241_v37  ;;  %v4240_v1 = vmul.f32 2.0, %v7241_v37  ;;  %v4236_v31 = vadd.f32 1.0, %v7241_v37  ;;  %v7037_v37 = vld [vmem:[#allocation19 + $0x30] sm:$0xff] }
 0x69a   :  { %7242 = vtanh.f32 %v4233_v4  ;;  %v7036_v4 = vld [vmem:[#allocation19 + $0x28] sm:$0xff] }
 0x69b   :  { %v4244_v18 = vadd.f32 1.0, %v4242_v49  ;;  %v4238_v51 = vmul.f32 0.5, %v4236_v31  ;;  %v7035_v49 = vld [vmem:[#allocation19 + $0x20] sm:$0xff] }
 0x69d   :  { %7244 = vrcp.f32 %v4244_v18  ;;  %v4381_v18 = vld [vmem:[#allocation24 + $0x22] ss:$8 sm:$0xf] }
 0x6a0   :  { %v7243_v33 = vpop.eup %7242 }
 0x6a1   :  { %v4243_v57 = vmul.f32 %v7243_v33, %v7243_v33  ;;  %v4237_v24 = vadd.f32 1.0, %v7243_v33  ;;  %v4241_v36 = vmul.f32 2.0, %v7243_v33  ;;  %v7034_v33 = vld [vmem:[#allocation19 + $0x18] sm:$0xff] }
 0x6a3   :  { %v7245_v54 = vpop.eup %7244  ;;  %v4245_v59 = vadd.f32 1.0, %v4243_v57  ;;  %v4239_v62 = vmul.f32 0.5, %v4237_v24  ;;  %v4384_v57 = vperm.slane %v4381_v18, 0 }
 0x6a4   :  { %v4248_v5 = vmul.f32 %v7245_v54, %v4240_v1  ;;  %v7033_v54 = vld [vmem:[#allocation19 + $0x10] sm:$0xff] }
 0x6a5   :  { %7246 = vrcp.f32 %v4245_v59 }
 0x6a6   :  { %v4250_v61 = vsub.f32 %v4248_v5, %v4228_v26  ;;  %v7032_v5 = vld [vmem:[#allocation19 + $0x8] sm:$0xff] }
 0x6a8   :  { %v4252_v32 = vmul.f32 %v4250_v61, %v4238_v51  ;;  %v7031_v61 = vld [vmem:[#allocation19] sm:$0xff] }
 0x6aa   :  { %v4254_v53 = vadd.f32 %v4252_v32, %v4228_v26 }
 0x6ab   :  { %v7247_v60 = vpop.eup %7246 }
 0x6ac   :  { %v4249_v6 = vmul.f32 %v7247_v60, %v4241_v36 }
 0x6ae   :  { %v4251_v22 = vsub.f32 %v4249_v6, %v4230_v2 }
 0x6b0   :  { %v4253_v7 = vmul.f32 %v4251_v22, %v4239_v62 }
 0x6b2   :  { %v4255_v8 = vadd.f32 %v4253_v7, %v4230_v2  ;;  %v7038_v2 = vld [vmem:[#allocation19 + $0x38] sm:$0xff] }
 0x6b3   :  { %4542 = vmatpush.bf16.msrb.mxu1 %v7038_v2 }
 0x6b4   :  { %v4274_v63 = vpack.c.bf16 %v4255_v8, %v4254_v53 }
 0x6b6   :  { %4334 = vmatmul.bf16.vlgmr.msra.gmra.mxu3 %v4274_v63 }
 0x6b7   :  { %4543 = vmatpush.bf16.msrb.mxu1 %v7037_v37 }
 0x6bb   :  { %4544 = vmatpush.bf16.msrb.mxu1 %v7036_v4 }
 0x6bf   :  { %4545 = vmatpush.bf16.msrb.mxu1 %v7035_v49 }
 0x6c3   :  { %4546 = vmatpush.bf16.msrb.mxu1 %v7034_v33 }
 0x6c7   :  { %4547 = vmatpush.bf16.msrb.mxu1 %v7033_v54 }
 0x6cb   :  { %4548 = vmatpush.bf16.msrb.mxu1 %v7032_v5 }
 0x6cf   :  { %4549 = vmatpush.bf16.msrb.mxu1 %v7031_v61 }
 0x739   :  { %v4335_v12 = vpop.f32.mrf.mxu3 }
 0x73a   :  { %v4336_v13 = vadd.f32 %v4335_v12, %v4276_v16 }
 0x73c   :  { %v4340_v14 = vmul.f32 0.5, %v4336_v13 }
 0x73e   :  { %7248 = vtanh.f32 %v4340_v14 }
 0x741   :  { %v4337_v23 = vpop.f32.mrf.mxu3 }
 0x742   :  { %v4338_v43 = vadd.f32 %v4337_v23, %v4276_v16 }
 0x744   :  { %v7249_v45 = vpop.eup %7248  ;;  %v4341_v0 = vmul.f32 0.5, %v4338_v43 }
 0x745   :  { %v4350_v50 = vmul.f32 %v7249_v45, %v7249_v45  ;;  %v4348_v29 = vmul.f32 2.0, %v7249_v45  ;;  %v4344_v35 = vadd.f32 1.0, %v7249_v45  ;;  %v7045_v45 = vld [vmem:[#allocation21 + $0x30] sm:$0xff] }
 0x746   :  { %7250 = vtanh.f32 %v4341_v0  ;;  %v7044_v0 = vld [vmem:[#allocation21 + $0x28] sm:$0xff] }
 0x747   :  { %v4352_v34 = vadd.f32 1.0, %v4350_v50  ;;  %v4346_v20 = vmul.f32 0.5, %v4344_v35  ;;  %v7043_v50 = vld [vmem:[#allocation21 + $0x20] sm:$0xff] }
 0x749   :  { %7252 = vrcp.f32 %v4352_v34  ;;  %v4489_v34 = vld [vmem:[#allocation24 + $0x23] ss:$8 sm:$0xf] }
 0x74c   :  { %v7251_v52 = vpop.eup %7250 }
 0x74d   :  { %v4351_v15 = vmul.f32 %v7251_v52, %v7251_v52  ;;  %v4345_v30 = vadd.f32 1.0, %v7251_v52  ;;  %v4349_v38 = vmul.f32 2.0, %v7251_v52  ;;  %v7042_v52 = vld [vmem:[#allocation21 + $0x18] sm:$0xff] }
 0x74f   :  { %v7253_v17 = vpop.eup %7252  ;;  %v4353_v25 = vadd.f32 1.0, %v4351_v15  ;;  %v4347_v27 = vmul.f32 0.5, %v4345_v30  ;;  %v4492_v15 = vperm.slane %v4489_v34, 0 }
 0x750   :  { %v4356_v11 = vmul.f32 %v7253_v17, %v4348_v29  ;;  %v7041_v17 = vld [vmem:[#allocation21 + $0x10] sm:$0xff] }
 0x751   :  { %7254 = vrcp.f32 %v4353_v25 }
 0x752   :  { %v4358_v41 = vsub.f32 %v4356_v11, %v4336_v13  ;;  %v7040_v11 = vld [vmem:[#allocation21 + $0x8] sm:$0xff] }
 0x754   :  { %v4360_v28 = vmul.f32 %v4358_v41, %v4346_v20  ;;  %v7039_v41 = vld [vmem:[#allocation21] sm:$0xff] }
 0x756   :  { %v4362_v46 = vadd.f32 %v4360_v28, %v4336_v13 }
 0x757   :  { %v7255_v42 = vpop.eup %7254 }
 0x758   :  { %v4357_v44 = vmul.f32 %v7255_v42, %v4349_v38 }
 0x75a   :  { %v4359_v26 = vsub.f32 %v4357_v44, %v4338_v43 }
 0x75c   :  { %v4361_v40 = vmul.f32 %v4359_v26, %v4347_v27 }
 0x75e   :  { %v4363_v47 = vadd.f32 %v4361_v40, %v4338_v43  ;;  %v7046_v43 = vld [vmem:[#allocation21 + $0x38] sm:$0xff] }
 0x75f   :  { %4650 = vmatpush.bf16.msrb.mxu2 %v7046_v43 }
 0x760   :  { %v4382_v48 = vpack.c.bf16 %v4363_v47, %v4362_v46 }
 0x762   :  { %4442 = vmatmul.bf16.vlgmr.msrb.gmra.mxu0 %v4382_v48 }
 0x763   :  { %4651 = vmatpush.bf16.msrb.mxu2 %v7045_v45 }
 0x767   :  { %4652 = vmatpush.bf16.msrb.mxu2 %v7044_v0 }
 0x76b   :  { %4653 = vmatpush.bf16.msrb.mxu2 %v7043_v50 }
 0x76f   :  { %4654 = vmatpush.bf16.msrb.mxu2 %v7042_v52 }
 0x773   :  { %4655 = vmatpush.bf16.msrb.mxu2 %v7041_v17 }
 0x777   :  { %4656 = vmatpush.bf16.msrb.mxu2 %v7040_v11 }
 0x77b   :  { %4657 = vmatpush.bf16.msrb.mxu2 %v7039_v41 }
 0x7df   :  { %v4443_v59 = vpop.f32.mrf.mxu0 }
 0x7e0   :  { %v4444_v1 = vadd.f32 %v4443_v59, %v4384_v57 }
 0x7e2   :  { %v4448_v31 = vmul.f32 0.5, %v4444_v1 }
 0x7e4   :  { %7256 = vtanh.f32 %v4448_v31 }
 0x7e7   :  { %v4445_v24 = vpop.f32.mrf.mxu0 }
 0x7e8   :  { %v4446_v36 = vadd.f32 %v4445_v24, %v4384_v57 }
 0x7ea   :  { %v7257_v60 = vpop.eup %7256  ;;  %v4449_v51 = vmul.f32 0.5, %v4446_v36 }
 0x7eb   :  { %v4458_v6 = vmul.f32 %v7257_v60, %v7257_v60  ;;  %v4456_v8 = vmul.f32 2.0, %v7257_v60  ;;  %v4452_v39 = vadd.f32 1.0, %v7257_v60  ;;  %v7053_v60 = vld [vmem:[#allocation22 + $0x30] sm:$0xff] }
 0x7ec   :  { %7258 = vtanh.f32 %v4449_v51  ;;  %v7052_v51 = vld [vmem:[#allocation22 + $0x28] sm:$0xff] }
 0x7ed   :  { %v4460_v32 = vadd.f32 1.0, %v4458_v6  ;;  %v4454_v3 = vmul.f32 0.5, %v4452_v39  ;;  %v7051_v6 = vld [vmem:[#allocation22 + $0x20] sm:$0xff] }
 0x7ef   :  { %7260 = vrcp.f32 %v4460_v32  ;;  %v4597_v32 = vld [vmem:[#allocation24 + $0x24] ss:$8 sm:$0xf] }
 0x7f2   :  { %v7259_v62 = vpop.eup %7258 }
 0x7f3   :  { %v4459_v22 = vmul.f32 %v7259_v62, %v7259_v62  ;;  %v4453_v10 = vadd.f32 1.0, %v7259_v62  ;;  %v4457_v19 = vmul.f32 2.0, %v7259_v62  ;;  %v7050_v62 = vld [vmem:[#allocation22 + $0x18] sm:$0xff] }
 0x7f5   :  { %v7261_v7 = vpop.eup %7260  ;;  %v4461_v53 = vadd.f32 1.0, %v4459_v22  ;;  %v4455_v12 = vmul.f32 0.5, %v4453_v10  ;;  %v4600_v22 = vperm.slane %v4597_v32, 0 }
 0x7f6   :  { %v4464_v63 = vmul.f32 %v7261_v7, %v4456_v8  ;;  %v7049_v7 = vld [vmem:[#allocation22 + $0x10] sm:$0xff] }
 0x7f7   :  { %7262 = vrcp.f32 %v4461_v53 }
 0x7f8   :  { %v4466_v9 = vsub.f32 %v4464_v63, %v4444_v1  ;;  %v7048_v63 = vld [vmem:[#allocation22 + $0x8] sm:$0xff] }
 0x7fa   :  { %v4468_v58 = vmul.f32 %v4466_v9, %v4454_v3  ;;  %v7047_v9 = vld [vmem:[#allocation22] sm:$0xff] }
 0x7fc   :  { %v4470_v14 = vadd.f32 %v4468_v58, %v4444_v1 }
 0x7fd   :  { %v7263_v55 = vpop.eup %7262 }
 0x7fe   :  { %v4465_v16 = vmul.f32 %v7263_v55, %v4457_v19 }
 0x800   :  { %v4467_v13 = vsub.f32 %v4465_v16, %v4446_v36 }
 0x802   :  { %v4469_v56 = vmul.f32 %v4467_v13, %v4455_v12 }
 0x804   :  { %v4471_v21 = vadd.f32 %v4469_v56, %v4446_v36  ;;  %v7054_v36 = vld [vmem:[#allocation22 + $0x38] sm:$0xff] }
 0x805   :  { %4758 = vmatpush.bf16.msrb.mxu3 %v7054_v36 }
 0x806   :  { %v4490_v23 = vpack.c.bf16 %v4471_v21, %v4470_v14 }
 0x808   :  { %4550 = vmatmul.bf16.vlgmr.msrb.gmra.mxu1 %v4490_v23 }
 0x809   :  { %4759 = vmatpush.bf16.msrb.mxu3 %v7053_v60 }
 0x80d   :  { %4760 = vmatpush.bf16.msrb.mxu3 %v7052_v51 }
 0x811   :  { %4761 = vmatpush.bf16.msrb.mxu3 %v7051_v6 }
 0x815   :  { %4762 = vmatpush.bf16.msrb.mxu3 %v7050_v62 }
 0x819   :  { %4763 = vmatpush.bf16.msrb.mxu3 %v7049_v7 }
 0x81d   :  { %4764 = vmatpush.bf16.msrb.mxu3 %v7048_v63 }
 0x821   :  { %4765 = vmatpush.bf16.msrb.mxu3 %v7047_v9 }
 0x885   :  { %v4551_v25 = vpop.f32.mrf.mxu1 }
 0x886   :  { %v4552_v29 = vadd.f32 %v4551_v25, %v4492_v15 }
 0x888   :  { %v4556_v35 = vmul.f32 0.5, %v4552_v29 }
 0x88a   :  { %7264 = vtanh.f32 %v4556_v35 }
 0x88d   :  { %v4553_v30 = vpop.f32.mrf.mxu1 }
 0x88e   :  { %v4554_v38 = vadd.f32 %v4553_v30, %v4492_v15 }
 0x890   :  { %v7265_v42 = vpop.eup %7264  ;;  %v4557_v20 = vmul.f32 0.5, %v4554_v38 }
 0x891   :  { %v4566_v44 = vmul.f32 %v7265_v42, %v7265_v42  ;;  %v4564_v47 = vmul.f32 2.0, %v7265_v42  ;;  %v4560_v2 = vadd.f32 1.0, %v7265_v42 }
 0x892   :  { %7266 = vtanh.f32 %v4557_v20 }
 0x893   :  { %v4568_v28 = vadd.f32 1.0, %v4566_v44  ;;  %v4562_v33 = vmul.f32 0.5, %v4560_v2 }
 0x895   :  { %7268 = vrcp.f32 %v4568_v28 }
 0x898   :  { %v7267_v27 = vpop.eup %7266 }
 0x899   :  { %v4567_v26 = vmul.f32 %v7267_v27, %v7267_v27  ;;  %v4561_v4 = vadd.f32 1.0, %v7267_v27  ;;  %v4565_v49 = vmul.f32 2.0, %v7267_v27 }
 0x89b   :  { %v7269_v40 = vpop.eup %7268  ;;  %v4569_v46 = vadd.f32 1.0, %v4567_v26  ;;  %v4563_v59 = vmul.f32 0.5, %v4561_v4 }
 0x89c   :  { %v4572_v48 = vmul.f32 %v7269_v40, %v4564_v47 }
 0x89d   :  { %7270 = vrcp.f32 %v4569_v46 }
 0x89e   :  { %v4574_v37 = vsub.f32 %v4572_v48, %v4552_v29 }
 0x8a0   :  { %v4576_v54 = vmul.f32 %v4574_v37, %v4562_v33 }
 0x8a2   :  { %v4578_v31 = vadd.f32 %v4576_v54, %v4552_v29 }
 0x8a3   :  { %v7271_v18 = vpop.eup %7270 }
 0x8a4   :  { %v4573_v57 = vmul.f32 %v7271_v18, %v4565_v49 }
 0x8a6   :  { %v4575_v1 = vsub.f32 %v4573_v57, %v4554_v38 }
 0x8a8   :  { %v4577_v5 = vmul.f32 %v4575_v1, %v4563_v59 }
 0x8aa   :  { %v4579_v61 = vadd.f32 %v4577_v5, %v4554_v38  ;;  %v4705_v38 = vld [vmem:[#allocation24 + $0x25] ss:$8 sm:$0xf] }
 0x8ab   :  { %v4708_v42 = vperm.slane %v4705_v38, 0 }
 0x8ac   :  { %v4598_v24 = vpack.c.bf16 %v4579_v61, %v4578_v31 }
 0x8ae   :  { %4658 = vmatmul.bf16.vlgmr.msrb.gmra.mxu2 %v4598_v24 }
 0x931   :  { %v4659_v53 = vpop.f32.mrf.mxu2 }
 0x932   :  { %v4660_v8 = vadd.f32 %v4659_v53, %v4600_v22 }
 0x934   :  { %v4664_v39 = vmul.f32 0.5, %v4660_v8 }
 0x936   :  { %7272 = vtanh.f32 %v4664_v39 }
 0x939   :  { %v4661_v10 = vpop.f32.mrf.mxu2 }
 0x93a   :  { %v4662_v19 = vadd.f32 %v4661_v10, %v4600_v22 }
 0x93c   :  { %v7273_v55 = vpop.eup %7272  ;;  %v4665_v3 = vmul.f32 0.5, %v4662_v19 }
 0x93d   :  { %v4674_v16 = vmul.f32 %v7273_v55, %v7273_v55  ;;  %v4672_v21 = vmul.f32 2.0, %v7273_v55  ;;  %v4668_v43 = vadd.f32 1.0, %v7273_v55 }
 0x93e   :  { %7274 = vtanh.f32 %v4665_v3 }
 0x93f   :  { %v4676_v58 = vadd.f32 1.0, %v4674_v16  ;;  %v4670_v52 = vmul.f32 0.5, %v4668_v43 }
 0x941   :  { %7276 = vrcp.f32 %v4676_v58 }
 0x944   :  { %v7275_v12 = vpop.eup %7274 }
 0x945   :  { %v4675_v13 = vmul.f32 %v7275_v12, %v7275_v12  ;;  %v4669_v0 = vadd.f32 1.0, %v7275_v12  ;;  %v4673_v50 = vmul.f32 2.0, %v7275_v12 }
 0x947   :  { %v7277_v56 = vpop.eup %7276  ;;  %v4677_v14 = vadd.f32 1.0, %v4675_v13  ;;  %v4671_v25 = vmul.f32 0.5, %v4669_v0 }
 0x948   :  { %v4680_v23 = vmul.f32 %v7277_v56, %v4672_v21 }
 0x949   :  { %7278 = vrcp.f32 %v4677_v14 }
 0x94a   :  { %v4682_v45 = vsub.f32 %v4680_v23, %v4660_v8 }
 0x94c   :  { %v4684_v17 = vmul.f32 %v4682_v45, %v4670_v52 }
 0x94e   :  { %v4686_v35 = vadd.f32 %v4684_v17, %v4660_v8 }
 0x94f   :  { %v7279_v34 = vpop.eup %7278 }
 0x950   :  { %v4681_v15 = vmul.f32 %v7279_v34, %v4673_v50 }
 0x952   :  { %v4683_v29 = vsub.f32 %v4681_v15, %v4662_v19 }
 0x954   :  { %v4685_v11 = vmul.f32 %v4683_v29, %v4671_v25 }
 0x956   :  { %v4687_v41 = vadd.f32 %v4685_v11, %v4662_v19 }
 0x958   :  { %v4706_v30 = vpack.c.bf16 %v4687_v41, %v4686_v35 }
 0x95a   :  { %4766 = vmatmul.bf16.vlgmr.msrb.gmra.mxu3 %v4706_v30 }
 0x9dd   :  { %v4767_v20 = vpop.f32.mrf.mxu3 }
 0x9de   :  { %v4768_v44 = vadd.f32 %v4767_v20, %v4708_v42 }
 0x9e0   :  { %v4772_v28 = vmul.f32 0.5, %v4768_v44 }
 0x9e2   :  { %7280 = vtanh.f32 %v4772_v28 }
 0x9e5   :  { %v4769_v27 = vpop.f32.mrf.mxu3 }
 0x9e6   :  { %v4770_v26 = vadd.f32 %v4769_v27, %v4708_v42 }
 0x9e8   :  { %v7281_v40 = vpop.eup %7280  ;;  %v4773_v46 = vmul.f32 0.5, %v4770_v26 }
 0x9e9   :  { %v4782_v47 = vmul.f32 %v7281_v40, %v7281_v40  ;;  %v4776_v4 = vadd.f32 1.0, %v7281_v40  ;;  %v4780_v49 = vmul.f32 2.0, %v7281_v40 }
 0x9ea   :  { %7282 = vtanh.f32 %v4773_v46 }
 0x9eb   :  { %v4784_v48 = vadd.f32 1.0, %v4782_v47  ;;  %v4778_v54 = vmul.f32 0.5, %v4776_v4 }
 0x9ed   :  { %7284 = vrcp.f32 %v4784_v48 }
 0x9f0   :  { %v7283_v2 = vpop.eup %7282 }
 0x9f1   :  { %v4783_v37 = vmul.f32 %v7283_v2, %v7283_v2  ;;  %v4777_v31 = vadd.f32 1.0, %v7283_v2  ;;  %v4781_v61 = vmul.f32 2.0, %v7283_v2 }
 0x9f3   :  { %v7285_v18 = vpop.eup %7284  ;;  %v4785_v33 = vadd.f32 1.0, %v4783_v37  ;;  %v4779_v60 = vmul.f32 0.5, %v4777_v31 }
 0x9f4   :  { %v4788_v57 = vmul.f32 %v7285_v18, %v4780_v49 }
 0x9f5   :  { %7286 = vrcp.f32 %v4785_v33 }
 0x9f6   :  { %v4790_v59 = vsub.f32 %v4788_v57, %v4768_v44 }
 0x9f8   :  { %v4792_v1 = vmul.f32 %v4790_v59, %v4778_v54 }
 0x9fa   :  { %v4794_v5 = vadd.f32 %v4792_v1, %v4768_v44 }
 0x9fb   :  { %v7287_v24 = vpop.eup %7286 }
 0x9fc   :  { %4796 = vst [vmem:[%s8238_s16] sm:$0xff] %v4794_v5  ;;  %v4789_v36 = vmul.f32 %v7287_v24, %v4781_v61 }
 0x9fe   :  { %v4791_v51 = vsub.f32 %v4789_v36, %v4770_v26 }
 0xa00   :  { %v4793_v6 = vmul.f32 %v4791_v51, %v4779_v60 }
 0xa02   :  { %v4795_v32 = vadd.f32 %v4793_v6, %v4770_v26 }
 0xa04   :  { %4797 = vst [vmem:[%s8238_s16 + $0x8] sm:$0xff] %v4795_v32 }
 0xa05   :  { %4802 = vsyncpa [#allocation3], 1 }
 0xa06   :  { %4803 = vsyncpa [#allocation5], 1 }
 0xa07   :  { %4804 = vsyncpa [#allocation8], 1 }
 0xa08   :  { %4805 = vsyncpa [#allocation11], 1 }
 0xa09   :  { %4806 = vsyncpa [#allocation14], 1 }
 0xa0a   :  { %4807 = vsyncpa [#allocation17], 1 }
 0xa0b   :  { %4808 = vsyncpa [#allocation20], 1 }
 0xa0c   :  { %4809 = vsyncpa [#allocation23], 1 }

</bundles_post_ra>
